<compile_context>
chip_gen: v7x
topology: tpu7x:2x2x1
jax: 0.10.0
libtpu: 0.0.40
codegen_flags: <defaults>
</compile_context>

<pallas_src>
import math
import jax
import jax.numpy as jnp
from jax.experimental import pallas as pl

# ---------------- model config (small, synthetic, lane-dense) ----------------
VOCAB = 128
D = 128            # hidden size (full 128-lane width)
NUM_HEADS = 4
HEAD_DIM = D // NUM_HEADS   # 32
FFN = 256          # MLP intermediate size
NUM_LAYERS = 2
NUM_LABELS = 1     # reranker -> single logit, BCEWithLogitsLoss
EPS = 1e-6

B = 2              # batch
S = 16             # sequence length
N = B * S          # flattened (batch * seq) rows carried through the kernel


# ---------------- fused Pallas kernel ----------------
def fused_forward_kernel(x_ref, bias_ref, pool_ref,
                         g1_ref, wq_ref, wk_ref, wv_ref, wo_ref,
                         g2_ref, wg_ref, wu_ref, wd_ref,
                         wcls_ref, bcls_ref, labels_ref,
                         logits_ref, loss_ref):
    """Entire forward pass in ONE pallas_call.

    x_ref:    (N, D)  f32   flattened hidden states (N = B*S)
    bias_ref: (N, N)  f32   additive mask: causal + key-padding + cross-batch block
    pool_ref: (B, N)  f32   one-hot selecting last non-pad token per batch row
    weights:  stacked per layer, bf16 for MXU operands, f32 gammas
    """
    x = x_ref[...]                      # (N, D) f32
    bias = bias_ref[...]                # (N, N) f32
    scale = 1.0 / math.sqrt(HEAD_DIM)

    # Static unroll over the (tiny) layer count: keeps everything resident in
    # VMEM/vregs, single kernel launch, no HBM writeback of intermediates.
    for l in range(NUM_LAYERS):
        # ---- RMSNorm 1 (f32) ----
        xn = x * jax.lax.rsqrt(jnp.mean(x * x, axis=-1, keepdims=True) + EPS)
        xn = (xn * g1_ref[l]).astype(jnp.bfloat16)           # bf16 MXU operand

        # ---- attention: per-head 2-D matmuls over the full flattened batch;
        #      the precomputed block-diagonal bias enforces batch separation,
        #      causality and key padding, so no lane slicing / concatenation.
        attn_out = jnp.zeros((N, D), jnp.float32)
        for h in range(NUM_HEADS):
            qh = jnp.dot(xn, wq_ref[l, h], preferred_element_type=jnp.float32)
            kh = jnp.dot(xn, wk_ref[l, h], preferred_element_type=jnp.float32)
            vh = jnp.dot(xn, wv_ref[l, h], preferred_element_type=jnp.float32)
            s_h = jax.lax.dot_general(
                qh.astype(jnp.bfloat16), kh.astype(jnp.bfloat16),
                (((1,), (1,)), ((), ())),                    # Q @ K^T, no transpose op
                preferred_element_type=jnp.float32) * scale + bias
            s_h = s_h - jnp.max(s_h, axis=-1, keepdims=True)  # f32 softmax
            p = jnp.exp(s_h)
            p = p * pl.reciprocal(jnp.sum(p, axis=-1, keepdims=True), approx=True)
            out_h = jnp.dot(p.astype(jnp.bfloat16), vh.astype(jnp.bfloat16),
                            preferred_element_type=jnp.float32)          # (N, HEAD_DIM)
            # fold the output projection per head -> accumulate full-width (N, D)
            attn_out = attn_out + jnp.dot(out_h.astype(jnp.bfloat16), wo_ref[l, h],
                                          preferred_element_type=jnp.float32)
        x = x + attn_out

        # ---- RMSNorm 2 + SiLU-gated MLP ----
        xn2 = x * jax.lax.rsqrt(jnp.mean(x * x, axis=-1, keepdims=True) + EPS)
        xn2 = (xn2 * g2_ref[l]).astype(jnp.bfloat16)
        gate = jnp.dot(xn2, wg_ref[l], preferred_element_type=jnp.float32)
        up = jnp.dot(xn2, wu_ref[l], preferred_element_type=jnp.float32)
        hidden = ((gate * jax.nn.sigmoid(gate)) * up).astype(jnp.bfloat16)
        x = x + jnp.dot(hidden, wd_ref[l], preferred_element_type=jnp.float32)

    # ---- epilogue: last-non-pad-token pooling + classification head + BCE ----
    pooled = jnp.dot(pool_ref[...], x, preferred_element_type=jnp.float32)    # (B, D)
    logits = jnp.dot(pooled, wcls_ref[...],
                     preferred_element_type=jnp.float32) + bcls_ref[...]      # (B, 1)
    logits_ref[...] = logits

    y = labels_ref[...]
    # numerically-stable BCEWithLogits: max(x,0) - x*y + log1p(exp(-|x|)); mean reduction
    loss_el = (jnp.maximum(logits, 0.0) - logits * y +
               jnp.log1p(jnp.exp(-jnp.abs(logits))))
    loss_ref[...] = jnp.sum(loss_el, keepdims=True) / loss_el.size


# ---------------- host-side helpers (plain JAX glue, fused under jit) ----------------
def build_attn_bias(attention_mask):
    """(N, N) additive bias: 0 where (same batch) & (causal) & (key not padded), else -1e9."""
    m = attention_mask.astype(jnp.float32).reshape(N)            # (N,)
    pos = jnp.arange(N)
    b_of = pos // S
    s_of = pos % S
    same_batch = b_of[:, None] == b_of[None, :]
    causal = s_of[:, None] >= s_of[None, :]
    key_keep = m[None, :] > 0.5
    allowed = same_batch & causal & key_keep
    return jnp.where(allowed, 0.0, -1e9).astype(jnp.float32)     # (N, N)


def build_pool_onehot(attention_mask):
    """(B, N) one-hot selecting the last non-pad token of each batch element."""
    lengths = jnp.sum(attention_mask.astype(jnp.int32), axis=-1)  # (B,)
    # NOTE: a fully-padded row (length 0) clamps to position 0 (documented assumption).
    last = jnp.maximum(lengths - 1, 0)
    flat_idx = jnp.arange(B) * S + last
    return jax.nn.one_hot(flat_idx, N, dtype=jnp.float32)


def init_params(key):
    ks = jax.random.split(key, 10)
    sd = 0.02

    def nrm(k, shape):
        return sd * jax.random.normal(k, shape, jnp.float32)

    return {
        "emb": nrm(ks[0], (VOCAB, D)),
        "g1": jnp.ones((NUM_LAYERS, 1, D), jnp.float32),
        "g2": jnp.ones((NUM_LAYERS, 1, D), jnp.float32),
        # per-head projection weights, bf16 MXU operands
        "wq": nrm(ks[1], (NUM_LAYERS, NUM_HEADS, D, HEAD_DIM)).astype(jnp.bfloat16),
        "wk": nrm(ks[2], (NUM_LAYERS, NUM_HEADS, D, HEAD_DIM)).astype(jnp.bfloat16),
        "wv": nrm(ks[3], (NUM_LAYERS, NUM_HEADS, D, HEAD_DIM)).astype(jnp.bfloat16),
        "wo": nrm(ks[4], (NUM_LAYERS, NUM_HEADS, HEAD_DIM, D)).astype(jnp.bfloat16),
        "wg": nrm(ks[5], (NUM_LAYERS, D, FFN)).astype(jnp.bfloat16),
        "wu": nrm(ks[6], (NUM_LAYERS, D, FFN)).astype(jnp.bfloat16),
        "wd": nrm(ks[7], (NUM_LAYERS, FFN, D)).astype(jnp.bfloat16),
        "w_cls": nrm(ks[8], (D, NUM_LABELS)),
        "b_cls": jnp.zeros((1, NUM_LABELS), jnp.float32),
    }


def forward_train(params, input_ids, attention_mask, labels):
    """Mirrors EediRerankerMiniCPMV1.forward_train:
       returns {'cls_loss', 'outputs': None, 'logits'}."""
    x = jnp.take(params["emb"], input_ids, axis=0)        # (B, S, D) embedding gather (glue)
    x_flat = x.reshape(N, D)
    bias = build_attn_bias(attention_mask)                # (N, N)
    pool = build_pool_onehot(attention_mask)              # (B, N)

    logits, loss = pl.pallas_call(
        fused_forward_kernel,
        out_shape=(jax.ShapeDtypeStruct((B, NUM_LABELS), jnp.float32),
                   jax.ShapeDtypeStruct((1, 1), jnp.float32)),
        # no grid: single invocation, every operand fully VMEM-resident
    )(x_flat, bias, pool,
      params["g1"], params["wq"], params["wk"], params["wv"], params["wo"],
      params["g2"], params["wg"], params["wu"], params["wd"],
      params["w_cls"], params["b_cls"], labels)

    return {"cls_loss": loss[0, 0], "outputs": None, "logits": logits}


if __name__ == "__main__":
    key = jax.random.PRNGKey(0)
    pkey, ikey, lkey = jax.random.split(key, 3)
    params = init_params(pkey)

    input_ids = jax.random.randint(ikey, (B, S), 0, VOCAB, dtype=jnp.int32)
    # second sequence has 4 padding positions at the end
    attention_mask = jnp.stack([
        jnp.ones((S,), jnp.int32),
        jnp.concatenate([jnp.ones((S - 4,), jnp.int32),
                         jnp.zeros((4,), jnp.int32)]),
    ], axis=0)                                            # (B, S)
    labels = jax.random.bernoulli(lkey, 0.5, (B, NUM_LABELS)).astype(jnp.float32)

    fwd = jax.jit(forward_train)
    out = fwd(params, input_ids, attention_mask, labels)
    jax.block_until_ready(out["logits"])
    jax.block_until_ready(out["cls_loss"])
    assert out["logits"].shape == (B, NUM_LABELS)
    assert jnp.isfinite(out["cls_loss"])
    print("KERNEL_OK")
</pallas_src>

<mosaic_0001>
module attributes {stable_mosaic.version = 11 : i64} {
  func.func @fused_forward_kernel(%arg0: memref<32x128xf32, #tpu.memory_space<vmem>>, %arg1: memref<32x32xf32, #tpu.memory_space<vmem>>, %arg2: memref<2x32xf32, #tpu.memory_space<vmem>>, %arg3: memref<2x1x128xf32, #tpu.memory_space<vmem>>, %arg4: memref<2x4x128x32xbf16, #tpu.memory_space<vmem>>, %arg5: memref<2x4x128x32xbf16, #tpu.memory_space<vmem>>, %arg6: memref<2x4x128x32xbf16, #tpu.memory_space<vmem>>, %arg7: memref<2x4x32x128xbf16, #tpu.memory_space<vmem>>, %arg8: memref<2x1x128xf32, #tpu.memory_space<vmem>>, %arg9: memref<2x128x256xbf16, #tpu.memory_space<vmem>>, %arg10: memref<2x128x256xbf16, #tpu.memory_space<vmem>>, %arg11: memref<2x256x128xbf16, #tpu.memory_space<vmem>>, %arg12: memref<128x1xf32, #tpu.memory_space<vmem>>, %arg13: memref<1x1xf32, #tpu.memory_space<vmem>>, %arg14: memref<2x1xf32, #tpu.memory_space<vmem>>, %arg15: memref<2x1xf32, #tpu.memory_space<vmem>>, %arg16: memref<1x1xf32, #tpu.memory_space<vmem>>) attributes {dimension_semantics = [], scalar_prefetch = 0 : i64, scratch_operands = 0 : i64, tpu.core_type = #tpu.core_type<tc>} {
    %c0 = arith.constant 0 : index
    %c0_0 = arith.constant 0 : index
    %0 = vector.load %arg0[%c0, %c0_0] : memref<32x128xf32, #tpu.memory_space<vmem>>, vector<32x128xf32>
    %c0_1 = arith.constant 0 : index
    %c0_2 = arith.constant 0 : index
    %1 = vector.load %arg1[%c0_1, %c0_2] : memref<32x32xf32, #tpu.memory_space<vmem>>, vector<32x32xf32>
    %2 = arith.mulf %0, %0 : vector<32x128xf32>
    %cst = arith.constant dense<0.000000e+00> : vector<32xf32>
    %3 = vector.multi_reduction <add>, %2, %cst [1] : vector<32x128xf32> to vector<32xf32>
    %4 = vector.shape_cast %3 : vector<32xf32> to vector<32x1xf32>
    %cst_3 = arith.constant 1.280000e+02 : f32
    %5 = vector.broadcast %cst_3 : f32 to vector<32x1xf32>
    %6 = arith.divf %4, %5 : vector<32x1xf32>
    %cst_4 = arith.constant 9.99999997E-7 : f32
    %7 = vector.broadcast %cst_4 : f32 to vector<32x1xf32>
    %8 = arith.addf %6, %7 : vector<32x1xf32>
    %9 = math.rsqrt %8 : vector<32x1xf32>
    %10 = vector.broadcast %9 : vector<32x1xf32> to vector<32x128xf32>
    %11 = arith.mulf %0, %10 : vector<32x128xf32>
    %c0_5 = arith.constant 0 : index
    %c0_6 = arith.constant 0 : index
    %c0_7 = arith.constant 0 : index
    %12 = vector.load %arg3[%c0_5, %c0_6, %c0_7] : memref<2x1x128xf32, #tpu.memory_space<vmem>>, vector<1x1x128xf32>
    %13 = vector.shape_cast %12 : vector<1x1x128xf32> to vector<1x128xf32>
    %14 = vector.broadcast %13 : vector<1x128xf32> to vector<32x128xf32>
    %15 = arith.mulf %11, %14 : vector<32x128xf32>
    %16 = arith.truncf %15 : vector<32x128xf32> to vector<32x128xbf16>
    %cst_8 = arith.constant 0.000000e+00 : f32
    %17 = vector.broadcast %cst_8 : f32 to vector<32x128xf32>
    %c0_9 = arith.constant 0 : index
    %c0_10 = arith.constant 0 : index
    %c0_11 = arith.constant 0 : index
    %c0_12 = arith.constant 0 : index
    %18 = vector.load %arg4[%c0_9, %c0_10, %c0_11, %c0_12] : memref<2x4x128x32xbf16, #tpu.memory_space<vmem>>, vector<1x1x128x32xbf16>
    %19 = vector.shape_cast %18 : vector<1x1x128x32xbf16> to vector<128x32xbf16>
    %cst_13 = arith.constant dense<0.000000e+00> : vector<32x32xf32>
    %20 = tpu.matmul %16, %19, %cst_13 {dimension_numbers = #tpu.dot_dimension_numbers<[1], [0], [0], [1], [0, 0, 1, 1], [], []>} : vector<32x128xbf16>, vector<128x32xbf16>, vector<32x32xf32> -> vector<32x32xf32>
    %c0_14 = arith.constant 0 : index
    %c0_15 = arith.constant 0 : index
    %c0_16 = arith.constant 0 : index
    %c0_17 = arith.constant 0 : index
    %21 = vector.load %arg5[%c0_14, %c0_15, %c0_16, %c0_17] : memref<2x4x128x32xbf16, #tpu.memory_space<vmem>>, vector<1x1x128x32xbf16>
    %22 = vector.shape_cast %21 : vector<1x1x128x32xbf16> to vector<128x32xbf16>
    %cst_18 = arith.constant dense<0.000000e+00> : vector<32x32xf32>
    %23 = tpu.matmul %16, %22, %cst_18 {dimension_numbers = #tpu.dot_dimension_numbers<[1], [0], [0], [1], [0, 0, 1, 1], [], []>} : vector<32x128xbf16>, vector<128x32xbf16>, vector<32x32xf32> -> vector<32x32xf32>
    %c0_19 = arith.constant 0 : index
    %c0_20 = arith.constant 0 : index
    %c0_21 = arith.constant 0 : index
    %c0_22 = arith.constant 0 : index
    %24 = vector.load %arg6[%c0_19, %c0_20, %c0_21, %c0_22] : memref<2x4x128x32xbf16, #tpu.memory_space<vmem>>, vector<1x1x128x32xbf16>
    %25 = vector.shape_cast %24 : vector<1x1x128x32xbf16> to vector<128x32xbf16>
    %cst_23 = arith.constant dense<0.000000e+00> : vector<32x32xf32>
    %26 = tpu.matmul %16, %25, %cst_23 {dimension_numbers = #tpu.dot_dimension_numbers<[1], [0], [0], [1], [0, 0, 1, 1], [], []>} : vector<32x128xbf16>, vector<128x32xbf16>, vector<32x32xf32> -> vector<32x32xf32>
    %27 = arith.truncf %20 : vector<32x32xf32> to vector<32x32xbf16>
    %28 = arith.truncf %23 : vector<32x32xf32> to vector<32x32xbf16>
    %cst_24 = arith.constant dense<0.000000e+00> : vector<32x32xf32>
    %29 = tpu.matmul %27, %28, %cst_24 {dimension_numbers = #tpu.dot_dimension_numbers<[1], [1], [0], [0], [0, 0, 1, 0], [], []>} : vector<32x32xbf16>, vector<32x32xbf16>, vector<32x32xf32> -> vector<32x32xf32>
    %cst_25 = arith.constant 0.176776692 : f32
    %30 = vector.broadcast %cst_25 : f32 to vector<32x32xf32>
    %31 = arith.mulf %29, %30 : vector<32x32xf32>
    %32 = arith.addf %31, %1 : vector<32x32xf32>
    %cst_26 = arith.constant dense<0xFF800000> : vector<32xf32>
    %33 = vector.multi_reduction <maximumf>, %32, %cst_26 [1] : vector<32x32xf32> to vector<32xf32>
    %34 = vector.shape_cast %33 : vector<32xf32> to vector<32x1xf32>
    %35 = vector.broadcast %34 : vector<32x1xf32> to vector<32x32xf32>
    %36 = arith.subf %32, %35 : vector<32x32xf32>
    %37 = math.exp %36 : vector<32x32xf32>
    %cst_27 = arith.constant dense<0.000000e+00> : vector<32xf32>
    %38 = vector.multi_reduction <add>, %37, %cst_27 [1] : vector<32x32xf32> to vector<32xf32>
    %39 = vector.shape_cast %38 : vector<32xf32> to vector<32x1xf32>
    %40 = tpu.reciprocal %39 {approx = true} : vector<32x1xf32> -> vector<32x1xf32>
    %41 = vector.broadcast %40 : vector<32x1xf32> to vector<32x32xf32>
    %42 = arith.mulf %37, %41 : vector<32x32xf32>
    %43 = arith.truncf %42 : vector<32x32xf32> to vector<32x32xbf16>
    %44 = arith.truncf %26 : vector<32x32xf32> to vector<32x32xbf16>
    %cst_28 = arith.constant dense<0.000000e+00> : vector<32x32xf32>
    %45 = tpu.matmul %43, %44, %cst_28 {dimension_numbers = #tpu.dot_dimension_numbers<[1], [0], [0], [1], [0, 0, 1, 1], [], []>} : vector<32x32xbf16>, vector<32x32xbf16>, vector<32x32xf32> -> vector<32x32xf32>
    %46 = arith.truncf %45 : vector<32x32xf32> to vector<32x32xbf16>
    %c0_29 = arith.constant 0 : index
    %c0_30 = arith.constant 0 : index
    %c0_31 = arith.constant 0 : index
    %c0_32 = arith.constant 0 : index
    %47 = vector.load %arg7[%c0_29, %c0_30, %c0_31, %c0_32] : memref<2x4x32x128xbf16, #tpu.memory_space<vmem>>, vector<1x1x32x128xbf16>
    %48 = vector.shape_cast %47 : vector<1x1x32x128xbf16> to vector<32x128xbf16>
    %cst_33 = arith.constant dense<0.000000e+00> : vector<32x128xf32>
    %49 = tpu.matmul %46, %48, %cst_33 {dimension_numbers = #tpu.dot_dimension_numbers<[1], [0], [0], [1], [0, 0, 1, 1], [], []>} : vector<32x32xbf16>, vector<32x128xbf16>, vector<32x128xf32> -> vector<32x128xf32>
    %50 = arith.addf %17, %49 : vector<32x128xf32>
    %c0_34 = arith.constant 0 : index
    %c1 = arith.constant 1 : index
    %c0_35 = arith.constant 0 : index
    %c0_36 = arith.constant 0 : index
    %51 = vector.load %arg4[%c0_34, %c1, %c0_35, %c0_36] : memref<2x4x128x32xbf16, #tpu.memory_space<vmem>>, vector<1x1x128x32xbf16>
    %52 = vector.shape_cast %51 : vector<1x1x128x32xbf16> to vector<128x32xbf16>
    %cst_37 = arith.constant dense<0.000000e+00> : vector<32x32xf32>
    %53 = tpu.matmul %16, %52, %cst_37 {dimension_numbers = #tpu.dot_dimension_numbers<[1], [0], [0], [1], [0, 0, 1, 1], [], []>} : vector<32x128xbf16>, vector<128x32xbf16>, vector<32x32xf32> -> vector<32x32xf32>
    %c0_38 = arith.constant 0 : index
    %c1_39 = arith.constant 1 : index
    %c0_40 = arith.constant 0 : index
    %c0_41 = arith.constant 0 : index
    %54 = vector.load %arg5[%c0_38, %c1_39, %c0_40, %c0_41] : memref<2x4x128x32xbf16, #tpu.memory_space<vmem>>, vector<1x1x128x32xbf16>
    %55 = vector.shape_cast %54 : vector<1x1x128x32xbf16> to vector<128x32xbf16>
    %cst_42 = arith.constant dense<0.000000e+00> : vector<32x32xf32>
    %56 = tpu.matmul %16, %55, %cst_42 {dimension_numbers = #tpu.dot_dimension_numbers<[1], [0], [0], [1], [0, 0, 1, 1], [], []>} : vector<32x128xbf16>, vector<128x32xbf16>, vector<32x32xf32> -> vector<32x32xf32>
    %c0_43 = arith.constant 0 : index
    %c1_44 = arith.constant 1 : index
    %c0_45 = arith.constant 0 : index
    %c0_46 = arith.constant 0 : index
    %57 = vector.load %arg6[%c0_43, %c1_44, %c0_45, %c0_46] : memref<2x4x128x32xbf16, #tpu.memory_space<vmem>>, vector<1x1x128x32xbf16>
    %58 = vector.shape_cast %57 : vector<1x1x128x32xbf16> to vector<128x32xbf16>
    %cst_47 = arith.constant dense<0.000000e+00> : vector<32x32xf32>
    %59 = tpu.matmul %16, %58, %cst_47 {dimension_numbers = #tpu.dot_dimension_numbers<[1], [0], [0], [1], [0, 0, 1, 1], [], []>} : vector<32x128xbf16>, vector<128x32xbf16>, vector<32x32xf32> -> vector<32x32xf32>
    %60 = arith.truncf %53 : vector<32x32xf32> to vector<32x32xbf16>
    %61 = arith.truncf %56 : vector<32x32xf32> to vector<32x32xbf16>
    %cst_48 = arith.constant dense<0.000000e+00> : vector<32x32xf32>
    %62 = tpu.matmul %60, %61, %cst_48 {dimension_numbers = #tpu.dot_dimension_numbers<[1], [1], [0], [0], [0, 0, 1, 0], [], []>} : vector<32x32xbf16>, vector<32x32xbf16>, vector<32x32xf32> -> vector<32x32xf32>
    %cst_49 = arith.constant 0.176776692 : f32
    %63 = vector.broadcast %cst_49 : f32 to vector<32x32xf32>
    %64 = arith.mulf %62, %63 : vector<32x32xf32>
    %65 = arith.addf %64, %1 : vector<32x32xf32>
    %cst_50 = arith.constant dense<0xFF800000> : vector<32xf32>
    %66 = vector.multi_reduction <maximumf>, %65, %cst_50 [1] : vector<32x32xf32> to vector<32xf32>
    %67 = vector.shape_cast %66 : vector<32xf32> to vector<32x1xf32>
    %68 = vector.broadcast %67 : vector<32x1xf32> to vector<32x32xf32>
    %69 = arith.subf %65, %68 : vector<32x32xf32>
    %70 = math.exp %69 : vector<32x32xf32>
    %cst_51 = arith.constant dense<0.000000e+00> : vector<32xf32>
    %71 = vector.multi_reduction <add>, %70, %cst_51 [1] : vector<32x32xf32> to vector<32xf32>
    %72 = vector.shape_cast %71 : vector<32xf32> to vector<32x1xf32>
    %73 = tpu.reciprocal %72 {approx = true} : vector<32x1xf32> -> vector<32x1xf32>
    %74 = vector.broadcast %73 : vector<32x1xf32> to vector<32x32xf32>
    %75 = arith.mulf %70, %74 : vector<32x32xf32>
    %76 = arith.truncf %75 : vector<32x32xf32> to vector<32x32xbf16>
    %77 = arith.truncf %59 : vector<32x32xf32> to vector<32x32xbf16>
    %cst_52 = arith.constant dense<0.000000e+00> : vector<32x32xf32>
    %78 = tpu.matmul %76, %77, %cst_52 {dimension_numbers = #tpu.dot_dimension_numbers<[1], [0], [0], [1], [0, 0, 1, 1], [], []>} : vector<32x32xbf16>, vector<32x32xbf16>, vector<32x32xf32> -> vector<32x32xf32>
    %79 = arith.truncf %78 : vector<32x32xf32> to vector<32x32xbf16>
    %c0_53 = arith.constant 0 : index
    %c1_54 = arith.constant 1 : index
    %c0_55 = arith.constant 0 : index
    %c0_56 = arith.constant 0 : index
    %80 = vector.load %arg7[%c0_53, %c1_54, %c0_55, %c0_56] : memref<2x4x32x128xbf16, #tpu.memory_space<vmem>>, vector<1x1x32x128xbf16>
    %81 = vector.shape_cast %80 : vector<1x1x32x128xbf16> to vector<32x128xbf16>
    %cst_57 = arith.constant dense<0.000000e+00> : vector<32x128xf32>
    %82 = tpu.matmul %79, %81, %cst_57 {dimension_numbers = #tpu.dot_dimension_numbers<[1], [0], [0], [1], [0, 0, 1, 1], [], []>} : vector<32x32xbf16>, vector<32x128xbf16>, vector<32x128xf32> -> vector<32x128xf32>
    %83 = arith.addf %50, %82 : vector<32x128xf32>
    %c0_58 = arith.constant 0 : index
    %c2 = arith.constant 2 : index
    %c0_59 = arith.constant 0 : index
    %c0_60 = arith.constant 0 : index
    %84 = vector.load %arg4[%c0_58, %c2, %c0_59, %c0_60] : memref<2x4x128x32xbf16, #tpu.memory_space<vmem>>, vector<1x1x128x32xbf16>
    %85 = vector.shape_cast %84 : vector<1x1x128x32xbf16> to vector<128x32xbf16>
    %cst_61 = arith.constant dense<0.000000e+00> : vector<32x32xf32>
    %86 = tpu.matmul %16, %85, %cst_61 {dimension_numbers = #tpu.dot_dimension_numbers<[1], [0], [0], [1], [0, 0, 1, 1], [], []>} : vector<32x128xbf16>, vector<128x32xbf16>, vector<32x32xf32> -> vector<32x32xf32>
    %c0_62 = arith.constant 0 : index
    %c2_63 = arith.constant 2 : index
    %c0_64 = arith.constant 0 : index
    %c0_65 = arith.constant 0 : index
    %87 = vector.load %arg5[%c0_62, %c2_63, %c0_64, %c0_65] : memref<2x4x128x32xbf16, #tpu.memory_space<vmem>>, vector<1x1x128x32xbf16>
    %88 = vector.shape_cast %87 : vector<1x1x128x32xbf16> to vector<128x32xbf16>
    %cst_66 = arith.constant dense<0.000000e+00> : vector<32x32xf32>
    %89 = tpu.matmul %16, %88, %cst_66 {dimension_numbers = #tpu.dot_dimension_numbers<[1], [0], [0], [1], [0, 0, 1, 1], [], []>} : vector<32x128xbf16>, vector<128x32xbf16>, vector<32x32xf32> -> vector<32x32xf32>
    %c0_67 = arith.constant 0 : index
    %c2_68 = arith.constant 2 : index
    %c0_69 = arith.constant 0 : index
    %c0_70 = arith.constant 0 : index
    %90 = vector.load %arg6[%c0_67, %c2_68, %c0_69, %c0_70] : memref<2x4x128x32xbf16, #tpu.memory_space<vmem>>, vector<1x1x128x32xbf16>
    %91 = vector.shape_cast %90 : vector<1x1x128x32xbf16> to vector<128x32xbf16>
    %cst_71 = arith.constant dense<0.000000e+00> : vector<32x32xf32>
    %92 = tpu.matmul %16, %91, %cst_71 {dimension_numbers = #tpu.dot_dimension_numbers<[1], [0], [0], [1], [0, 0, 1, 1], [], []>} : vector<32x128xbf16>, vector<128x32xbf16>, vector<32x32xf32> -> vector<32x32xf32>
    %93 = arith.truncf %86 : vector<32x32xf32> to vector<32x32xbf16>
    %94 = arith.truncf %89 : vector<32x32xf32> to vector<32x32xbf16>
    %cst_72 = arith.constant dense<0.000000e+00> : vector<32x32xf32>
    %95 = tpu.matmul %93, %94, %cst_72 {dimension_numbers = #tpu.dot_dimension_numbers<[1], [1], [0], [0], [0, 0, 1, 0], [], []>} : vector<32x32xbf16>, vector<32x32xbf16>, vector<32x32xf32> -> vector<32x32xf32>
    %cst_73 = arith.constant 0.176776692 : f32
    %96 = vector.broadcast %cst_73 : f32 to vector<32x32xf32>
    %97 = arith.mulf %95, %96 : vector<32x32xf32>
    %98 = arith.addf %97, %1 : vector<32x32xf32>
    %cst_74 = arith.constant dense<0xFF800000> : vector<32xf32>
    %99 = vector.multi_reduction <maximumf>, %98, %cst_74 [1] : vector<32x32xf32> to vector<32xf32>
    %100 = vector.shape_cast %99 : vector<32xf32> to vector<32x1xf32>
    %101 = vector.broadcast %100 : vector<32x1xf32> to vector<32x32xf32>
    %102 = arith.subf %98, %101 : vector<32x32xf32>
    %103 = math.exp %102 : vector<32x32xf32>
    %cst_75 = arith.constant dense<0.000000e+00> : vector<32xf32>
    %104 = vector.multi_reduction <add>, %103, %cst_75 [1] : vector<32x32xf32> to vector<32xf32>
    %105 = vector.shape_cast %104 : vector<32xf32> to vector<32x1xf32>
    %106 = tpu.reciprocal %105 {approx = true} : vector<32x1xf32> -> vector<32x1xf32>
    %107 = vector.broadcast %106 : vector<32x1xf32> to vector<32x32xf32>
    %108 = arith.mulf %103, %107 : vector<32x32xf32>
    %109 = arith.truncf %108 : vector<32x32xf32> to vector<32x32xbf16>
    %110 = arith.truncf %92 : vector<32x32xf32> to vector<32x32xbf16>
    %cst_76 = arith.constant dense<0.000000e+00> : vector<32x32xf32>
    %111 = tpu.matmul %109, %110, %cst_76 {dimension_numbers = #tpu.dot_dimension_numbers<[1], [0], [0], [1], [0, 0, 1, 1], [], []>} : vector<32x32xbf16>, vector<32x32xbf16>, vector<32x32xf32> -> vector<32x32xf32>
    %112 = arith.truncf %111 : vector<32x32xf32> to vector<32x32xbf16>
    %c0_77 = arith.constant 0 : index
    %c2_78 = arith.constant 2 : index
    %c0_79 = arith.constant 0 : index
    %c0_80 = arith.constant 0 : index
    %113 = vector.load %arg7[%c0_77, %c2_78, %c0_79, %c0_80] : memref<2x4x32x128xbf16, #tpu.memory_space<vmem>>, vector<1x1x32x128xbf16>
    %114 = vector.shape_cast %113 : vector<1x1x32x128xbf16> to vector<32x128xbf16>
    %cst_81 = arith.constant dense<0.000000e+00> : vector<32x128xf32>
    %115 = tpu.matmul %112, %114, %cst_81 {dimension_numbers = #tpu.dot_dimension_numbers<[1], [0], [0], [1], [0, 0, 1, 1], [], []>} : vector<32x32xbf16>, vector<32x128xbf16>, vector<32x128xf32> -> vector<32x128xf32>
    %116 = arith.addf %83, %115 : vector<32x128xf32>
    %c0_82 = arith.constant 0 : index
    %c3 = arith.constant 3 : index
    %c0_83 = arith.constant 0 : index
    %c0_84 = arith.constant 0 : index
    %117 = vector.load %arg4[%c0_82, %c3, %c0_83, %c0_84] : memref<2x4x128x32xbf16, #tpu.memory_space<vmem>>, vector<1x1x128x32xbf16>
    %118 = vector.shape_cast %117 : vector<1x1x128x32xbf16> to vector<128x32xbf16>
    %cst_85 = arith.constant dense<0.000000e+00> : vector<32x32xf32>
    %119 = tpu.matmul %16, %118, %cst_85 {dimension_numbers = #tpu.dot_dimension_numbers<[1], [0], [0], [1], [0, 0, 1, 1], [], []>} : vector<32x128xbf16>, vector<128x32xbf16>, vector<32x32xf32> -> vector<32x32xf32>
    %c0_86 = arith.constant 0 : index
    %c3_87 = arith.constant 3 : index
    %c0_88 = arith.constant 0 : index
    %c0_89 = arith.constant 0 : index
    %120 = vector.load %arg5[%c0_86, %c3_87, %c0_88, %c0_89] : memref<2x4x128x32xbf16, #tpu.memory_space<vmem>>, vector<1x1x128x32xbf16>
    %121 = vector.shape_cast %120 : vector<1x1x128x32xbf16> to vector<128x32xbf16>
    %cst_90 = arith.constant dense<0.000000e+00> : vector<32x32xf32>
    %122 = tpu.matmul %16, %121, %cst_90 {dimension_numbers = #tpu.dot_dimension_numbers<[1], [0], [0], [1], [0, 0, 1, 1], [], []>} : vector<32x128xbf16>, vector<128x32xbf16>, vector<32x32xf32> -> vector<32x32xf32>
    %c0_91 = arith.constant 0 : index
    %c3_92 = arith.constant 3 : index
    %c0_93 = arith.constant 0 : index
    %c0_94 = arith.constant 0 : index
    %123 = vector.load %arg6[%c0_91, %c3_92, %c0_93, %c0_94] : memref<2x4x128x32xbf16, #tpu.memory_space<vmem>>, vector<1x1x128x32xbf16>
    %124 = vector.shape_cast %123 : vector<1x1x128x32xbf16> to vector<128x32xbf16>
    %cst_95 = arith.constant dense<0.000000e+00> : vector<32x32xf32>
    %125 = tpu.matmul %16, %124, %cst_95 {dimension_numbers = #tpu.dot_dimension_numbers<[1], [0], [0], [1], [0, 0, 1, 1], [], []>} : vector<32x128xbf16>, vector<128x32xbf16>, vector<32x32xf32> -> vector<32x32xf32>
    %126 = arith.truncf %119 : vector<32x32xf32> to vector<32x32xbf16>
    %127 = arith.truncf %122 : vector<32x32xf32> to vector<32x32xbf16>
    %cst_96 = arith.constant dense<0.000000e+00> : vector<32x32xf32>
    %128 = tpu.matmul %126, %127, %cst_96 {dimension_numbers = #tpu.dot_dimension_numbers<[1], [1], [0], [0], [0, 0, 1, 0], [], []>} : vector<32x32xbf16>, vector<32x32xbf16>, vector<32x32xf32> -> vector<32x32xf32>
    %cst_97 = arith.constant 0.176776692 : f32
    %129 = vector.broadcast %cst_97 : f32 to vector<32x32xf32>
    %130 = arith.mulf %128, %129 : vector<32x32xf32>
    %131 = arith.addf %130, %1 : vector<32x32xf32>
    %cst_98 = arith.constant dense<0xFF800000> : vector<32xf32>
    %132 = vector.multi_reduction <maximumf>, %131, %cst_98 [1] : vector<32x32xf32> to vector<32xf32>
    %133 = vector.shape_cast %132 : vector<32xf32> to vector<32x1xf32>
    %134 = vector.broadcast %133 : vector<32x1xf32> to vector<32x32xf32>
    %135 = arith.subf %131, %134 : vector<32x32xf32>
    %136 = math.exp %135 : vector<32x32xf32>
    %cst_99 = arith.constant dense<0.000000e+00> : vector<32xf32>
    %137 = vector.multi_reduction <add>, %136, %cst_99 [1] : vector<32x32xf32> to vector<32xf32>
    %138 = vector.shape_cast %137 : vector<32xf32> to vector<32x1xf32>
    %139 = tpu.reciprocal %138 {approx = true} : vector<32x1xf32> -> vector<32x1xf32>
    %140 = vector.broadcast %139 : vector<32x1xf32> to vector<32x32xf32>
    %141 = arith.mulf %136, %140 : vector<32x32xf32>
    %142 = arith.truncf %141 : vector<32x32xf32> to vector<32x32xbf16>
    %143 = arith.truncf %125 : vector<32x32xf32> to vector<32x32xbf16>
    %cst_100 = arith.constant dense<0.000000e+00> : vector<32x32xf32>
    %144 = tpu.matmul %142, %143, %cst_100 {dimension_numbers = #tpu.dot_dimension_numbers<[1], [0], [0], [1], [0, 0, 1, 1], [], []>} : vector<32x32xbf16>, vector<32x32xbf16>, vector<32x32xf32> -> vector<32x32xf32>
    %145 = arith.truncf %144 : vector<32x32xf32> to vector<32x32xbf16>
    %c0_101 = arith.constant 0 : index
    %c3_102 = arith.constant 3 : index
    %c0_103 = arith.constant 0 : index
    %c0_104 = arith.constant 0 : index
    %146 = vector.load %arg7[%c0_101, %c3_102, %c0_103, %c0_104] : memref<2x4x32x128xbf16, #tpu.memory_space<vmem>>, vector<1x1x32x128xbf16>
    %147 = vector.shape_cast %146 : vector<1x1x32x128xbf16> to vector<32x128xbf16>
    %cst_105 = arith.constant dense<0.000000e+00> : vector<32x128xf32>
    %148 = tpu.matmul %145, %147, %cst_105 {dimension_numbers = #tpu.dot_dimension_numbers<[1], [0], [0], [1], [0, 0, 1, 1], [], []>} : vector<32x32xbf16>, vector<32x128xbf16>, vector<32x128xf32> -> vector<32x128xf32>
    %149 = arith.addf %116, %148 : vector<32x128xf32>
    %150 = arith.addf %0, %149 : vector<32x128xf32>
    %151 = arith.mulf %150, %150 : vector<32x128xf32>
    %cst_106 = arith.constant dense<0.000000e+00> : vector<32xf32>
    %152 = vector.multi_reduction <add>, %151, %cst_106 [1] : vector<32x128xf32> to vector<32xf32>
    %153 = vector.shape_cast %152 : vector<32xf32> to vector<32x1xf32>
    %cst_107 = arith.constant 1.280000e+02 : f32
    %154 = vector.broadcast %cst_107 : f32 to vector<32x1xf32>
    %155 = arith.divf %153, %154 : vector<32x1xf32>
    %cst_108 = arith.constant 9.99999997E-7 : f32
    %156 = vector.broadcast %cst_108 : f32 to vector<32x1xf32>
    %157 = arith.addf %155, %156 : vector<32x1xf32>
    %158 = math.rsqrt %157 : vector<32x1xf32>
    %159 = vector.broadcast %158 : vector<32x1xf32> to vector<32x128xf32>
    %160 = arith.mulf %150, %159 : vector<32x128xf32>
    %c0_109 = arith.constant 0 : index
    %c0_110 = arith.constant 0 : index
    %c0_111 = arith.constant 0 : index
    %161 = vector.load %arg8[%c0_109, %c0_110, %c0_111] : memref<2x1x128xf32, #tpu.memory_space<vmem>>, vector<1x1x128xf32>
    %162 = vector.shape_cast %161 : vector<1x1x128xf32> to vector<1x128xf32>
    %163 = vector.broadcast %162 : vector<1x128xf32> to vector<32x128xf32>
    %164 = arith.mulf %160, %163 : vector<32x128xf32>
    %165 = arith.truncf %164 : vector<32x128xf32> to vector<32x128xbf16>
    %c0_112 = arith.constant 0 : index
    %c0_113 = arith.constant 0 : index
    %c0_114 = arith.constant 0 : index
    %166 = vector.load %arg9[%c0_112, %c0_113, %c0_114] : memref<2x128x256xbf16, #tpu.memory_space<vmem>>, vector<1x128x256xbf16>
    %167 = vector.shape_cast %166 : vector<1x128x256xbf16> to vector<128x256xbf16>
    %cst_115 = arith.constant dense<0.000000e+00> : vector<32x256xf32>
    %168 = tpu.matmul %165, %167, %cst_115 {dimension_numbers = #tpu.dot_dimension_numbers<[1], [0], [0], [1], [0, 0, 1, 1], [], []>} : vector<32x128xbf16>, vector<128x256xbf16>, vector<32x256xf32> -> vector<32x256xf32>
    %c0_116 = arith.constant 0 : index
    %c0_117 = arith.constant 0 : index
    %c0_118 = arith.constant 0 : index
    %169 = vector.load %arg10[%c0_116, %c0_117, %c0_118] : memref<2x128x256xbf16, #tpu.memory_space<vmem>>, vector<1x128x256xbf16>
    %170 = vector.shape_cast %169 : vector<1x128x256xbf16> to vector<128x256xbf16>
    %cst_119 = arith.constant dense<0.000000e+00> : vector<32x256xf32>
    %171 = tpu.matmul %165, %170, %cst_119 {dimension_numbers = #tpu.dot_dimension_numbers<[1], [0], [0], [1], [0, 0, 1, 1], [], []>} : vector<32x128xbf16>, vector<128x256xbf16>, vector<32x256xf32> -> vector<32x256xf32>
    %172 = arith.negf %168 : vector<32x256xf32>
    %173 = math.exp %172 : vector<32x256xf32>
    %cst_120 = arith.constant 1.000000e+00 : f32
    %174 = vector.broadcast %cst_120 : f32 to vector<32x256xf32>
    %175 = arith.addf %174, %173 : vector<32x256xf32>
    %176 = arith.divf %174, %175 : vector<32x256xf32>
    %177 = arith.mulf %168, %176 : vector<32x256xf32>
    %178 = arith.mulf %177, %171 : vector<32x256xf32>
    %179 = arith.truncf %178 : vector<32x256xf32> to vector<32x256xbf16>
    %c0_121 = arith.constant 0 : index
    %c0_122 = arith.constant 0 : index
    %c0_123 = arith.constant 0 : index
    %180 = vector.load %arg11[%c0_121, %c0_122, %c0_123] : memref<2x256x128xbf16, #tpu.memory_space<vmem>>, vector<1x256x128xbf16>
    %181 = vector.shape_cast %180 : vector<1x256x128xbf16> to vector<256x128xbf16>
    %cst_124 = arith.constant dense<0.000000e+00> : vector<32x128xf32>
    %182 = tpu.matmul %179, %181, %cst_124 {dimension_numbers = #tpu.dot_dimension_numbers<[1], [0], [0], [1], [0, 0, 1, 1], [], []>} : vector<32x256xbf16>, vector<256x128xbf16>, vector<32x128xf32> -> vector<32x128xf32>
    %183 = arith.addf %150, %182 : vector<32x128xf32>
    %184 = arith.mulf %183, %183 : vector<32x128xf32>
    %cst_125 = arith.constant dense<0.000000e+00> : vector<32xf32>
    %185 = vector.multi_reduction <add>, %184, %cst_125 [1] : vector<32x128xf32> to vector<32xf32>
    %186 = vector.shape_cast %185 : vector<32xf32> to vector<32x1xf32>
    %cst_126 = arith.constant 1.280000e+02 : f32
    %187 = vector.broadcast %cst_126 : f32 to vector<32x1xf32>
    %188 = arith.divf %186, %187 : vector<32x1xf32>
    %cst_127 = arith.constant 9.99999997E-7 : f32
    %189 = vector.broadcast %cst_127 : f32 to vector<32x1xf32>
    %190 = arith.addf %188, %189 : vector<32x1xf32>
    %191 = math.rsqrt %190 : vector<32x1xf32>
    %192 = vector.broadcast %191 : vector<32x1xf32> to vector<32x128xf32>
    %193 = arith.mulf %183, %192 : vector<32x128xf32>
    %c1_128 = arith.constant 1 : index
    %c0_129 = arith.constant 0 : index
    %c0_130 = arith.constant 0 : index
    %194 = vector.load %arg3[%c1_128, %c0_129, %c0_130] : memref<2x1x128xf32, #tpu.memory_space<vmem>>, vector<1x1x128xf32>
    %195 = vector.shape_cast %194 : vector<1x1x128xf32> to vector<1x128xf32>
    %196 = vector.broadcast %195 : vector<1x128xf32> to vector<32x128xf32>
    %197 = arith.mulf %193, %196 : vector<32x128xf32>
    %198 = arith.truncf %197 : vector<32x128xf32> to vector<32x128xbf16>
    %cst_131 = arith.constant 0.000000e+00 : f32
    %199 = vector.broadcast %cst_131 : f32 to vector<32x128xf32>
    %c1_132 = arith.constant 1 : index
    %c0_133 = arith.constant 0 : index
    %c0_134 = arith.constant 0 : index
    %c0_135 = arith.constant 0 : index
    %200 = vector.load %arg4[%c1_132, %c0_133, %c0_134, %c0_135] : memref<2x4x128x32xbf16, #tpu.memory_space<vmem>>, vector<1x1x128x32xbf16>
    %201 = vector.shape_cast %200 : vector<1x1x128x32xbf16> to vector<128x32xbf16>
    %cst_136 = arith.constant dense<0.000000e+00> : vector<32x32xf32>
    %202 = tpu.matmul %198, %201, %cst_136 {dimension_numbers = #tpu.dot_dimension_numbers<[1], [0], [0], [1], [0, 0, 1, 1], [], []>} : vector<32x128xbf16>, vector<128x32xbf16>, vector<32x32xf32> -> vector<32x32xf32>
    %c1_137 = arith.constant 1 : index
    %c0_138 = arith.constant 0 : index
    %c0_139 = arith.constant 0 : index
    %c0_140 = arith.constant 0 : index
    %203 = vector.load %arg5[%c1_137, %c0_138, %c0_139, %c0_140] : memref<2x4x128x32xbf16, #tpu.memory_space<vmem>>, vector<1x1x128x32xbf16>
    %204 = vector.shape_cast %203 : vector<1x1x128x32xbf16> to vector<128x32xbf16>
    %cst_141 = arith.constant dense<0.000000e+00> : vector<32x32xf32>
    %205 = tpu.matmul %198, %204, %cst_141 {dimension_numbers = #tpu.dot_dimension_numbers<[1], [0], [0], [1], [0, 0, 1, 1], [], []>} : vector<32x128xbf16>, vector<128x32xbf16>, vector<32x32xf32> -> vector<32x32xf32>
    %c1_142 = arith.constant 1 : index
    %c0_143 = arith.constant 0 : index
    %c0_144 = arith.constant 0 : index
    %c0_145 = arith.constant 0 : index
    %206 = vector.load %arg6[%c1_142, %c0_143, %c0_144, %c0_145] : memref<2x4x128x32xbf16, #tpu.memory_space<vmem>>, vector<1x1x128x32xbf16>
    %207 = vector.shape_cast %206 : vector<1x1x128x32xbf16> to vector<128x32xbf16>
    %cst_146 = arith.constant dense<0.000000e+00> : vector<32x32xf32>
    %208 = tpu.matmul %198, %207, %cst_146 {dimension_numbers = #tpu.dot_dimension_numbers<[1], [0], [0], [1], [0, 0, 1, 1], [], []>} : vector<32x128xbf16>, vector<128x32xbf16>, vector<32x32xf32> -> vector<32x32xf32>
    %209 = arith.truncf %202 : vector<32x32xf32> to vector<32x32xbf16>
    %210 = arith.truncf %205 : vector<32x32xf32> to vector<32x32xbf16>
    %cst_147 = arith.constant dense<0.000000e+00> : vector<32x32xf32>
    %211 = tpu.matmul %209, %210, %cst_147 {dimension_numbers = #tpu.dot_dimension_numbers<[1], [1], [0], [0], [0, 0, 1, 0], [], []>} : vector<32x32xbf16>, vector<32x32xbf16>, vector<32x32xf32> -> vector<32x32xf32>
    %cst_148 = arith.constant 0.176776692 : f32
    %212 = vector.broadcast %cst_148 : f32 to vector<32x32xf32>
    %213 = arith.mulf %211, %212 : vector<32x32xf32>
    %214 = arith.addf %213, %1 : vector<32x32xf32>
    %cst_149 = arith.constant dense<0xFF800000> : vector<32xf32>
    %215 = vector.multi_reduction <maximumf>, %214, %cst_149 [1] : vector<32x32xf32> to vector<32xf32>
    %216 = vector.shape_cast %215 : vector<32xf32> to vector<32x1xf32>
    %217 = vector.broadcast %216 : vector<32x1xf32> to vector<32x32xf32>
    %218 = arith.subf %214, %217 : vector<32x32xf32>
    %219 = math.exp %218 : vector<32x32xf32>
    %cst_150 = arith.constant dense<0.000000e+00> : vector<32xf32>
    %220 = vector.multi_reduction <add>, %219, %cst_150 [1] : vector<32x32xf32> to vector<32xf32>
    %221 = vector.shape_cast %220 : vector<32xf32> to vector<32x1xf32>
    %222 = tpu.reciprocal %221 {approx = true} : vector<32x1xf32> -> vector<32x1xf32>
    %223 = vector.broadcast %222 : vector<32x1xf32> to vector<32x32xf32>
    %224 = arith.mulf %219, %223 : vector<32x32xf32>
    %225 = arith.truncf %224 : vector<32x32xf32> to vector<32x32xbf16>
    %226 = arith.truncf %208 : vector<32x32xf32> to vector<32x32xbf16>
    %cst_151 = arith.constant dense<0.000000e+00> : vector<32x32xf32>
    %227 = tpu.matmul %225, %226, %cst_151 {dimension_numbers = #tpu.dot_dimension_numbers<[1], [0], [0], [1], [0, 0, 1, 1], [], []>} : vector<32x32xbf16>, vector<32x32xbf16>, vector<32x32xf32> -> vector<32x32xf32>
    %228 = arith.truncf %227 : vector<32x32xf32> to vector<32x32xbf16>
    %c1_152 = arith.constant 1 : index
    %c0_153 = arith.constant 0 : index
    %c0_154 = arith.constant 0 : index
    %c0_155 = arith.constant 0 : index
    %229 = vector.load %arg7[%c1_152, %c0_153, %c0_154, %c0_155] : memref<2x4x32x128xbf16, #tpu.memory_space<vmem>>, vector<1x1x32x128xbf16>
    %230 = vector.shape_cast %229 : vector<1x1x32x128xbf16> to vector<32x128xbf16>
    %cst_156 = arith.constant dense<0.000000e+00> : vector<32x128xf32>
    %231 = tpu.matmul %228, %230, %cst_156 {dimension_numbers = #tpu.dot_dimension_numbers<[1], [0], [0], [1], [0, 0, 1, 1], [], []>} : vector<32x32xbf16>, vector<32x128xbf16>, vector<32x128xf32> -> vector<32x128xf32>
    %232 = arith.addf %199, %231 : vector<32x128xf32>
    %c1_157 = arith.constant 1 : index
    %c1_158 = arith.constant 1 : index
    %c0_159 = arith.constant 0 : index
    %c0_160 = arith.constant 0 : index
    %233 = vector.load %arg4[%c1_157, %c1_158, %c0_159, %c0_160] : memref<2x4x128x32xbf16, #tpu.memory_space<vmem>>, vector<1x1x128x32xbf16>
    %234 = vector.shape_cast %233 : vector<1x1x128x32xbf16> to vector<128x32xbf16>
    %cst_161 = arith.constant dense<0.000000e+00> : vector<32x32xf32>
    %235 = tpu.matmul %198, %234, %cst_161 {dimension_numbers = #tpu.dot_dimension_numbers<[1], [0], [0], [1], [0, 0, 1, 1], [], []>} : vector<32x128xbf16>, vector<128x32xbf16>, vector<32x32xf32> -> vector<32x32xf32>
    %c1_162 = arith.constant 1 : index
    %c1_163 = arith.constant 1 : index
    %c0_164 = arith.constant 0 : index
    %c0_165 = arith.constant 0 : index
    %236 = vector.load %arg5[%c1_162, %c1_163, %c0_164, %c0_165] : memref<2x4x128x32xbf16, #tpu.memory_space<vmem>>, vector<1x1x128x32xbf16>
    %237 = vector.shape_cast %236 : vector<1x1x128x32xbf16> to vector<128x32xbf16>
    %cst_166 = arith.constant dense<0.000000e+00> : vector<32x32xf32>
    %238 = tpu.matmul %198, %237, %cst_166 {dimension_numbers = #tpu.dot_dimension_numbers<[1], [0], [0], [1], [0, 0, 1, 1], [], []>} : vector<32x128xbf16>, vector<128x32xbf16>, vector<32x32xf32> -> vector<32x32xf32>
    %c1_167 = arith.constant 1 : index
    %c1_168 = arith.constant 1 : index
    %c0_169 = arith.constant 0 : index
    %c0_170 = arith.constant 0 : index
    %239 = vector.load %arg6[%c1_167, %c1_168, %c0_169, %c0_170] : memref<2x4x128x32xbf16, #tpu.memory_space<vmem>>, vector<1x1x128x32xbf16>
    %240 = vector.shape_cast %239 : vector<1x1x128x32xbf16> to vector<128x32xbf16>
    %cst_171 = arith.constant dense<0.000000e+00> : vector<32x32xf32>
    %241 = tpu.matmul %198, %240, %cst_171 {dimension_numbers = #tpu.dot_dimension_numbers<[1], [0], [0], [1], [0, 0, 1, 1], [], []>} : vector<32x128xbf16>, vector<128x32xbf16>, vector<32x32xf32> -> vector<32x32xf32>
    %242 = arith.truncf %235 : vector<32x32xf32> to vector<32x32xbf16>
    %243 = arith.truncf %238 : vector<32x32xf32> to vector<32x32xbf16>
    %cst_172 = arith.constant dense<0.000000e+00> : vector<32x32xf32>
    %244 = tpu.matmul %242, %243, %cst_172 {dimension_numbers = #tpu.dot_dimension_numbers<[1], [1], [0], [0], [0, 0, 1, 0], [], []>} : vector<32x32xbf16>, vector<32x32xbf16>, vector<32x32xf32> -> vector<32x32xf32>
    %cst_173 = arith.constant 0.176776692 : f32
    %245 = vector.broadcast %cst_173 : f32 to vector<32x32xf32>
    %246 = arith.mulf %244, %245 : vector<32x32xf32>
    %247 = arith.addf %246, %1 : vector<32x32xf32>
    %cst_174 = arith.constant dense<0xFF800000> : vector<32xf32>
    %248 = vector.multi_reduction <maximumf>, %247, %cst_174 [1] : vector<32x32xf32> to vector<32xf32>
    %249 = vector.shape_cast %248 : vector<32xf32> to vector<32x1xf32>
    %250 = vector.broadcast %249 : vector<32x1xf32> to vector<32x32xf32>
    %251 = arith.subf %247, %250 : vector<32x32xf32>
    %252 = math.exp %251 : vector<32x32xf32>
    %cst_175 = arith.constant dense<0.000000e+00> : vector<32xf32>
    %253 = vector.multi_reduction <add>, %252, %cst_175 [1] : vector<32x32xf32> to vector<32xf32>
    %254 = vector.shape_cast %253 : vector<32xf32> to vector<32x1xf32>
    %255 = tpu.reciprocal %254 {approx = true} : vector<32x1xf32> -> vector<32x1xf32>
    %256 = vector.broadcast %255 : vector<32x1xf32> to vector<32x32xf32>
    %257 = arith.mulf %252, %256 : vector<32x32xf32>
    %258 = arith.truncf %257 : vector<32x32xf32> to vector<32x32xbf16>
    %259 = arith.truncf %241 : vector<32x32xf32> to vector<32x32xbf16>
    %cst_176 = arith.constant dense<0.000000e+00> : vector<32x32xf32>
    %260 = tpu.matmul %258, %259, %cst_176 {dimension_numbers = #tpu.dot_dimension_numbers<[1], [0], [0], [1], [0, 0, 1, 1], [], []>} : vector<32x32xbf16>, vector<32x32xbf16>, vector<32x32xf32> -> vector<32x32xf32>
    %261 = arith.truncf %260 : vector<32x32xf32> to vector<32x32xbf16>
    %c1_177 = arith.constant 1 : index
    %c1_178 = arith.constant 1 : index
    %c0_179 = arith.constant 0 : index
    %c0_180 = arith.constant 0 : index
    %262 = vector.load %arg7[%c1_177, %c1_178, %c0_179, %c0_180] : memref<2x4x32x128xbf16, #tpu.memory_space<vmem>>, vector<1x1x32x128xbf16>
    %263 = vector.shape_cast %262 : vector<1x1x32x128xbf16> to vector<32x128xbf16>
    %cst_181 = arith.constant dense<0.000000e+00> : vector<32x128xf32>
    %264 = tpu.matmul %261, %263, %cst_181 {dimension_numbers = #tpu.dot_dimension_numbers<[1], [0], [0], [1], [0, 0, 1, 1], [], []>} : vector<32x32xbf16>, vector<32x128xbf16>, vector<32x128xf32> -> vector<32x128xf32>
    %265 = arith.addf %232, %264 : vector<32x128xf32>
    %c1_182 = arith.constant 1 : index
    %c2_183 = arith.constant 2 : index
    %c0_184 = arith.constant 0 : index
    %c0_185 = arith.constant 0 : index
    %266 = vector.load %arg4[%c1_182, %c2_183, %c0_184, %c0_185] : memref<2x4x128x32xbf16, #tpu.memory_space<vmem>>, vector<1x1x128x32xbf16>
    %267 = vector.shape_cast %266 : vector<1x1x128x32xbf16> to vector<128x32xbf16>
    %cst_186 = arith.constant dense<0.000000e+00> : vector<32x32xf32>
    %268 = tpu.matmul %198, %267, %cst_186 {dimension_numbers = #tpu.dot_dimension_numbers<[1], [0], [0], [1], [0, 0, 1, 1], [], []>} : vector<32x128xbf16>, vector<128x32xbf16>, vector<32x32xf32> -> vector<32x32xf32>
    %c1_187 = arith.constant 1 : index
    %c2_188 = arith.constant 2 : index
    %c0_189 = arith.constant 0 : index
    %c0_190 = arith.constant 0 : index
    %269 = vector.load %arg5[%c1_187, %c2_188, %c0_189, %c0_190] : memref<2x4x128x32xbf16, #tpu.memory_space<vmem>>, vector<1x1x128x32xbf16>
    %270 = vector.shape_cast %269 : vector<1x1x128x32xbf16> to vector<128x32xbf16>
    %cst_191 = arith.constant dense<0.000000e+00> : vector<32x32xf32>
    %271 = tpu.matmul %198, %270, %cst_191 {dimension_numbers = #tpu.dot_dimension_numbers<[1], [0], [0], [1], [0, 0, 1, 1], [], []>} : vector<32x128xbf16>, vector<128x32xbf16>, vector<32x32xf32> -> vector<32x32xf32>
    %c1_192 = arith.constant 1 : index
    %c2_193 = arith.constant 2 : index
    %c0_194 = arith.constant 0 : index
    %c0_195 = arith.constant 0 : index
    %272 = vector.load %arg6[%c1_192, %c2_193, %c0_194, %c0_195] : memref<2x4x128x32xbf16, #tpu.memory_space<vmem>>, vector<1x1x128x32xbf16>
    %273 = vector.shape_cast %272 : vector<1x1x128x32xbf16> to vector<128x32xbf16>
    %cst_196 = arith.constant dense<0.000000e+00> : vector<32x32xf32>
    %274 = tpu.matmul %198, %273, %cst_196 {dimension_numbers = #tpu.dot_dimension_numbers<[1], [0], [0], [1], [0, 0, 1, 1], [], []>} : vector<32x128xbf16>, vector<128x32xbf16>, vector<32x32xf32> -> vector<32x32xf32>
    %275 = arith.truncf %268 : vector<32x32xf32> to vector<32x32xbf16>
    %276 = arith.truncf %271 : vector<32x32xf32> to vector<32x32xbf16>
    %cst_197 = arith.constant dense<0.000000e+00> : vector<32x32xf32>
    %277 = tpu.matmul %275, %276, %cst_197 {dimension_numbers = #tpu.dot_dimension_numbers<[1], [1], [0], [0], [0, 0, 1, 0], [], []>} : vector<32x32xbf16>, vector<32x32xbf16>, vector<32x32xf32> -> vector<32x32xf32>
    %cst_198 = arith.constant 0.176776692 : f32
    %278 = vector.broadcast %cst_198 : f32 to vector<32x32xf32>
    %279 = arith.mulf %277, %278 : vector<32x32xf32>
    %280 = arith.addf %279, %1 : vector<32x32xf32>
    %cst_199 = arith.constant dense<0xFF800000> : vector<32xf32>
    %281 = vector.multi_reduction <maximumf>, %280, %cst_199 [1] : vector<32x32xf32> to vector<32xf32>
    %282 = vector.shape_cast %281 : vector<32xf32> to vector<32x1xf32>
    %283 = vector.broadcast %282 : vector<32x1xf32> to vector<32x32xf32>
    %284 = arith.subf %280, %283 : vector<32x32xf32>
    %285 = math.exp %284 : vector<32x32xf32>
    %cst_200 = arith.constant dense<0.000000e+00> : vector<32xf32>
    %286 = vector.multi_reduction <add>, %285, %cst_200 [1] : vector<32x32xf32> to vector<32xf32>
    %287 = vector.shape_cast %286 : vector<32xf32> to vector<32x1xf32>
    %288 = tpu.reciprocal %287 {approx = true} : vector<32x1xf32> -> vector<32x1xf32>
    %289 = vector.broadcast %288 : vector<32x1xf32> to vector<32x32xf32>
    %290 = arith.mulf %285, %289 : vector<32x32xf32>
    %291 = arith.truncf %290 : vector<32x32xf32> to vector<32x32xbf16>
    %292 = arith.truncf %274 : vector<32x32xf32> to vector<32x32xbf16>
    %cst_201 = arith.constant dense<0.000000e+00> : vector<32x32xf32>
    %293 = tpu.matmul %291, %292, %cst_201 {dimension_numbers = #tpu.dot_dimension_numbers<[1], [0], [0], [1], [0, 0, 1, 1], [], []>} : vector<32x32xbf16>, vector<32x32xbf16>, vector<32x32xf32> -> vector<32x32xf32>
    %294 = arith.truncf %293 : vector<32x32xf32> to vector<32x32xbf16>
    %c1_202 = arith.constant 1 : index
    %c2_203 = arith.constant 2 : index
    %c0_204 = arith.constant 0 : index
    %c0_205 = arith.constant 0 : index
    %295 = vector.load %arg7[%c1_202, %c2_203, %c0_204, %c0_205] : memref<2x4x32x128xbf16, #tpu.memory_space<vmem>>, vector<1x1x32x128xbf16>
    %296 = vector.shape_cast %295 : vector<1x1x32x128xbf16> to vector<32x128xbf16>
    %cst_206 = arith.constant dense<0.000000e+00> : vector<32x128xf32>
    %297 = tpu.matmul %294, %296, %cst_206 {dimension_numbers = #tpu.dot_dimension_numbers<[1], [0], [0], [1], [0, 0, 1, 1], [], []>} : vector<32x32xbf16>, vector<32x128xbf16>, vector<32x128xf32> -> vector<32x128xf32>
    %298 = arith.addf %265, %297 : vector<32x128xf32>
    %c1_207 = arith.constant 1 : index
    %c3_208 = arith.constant 3 : index
    %c0_209 = arith.constant 0 : index
    %c0_210 = arith.constant 0 : index
    %299 = vector.load %arg4[%c1_207, %c3_208, %c0_209, %c0_210] : memref<2x4x128x32xbf16, #tpu.memory_space<vmem>>, vector<1x1x128x32xbf16>
    %300 = vector.shape_cast %299 : vector<1x1x128x32xbf16> to vector<128x32xbf16>
    %cst_211 = arith.constant dense<0.000000e+00> : vector<32x32xf32>
    %301 = tpu.matmul %198, %300, %cst_211 {dimension_numbers = #tpu.dot_dimension_numbers<[1], [0], [0], [1], [0, 0, 1, 1], [], []>} : vector<32x128xbf16>, vector<128x32xbf16>, vector<32x32xf32> -> vector<32x32xf32>
    %c1_212 = arith.constant 1 : index
    %c3_213 = arith.constant 3 : index
    %c0_214 = arith.constant 0 : index
    %c0_215 = arith.constant 0 : index
    %302 = vector.load %arg5[%c1_212, %c3_213, %c0_214, %c0_215] : memref<2x4x128x32xbf16, #tpu.memory_space<vmem>>, vector<1x1x128x32xbf16>
    %303 = vector.shape_cast %302 : vector<1x1x128x32xbf16> to vector<128x32xbf16>
    %cst_216 = arith.constant dense<0.000000e+00> : vector<32x32xf32>
    %304 = tpu.matmul %198, %303, %cst_216 {dimension_numbers = #tpu.dot_dimension_numbers<[1], [0], [0], [1], [0, 0, 1, 1], [], []>} : vector<32x128xbf16>, vector<128x32xbf16>, vector<32x32xf32> -> vector<32x32xf32>
    %c1_217 = arith.constant 1 : index
    %c3_218 = arith.constant 3 : index
    %c0_219 = arith.constant 0 : index
    %c0_220 = arith.constant 0 : index
    %305 = vector.load %arg6[%c1_217, %c3_218, %c0_219, %c0_220] : memref<2x4x128x32xbf16, #tpu.memory_space<vmem>>, vector<1x1x128x32xbf16>
    %306 = vector.shape_cast %305 : vector<1x1x128x32xbf16> to vector<128x32xbf16>
    %cst_221 = arith.constant dense<0.000000e+00> : vector<32x32xf32>
    %307 = tpu.matmul %198, %306, %cst_221 {dimension_numbers = #tpu.dot_dimension_numbers<[1], [0], [0], [1], [0, 0, 1, 1], [], []>} : vector<32x128xbf16>, vector<128x32xbf16>, vector<32x32xf32> -> vector<32x32xf32>
    %308 = arith.truncf %301 : vector<32x32xf32> to vector<32x32xbf16>
    %309 = arith.truncf %304 : vector<32x32xf32> to vector<32x32xbf16>
    %cst_222 = arith.constant dense<0.000000e+00> : vector<32x32xf32>
    %310 = tpu.matmul %308, %309, %cst_222 {dimension_numbers = #tpu.dot_dimension_numbers<[1], [1], [0], [0], [0, 0, 1, 0], [], []>} : vector<32x32xbf16>, vector<32x32xbf16>, vector<32x32xf32> -> vector<32x32xf32>
    %cst_223 = arith.constant 0.176776692 : f32
    %311 = vector.broadcast %cst_223 : f32 to vector<32x32xf32>
    %312 = arith.mulf %310, %311 : vector<32x32xf32>
    %313 = arith.addf %312, %1 : vector<32x32xf32>
    %cst_224 = arith.constant dense<0xFF800000> : vector<32xf32>
    %314 = vector.multi_reduction <maximumf>, %313, %cst_224 [1] : vector<32x32xf32> to vector<32xf32>
    %315 = vector.shape_cast %314 : vector<32xf32> to vector<32x1xf32>
    %316 = vector.broadcast %315 : vector<32x1xf32> to vector<32x32xf32>
    %317 = arith.subf %313, %316 : vector<32x32xf32>
    %318 = math.exp %317 : vector<32x32xf32>
    %cst_225 = arith.constant dense<0.000000e+00> : vector<32xf32>
    %319 = vector.multi_reduction <add>, %318, %cst_225 [1] : vector<32x32xf32> to vector<32xf32>
    %320 = vector.shape_cast %319 : vector<32xf32> to vector<32x1xf32>
    %321 = tpu.reciprocal %320 {approx = true} : vector<32x1xf32> -> vector<32x1xf32>
    %322 = vector.broadcast %321 : vector<32x1xf32> to vector<32x32xf32>
    %323 = arith.mulf %318, %322 : vector<32x32xf32>
    %324 = arith.truncf %323 : vector<32x32xf32> to vector<32x32xbf16>
    %325 = arith.truncf %307 : vector<32x32xf32> to vector<32x32xbf16>
    %cst_226 = arith.constant dense<0.000000e+00> : vector<32x32xf32>
    %326 = tpu.matmul %324, %325, %cst_226 {dimension_numbers = #tpu.dot_dimension_numbers<[1], [0], [0], [1], [0, 0, 1, 1], [], []>} : vector<32x32xbf16>, vector<32x32xbf16>, vector<32x32xf32> -> vector<32x32xf32>
    %327 = arith.truncf %326 : vector<32x32xf32> to vector<32x32xbf16>
    %c1_227 = arith.constant 1 : index
    %c3_228 = arith.constant 3 : index
    %c0_229 = arith.constant 0 : index
    %c0_230 = arith.constant 0 : index
    %328 = vector.load %arg7[%c1_227, %c3_228, %c0_229, %c0_230] : memref<2x4x32x128xbf16, #tpu.memory_space<vmem>>, vector<1x1x32x128xbf16>
    %329 = vector.shape_cast %328 : vector<1x1x32x128xbf16> to vector<32x128xbf16>
    %cst_231 = arith.constant dense<0.000000e+00> : vector<32x128xf32>
    %330 = tpu.matmul %327, %329, %cst_231 {dimension_numbers = #tpu.dot_dimension_numbers<[1], [0], [0], [1], [0, 0, 1, 1], [], []>} : vector<32x32xbf16>, vector<32x128xbf16>, vector<32x128xf32> -> vector<32x128xf32>
    %331 = arith.addf %298, %330 : vector<32x128xf32>
    %332 = arith.addf %183, %331 : vector<32x128xf32>
    %333 = arith.mulf %332, %332 : vector<32x128xf32>
    %cst_232 = arith.constant dense<0.000000e+00> : vector<32xf32>
    %334 = vector.multi_reduction <add>, %333, %cst_232 [1] : vector<32x128xf32> to vector<32xf32>
    %335 = vector.shape_cast %334 : vector<32xf32> to vector<32x1xf32>
    %cst_233 = arith.constant 1.280000e+02 : f32
    %336 = vector.broadcast %cst_233 : f32 to vector<32x1xf32>
    %337 = arith.divf %335, %336 : vector<32x1xf32>
    %cst_234 = arith.constant 9.99999997E-7 : f32
    %338 = vector.broadcast %cst_234 : f32 to vector<32x1xf32>
    %339 = arith.addf %337, %338 : vector<32x1xf32>
    %340 = math.rsqrt %339 : vector<32x1xf32>
    %341 = vector.broadcast %340 : vector<32x1xf32> to vector<32x128xf32>
    %342 = arith.mulf %332, %341 : vector<32x128xf32>
    %c1_235 = arith.constant 1 : index
    %c0_236 = arith.constant 0 : index
    %c0_237 = arith.constant 0 : index
    %343 = vector.load %arg8[%c1_235, %c0_236, %c0_237] : memref<2x1x128xf32, #tpu.memory_space<vmem>>, vector<1x1x128xf32>
    %344 = vector.shape_cast %343 : vector<1x1x128xf32> to vector<1x128xf32>
    %345 = vector.broadcast %344 : vector<1x128xf32> to vector<32x128xf32>
    %346 = arith.mulf %342, %345 : vector<32x128xf32>
    %347 = arith.truncf %346 : vector<32x128xf32> to vector<32x128xbf16>
    %c1_238 = arith.constant 1 : index
    %c0_239 = arith.constant 0 : index
    %c0_240 = arith.constant 0 : index
    %348 = vector.load %arg9[%c1_238, %c0_239, %c0_240] : memref<2x128x256xbf16, #tpu.memory_space<vmem>>, vector<1x128x256xbf16>
    %349 = vector.shape_cast %348 : vector<1x128x256xbf16> to vector<128x256xbf16>
    %cst_241 = arith.constant dense<0.000000e+00> : vector<32x256xf32>
    %350 = tpu.matmul %347, %349, %cst_241 {dimension_numbers = #tpu.dot_dimension_numbers<[1], [0], [0], [1], [0, 0, 1, 1], [], []>} : vector<32x128xbf16>, vector<128x256xbf16>, vector<32x256xf32> -> vector<32x256xf32>
    %c1_242 = arith.constant 1 : index
    %c0_243 = arith.constant 0 : index
    %c0_244 = arith.constant 0 : index
    %351 = vector.load %arg10[%c1_242, %c0_243, %c0_244] : memref<2x128x256xbf16, #tpu.memory_space<vmem>>, vector<1x128x256xbf16>
    %352 = vector.shape_cast %351 : vector<1x128x256xbf16> to vector<128x256xbf16>
    %cst_245 = arith.constant dense<0.000000e+00> : vector<32x256xf32>
    %353 = tpu.matmul %347, %352, %cst_245 {dimension_numbers = #tpu.dot_dimension_numbers<[1], [0], [0], [1], [0, 0, 1, 1], [], []>} : vector<32x128xbf16>, vector<128x256xbf16>, vector<32x256xf32> -> vector<32x256xf32>
    %354 = arith.negf %350 : vector<32x256xf32>
    %355 = math.exp %354 : vector<32x256xf32>
    %cst_246 = arith.constant 1.000000e+00 : f32
    %356 = vector.broadcast %cst_246 : f32 to vector<32x256xf32>
    %357 = arith.addf %356, %355 : vector<32x256xf32>
    %358 = arith.divf %356, %357 : vector<32x256xf32>
    %359 = arith.mulf %350, %358 : vector<32x256xf32>
    %360 = arith.mulf %359, %353 : vector<32x256xf32>
    %361 = arith.truncf %360 : vector<32x256xf32> to vector<32x256xbf16>
    %c1_247 = arith.constant 1 : index
    %c0_248 = arith.constant 0 : index
    %c0_249 = arith.constant 0 : index
    %362 = vector.load %arg11[%c1_247, %c0_248, %c0_249] : memref<2x256x128xbf16, #tpu.memory_space<vmem>>, vector<1x256x128xbf16>
    %363 = vector.shape_cast %362 : vector<1x256x128xbf16> to vector<256x128xbf16>
    %cst_250 = arith.constant dense<0.000000e+00> : vector<32x128xf32>
    %364 = tpu.matmul %361, %363, %cst_250 {dimension_numbers = #tpu.dot_dimension_numbers<[1], [0], [0], [1], [0, 0, 1, 1], [], []>} : vector<32x256xbf16>, vector<256x128xbf16>, vector<32x128xf32> -> vector<32x128xf32>
    %365 = arith.addf %332, %364 : vector<32x128xf32>
    %c0_251 = arith.constant 0 : index
    %c0_252 = arith.constant 0 : index
    %366 = vector.load %arg2[%c0_251, %c0_252] : memref<2x32xf32, #tpu.memory_space<vmem>>, vector<2x32xf32>
    %cst_253 = arith.constant dense<0.000000e+00> : vector<2x128xf32>
    %367 = tpu.matmul %366, %365, %cst_253 {dimension_numbers = #tpu.dot_dimension_numbers<[1], [0], [0], [1], [0, 0, 1, 1], [], []>} : vector<2x32xf32>, vector<32x128xf32>, vector<2x128xf32> -> vector<2x128xf32>
    %c0_254 = arith.constant 0 : index
    %c0_255 = arith.constant 0 : index
    %368 = vector.load %arg12[%c0_254, %c0_255] : memref<128x1xf32, #tpu.memory_space<vmem>>, vector<128x1xf32>
    %cst_256 = arith.constant dense<0.000000e+00> : vector<2x1xf32>
    %369 = tpu.matmul %367, %368, %cst_256 {dimension_numbers = #tpu.dot_dimension_numbers<[1], [0], [0], [1], [0, 0, 1, 1], [], []>} : vector<2x128xf32>, vector<128x1xf32>, vector<2x1xf32> -> vector<2x1xf32>
    %c0_257 = arith.constant 0 : index
    %c0_258 = arith.constant 0 : index
    %370 = vector.load %arg13[%c0_257, %c0_258] : memref<1x1xf32, #tpu.memory_space<vmem>>, vector<1x1xf32>
    %371 = vector.broadcast %370 : vector<1x1xf32> to vector<2x1xf32>
    %372 = arith.addf %369, %371 : vector<2x1xf32>
    %c0_259 = arith.constant 0 : index
    %c0_260 = arith.constant 0 : index
    %373 = vector.load %arg15[%c0_259, %c0_260] : memref<2x1xf32, #tpu.memory_space<vmem>>, vector<2x1xf32>
    tpu.vector_store %arg15[%c0_259, %c0_260], %372 {strides = array<i32>} : memref<2x1xf32, #tpu.memory_space<vmem>>, vector<2x1xf32>,
    %c0_261 = arith.constant 0 : index
    %c0_262 = arith.constant 0 : index
    %374 = vector.load %arg14[%c0_261, %c0_262] : memref<2x1xf32, #tpu.memory_space<vmem>>, vector<2x1xf32>
    %cst_263 = arith.constant 0.000000e+00 : f32
    %375 = vector.broadcast %cst_263 : f32 to vector<2x1xf32>
    %376 = arith.maximumf %372, %375 : vector<2x1xf32>
    %377 = arith.mulf %372, %374 : vector<2x1xf32>
    %378 = arith.subf %376, %377 : vector<2x1xf32>
    %379 = math.absf %372 : vector<2x1xf32>
    %cst_264 = arith.constant 0.000000e+00 : f32
    %380 = vector.broadcast %cst_264 : f32 to vector<2x1xf32>
    %381 = arith.subf %380, %379 : vector<2x1xf32>
    %382 = math.exp %381 : vector<2x1xf32>
    %383 = math.log1p %382 : vector<2x1xf32>
    %384 = arith.addf %378, %383 : vector<2x1xf32>
    %385 = vector.shape_cast %384 : vector<2x1xf32> to vector<1x2x1xf32>
    %cst_265 = arith.constant dense<0.000000e+00> : vector<1xf32>
    %386 = vector.multi_reduction <add>, %385, %cst_265 [1, 2] : vector<1x2x1xf32> to vector<1xf32>
    %387 = vector.shape_cast %386 : vector<1xf32> to vector<1x1x1xf32>
    %388 = vector.extract %387[0, 0, 0] : f32 from vector<1x1x1xf32>
    %389 = vector.broadcast %388 : f32 to vector<1x1xf32>
    %cst_266 = arith.constant 2.000000e+00 : f32
    %390 = vector.broadcast %cst_266 : f32 to vector<1x1xf32>
    %391 = arith.divf %389, %390 : vector<1x1xf32>
    %c0_267 = arith.constant 0 : index
    %c0_268 = arith.constant 0 : index
    %392 = vector.load %arg16[%c0_267, %c0_268] : memref<1x1xf32, #tpu.memory_space<vmem>>, vector<1x1xf32>
    tpu.vector_store %arg16[%c0_267, %c0_268], %391 {strides = array<i32>} : memref<1x1xf32, #tpu.memory_space<vmem>>, vector<1x1xf32>,
    return
  }
}

</mosaic_0001>

<bundles_post_ra>
// kernel: forward_train.1
= control target key start
LH: loop header
LB: loop body
LE: loop exit
PB: predicated region body
PF: predicated region fallthrough
CT: control target
= control target key end

     0   :  { %s10573_s0 = inlined_call_operand.vmem [shape: f32[32,128], index: 0, kind: input, shape index: {}]   ;;  %s10574_s1 = inlined_call_operand.vmem [shape: f32[32,32], index: 1, kind: input, shape index: {}]   ;;  %s10575_s2 = inlined_call_operand.vmem [shape: f32[2,32], index: 2, kind: input, shape index: {}]   ;;  %s10576_s3 = inlined_call_operand.vmem [shape: f32[2,1,128], index: 3, kind: input, shape index: {}]   ;;  %s10577_s4 = inlined_call_operand.vmem [shape: bf16[2,4,128,32], index: 4, kind: input, shape index: {}]   ;;  %s10578_s5 = inlined_call_operand.vmem [shape: bf16[2,4,128,32], index: 5, kind: input, shape index: {}]   ;;  %s10579_s6 = inlined_call_operand.vmem [shape: bf16[2,4,128,32], index: 6, kind: input, shape index: {}]   ;;  %s10580_s7 = inlined_call_operand.vmem [shape: bf16[2,4,32,128], index: 7, kind: input, shape index: {}]   ;;  %s10581_s8 = inlined_call_operand.vmem [shape: f32[2,1,128], index: 8, kind: input, shape index: {}]   ;;  %s10582_s9 = inlined_call_operand.vmem [shape: bf16[2,128,256], index: 9, kind: input, shape index: {}]   ;;  %s10583_s10 = inlined_call_operand.vmem [shape: bf16[2,128,256], index: 10, kind: input, shape index: {}]   ;;  %s10584_s11 = inlined_call_operand.vmem [shape: bf16[2,256,128], index: 11, kind: input, shape index: {}]   ;;  %s10585_s12 = inlined_call_operand.vmem [shape: f32[128,1], index: 12, kind: input, shape index: {}]   ;;  %s10586_s13 = inlined_call_operand.<no memory space> [shape: f32[1,1], index: 13, kind: input, shape index: {}]   ;;  %s10587_s14 = inlined_call_operand.vmem [shape: f32[2,1], index: 14, kind: input, shape index: {}]   ;;  %s10588_s15 = inlined_call_operand.vmem [shape: f32[2,1], index: 15, kind: output, shape index: {0}]   ;;  %s10589_s16 = inlined_call_operand.hbm [shape: f32[1,1], index: 16, kind: output, shape index: {1}]  }
   0x1   :  { %10591 = sst [smem:[#allocation6_spill]] %s10573_s0  ;;  %v22_v0 = vstv %s10586_s13 }
   0x2   :  { %23 = vst [vmem:[#allocation2] sm:$0x1] %v22_v0 }
   0x3   :  { %s10592_s25 = sld [smem:[#allocation6_spill]]  ;;  %v8318_v7 = vld [vmem:[%s10577_s4] sm:$0xff]   ;;  %v8320_v11 = vld [vmem:[%s10577_s4 + $0x8] sm:$0xff]   ;;  %v8322_v13 = vld [vmem:[%s10577_s4 + $0x10] sm:$0xff]  }
   0x4   :  { %v8319_v10 = vld [vmem:[%s10578_s5] sm:$0xff]   ;;  %7523 = vmatprep.subr.bf16.mxu0 %v8318_v7  ;;  %v8321_v12 = vld [vmem:[%s10578_s5 + $0x8] sm:$0xff]   ;;  %v8323_v14 = vld [vmem:[%s10578_s5 + $0x10] sm:$0xff]  }
   0x5   :  { %7524 = vmatpush3.bf16.msra.mxu0 %v8318_v7  ;;  %7543 = vmatprep.subr.bf16.mxu1 %v8319_v10  ;;  %v8324_v15 = vld [vmem:[%s10577_s4 + $0x18] sm:$0xff]   ;;  %v8326_v17 = vld [vmem:[%s10577_s4 + $0x20] sm:$0xff]   ;;  %v8328_v19 = vld [vmem:[%s10577_s4 + $0x28] sm:$0xff]  }
   0x6   :  { %7544 = vmatpush3.bf16.msra.mxu1 %v8319_v10  ;;  %7525 = vmatprep.subr.bf16.mxu0 %v8320_v11  ;;  %v8325_v16 = vld [vmem:[%s10578_s5 + $0x18] sm:$0xff]   ;;  %v8327_v18 = vld [vmem:[%s10578_s5 + $0x20] sm:$0xff]   ;;  %v8329_v20 = vld [vmem:[%s10578_s5 + $0x28] sm:$0xff]  }
   0x7   :  { %7545 = vmatprep.subr.bf16.mxu1 %v8321_v12  ;;  %v8330_v21 = vld [vmem:[%s10577_s4 + $0x30] sm:$0xff]   ;;  %v8332_v23 = vld [vmem:[%s10577_s4 + $0x38] sm:$0xff]   ;;  %v8334_v25 = vld [vmem:[%s10579_s6] sm:$0xff]  }
   0x8   :  { %v8331_v22 = vld [vmem:[%s10578_s5 + $0x30] sm:$0xff]   ;;  %v8333_v24 = vld [vmem:[%s10578_s5 + $0x38] sm:$0xff]   ;;  %v6305_v40 = vld [vmem:[%s10576_s3] ss:$0 sm:$0xff] }
   0x9   :  { %v58_v1 = vld [vmem:[%s10592_s25 + $0x10] sm:$0xff]  ;;  %v56_v2 = vld [vmem:[%s10592_s25] sm:$0xff]  ;;  %v59_v3 = vld [vmem:[%s10592_s25 + $0x18] sm:$0xff]  ;;  %7526 = vmatpush3.bf16.msra.mxu0 %v8320_v11 }
   0xa   :  { %v66_v4 = vmul.f32 %v58_v1, %v58_v1  ;;  %v64_v5 = vmul.f32 %v56_v2, %v56_v2  ;;  %v57_v6 = vld [vmem:[%s10592_s25 + $0x8] sm:$0xff]  ;;  %v67_v8 = vmul.f32 %v59_v3, %v59_v3  ;;  %7546 = vmatpush3.bf16.msra.mxu1 %v8321_v12  ;;  %7527 = vmatprep.subr.bf16.mxu0 %v8322_v13  ;;  %v8882_v41 = vld [vmem:[%s10592_s25 + $0x10] sm:$0xff]  ;;  %v8883_v44 = vld [vmem:[%s10592_s25] sm:$0xff] }
   0xb   :  { %v65_v9 = vmul.f32 %v57_v6, %v57_v6  ;;  %7547 = vmatprep.subr.bf16.mxu1 %v8323_v14  ;;  %v8884_v47 = vld [vmem:[%s10592_s25 + $0x18] sm:$0xff]  ;;  %v8885_v49 = vld [vmem:[%s10592_s25 + $0x8] sm:$0xff]  ;;  %v8336_v58 = vld [vmem:[%s10579_s6 + $0x10] sm:$0xff]  }
   0xc   :  { %72 = vadd.xlane.f32.xlu1 %v66_v4  ;;  %68 = vadd.xlane.f32.xlu0 %v64_v5  ;;  %v8335_v56 = vld [vmem:[%s10579_s6 + $0x8] sm:$0xff]   ;;  %v8337_v59 = vld [vmem:[%s10579_s6 + $0x18] sm:$0xff]   ;;  %v8338_v60 = vld [vmem:[%s10579_s6 + $0x20] sm:$0xff]  }
   0xd   :  { %7528 = vmatpush3.bf16.msra.mxu0 %v8322_v13  ;;  %v8339_v61 = vld [vmem:[%s10579_s6 + $0x28] sm:$0xff]   ;;  %v8340_v62 = vld [vmem:[%s10579_s6 + $0x30] sm:$0xff]   ;;  %v8341_v63 = vld [vmem:[%s10579_s6 + $0x38] sm:$0xff]  }
   0xe   :  { %7548 = vmatpush3.bf16.msra.mxu1 %v8323_v14  ;;  %7529 = vmatprep.subr.bf16.mxu0 %v8324_v15 }
   0xf   :  { %7549 = vmatprep.subr.bf16.mxu1 %v8325_v16 }
  0x10   :  { %74 = vadd.xlane.f32.xlu1 %v67_v8  ;;  %70 = vadd.xlane.f32.xlu0 %v65_v9 }
  0x11   :  { %7530 = vmatpush3.bf16.msra.mxu0 %v8324_v15 }
  0x12   :  { %7550 = vmatpush3.bf16.msra.mxu1 %v8325_v16  ;;  %7531 = vmatprep.subr.bf16.mxu0 %v8326_v17 }
  0x13   :  { %7551 = vmatprep.subr.bf16.mxu1 %v8327_v18 }
  0x15   :  { %7532 = vmatpush3.bf16.msra.mxu0 %v8326_v17 }
  0x16   :  { %7552 = vmatpush3.bf16.msra.mxu1 %v8327_v18  ;;  %7533 = vmatprep.subr.bf16.mxu0 %v8328_v19 }
  0x17   :  { %7553 = vmatprep.subr.bf16.mxu1 %v8329_v20 }
  0x19   :  { %7534 = vmatpush3.bf16.msra.mxu0 %v8328_v19 }
  0x1a   :  { %7554 = vmatpush3.bf16.msra.mxu1 %v8329_v20  ;;  %7535 = vmatprep.subr.bf16.mxu0 %v8330_v21 }
  0x1b   :  { %7555 = vmatprep.subr.bf16.mxu1 %v8331_v22 }
  0x1d   :  { %7536 = vmatpush3.bf16.msra.mxu0 %v8330_v21 }
  0x1e   :  { %7556 = vmatpush3.bf16.msra.mxu1 %v8331_v22  ;;  %7537 = vmatprep.subr.bf16.mxu0 %v8332_v23 }
  0x1f   :  { %7557 = vmatprep.subr.bf16.mxu1 %v8333_v24 }
  0x21   :  { %7538 = vmatpush3.bf16.msra.mxu0 %v8332_v23 }
  0x22   :  { %7558 = vmatpush3.bf16.msra.mxu1 %v8333_v24  ;;  %7563 = vmatprep.subr.bf16.mxu0 %v8334_v25 }
  0x99   :  { %v73_v26 = vpop.xlane.xlu1 %72  ;;  %v69_v27 = vpop.xlane.xlu0 %68 }
  0x9a   :  { %v79_v28 = vmul.f32 0.0078125, %v73_v26  ;;  %v77_v29 = vmul.f32 0.0078125, %v69_v27 }
  0x9c   :  { %v83_v30 = vadd.f32 1e-06, %v79_v28  ;;  %v81_v31 = vadd.f32 1e-06, %v77_v29 }
  0x9d   :  { %v75_v32 = vpop.xlane.xlu1 %74  ;;  %v71_v33 = vpop.xlane.xlu0 %70 }
  0x9e   :  { %8654 = vrsqrt.f32 %v83_v30  ;;  %v80_v34 = vmul.f32 0.0078125, %v75_v32  ;;  %v78_v35 = vmul.f32 0.0078125, %v71_v33 }
  0x9f   :  { %8656 = vrsqrt.f32 %v81_v31 }
  0xa0   :  { %v84_v36 = vadd.f32 1e-06, %v80_v34  ;;  %v82_v37 = vadd.f32 1e-06, %v78_v35 }
  0xa2   :  { %8658 = vrsqrt.f32 %v84_v36 }
  0xa3   :  { %8660 = vrsqrt.f32 %v82_v37 }
  0xa8   :  { %v8655_v38 = vpop.eup %8654 }
  0xa9   :  { %v8657_v39 = vpop.eup %8656  ;;  %v91_v42 = vmul.f32 %v8882_v41, %v8655_v38 }
  0xaa   :  { %v89_v45 = vmul.f32 %v8883_v44, %v8657_v39 }
  0xab   :  { %v102_v51 = vmul.f32 %v6305_v40, %v91_v42 }
  0xac   :  { %v8659_v43 = vpop.eup %8658  ;;  %v100_v53 = vmul.f32 %v6305_v40, %v89_v45 }
  0xad   :  { %v8661_v46 = vpop.eup %8660  ;;  %v92_v48 = vmul.f32 %v8884_v47, %v8659_v43 }
  0xae   :  { %v90_v50 = vmul.f32 %v8885_v49, %v8661_v46 }
  0xaf   :  { %v103_v52 = vmul.f32 %v6305_v40, %v92_v48 }
  0xb0   :  { %v101_v54 = vmul.f32 %v6305_v40, %v90_v50 }
  0xb1   :  { %v9093_v55 = vpack.c.bf16 %v103_v52, %v102_v51 }
  0xb2   :  { %v9098_v57 = vpack.c.bf16 %v101_v54, %v100_v53 }
  0xb4   :  { %7539 = vmatprep.mubr.bf16.mxu0 %v9098_v57  ;;  %7559 = vmatprep.mubr.bf16.mxu1 %v9098_v57 }
  0xb5   :  { %7540 = vmatmul.mubr.bf16.vlgmr.msra.gmra.mrb[0].mxu0 %v9093_v55  ;;  %7560 = vmatmul.mubr.bf16.vlgmr.msra.gmra.mrb[0].mxu1 %v9093_v55 }
  0xb6   :  { %7564 = vmatpush3.bf16.msra.mxu0 %v8334_v25  ;;  %7579 = vmatprep.mubr.bf16.mxu0 %v9098_v57 }
  0xb7   :  { %7565 = vmatprep.subr.bf16.mxu0 %v8335_v56 }
  0xba   :  { %7566 = vmatpush3.bf16.msra.mxu0 %v8335_v56 }
  0xbb   :  { %7567 = vmatprep.subr.bf16.mxu0 %v8336_v58 }
  0xbe   :  { %7568 = vmatpush3.bf16.msra.mxu0 %v8336_v58 }
  0xbf   :  { %7569 = vmatprep.subr.bf16.mxu0 %v8337_v59 }
  0xc2   :  { %7570 = vmatpush3.bf16.msra.mxu0 %v8337_v59 }
  0xc3   :  { %7571 = vmatprep.subr.bf16.mxu0 %v8338_v60 }
  0xc6   :  { %7572 = vmatpush3.bf16.msra.mxu0 %v8338_v60 }
  0xc7   :  { %7573 = vmatprep.subr.bf16.mxu0 %v8339_v61 }
  0xca   :  { %7574 = vmatpush3.bf16.msra.mxu0 %v8339_v61 }
  0xcb   :  { %7575 = vmatprep.subr.bf16.mxu0 %v8340_v62 }
  0xcc   :  { %24 = vsyncpa [#allocation4], 0  ;;  %v8342_v0 = vld [vmem:[%s10578_s5 + $0x40] sm:$0xff]   ;;  %v8343_v1 = vld [vmem:[%s10578_s5 + $0x48] sm:$0xff]   ;;  %vm449_vm0 = vcmask 261120   ;;  %vm8924_vm1 = vmmov 0  }
  0xcd   :  { %v8344_v2 = vld [vmem:[%s10578_s5 + $0x50] sm:$0xff]   ;;  %v8345_v3 = vld [vmem:[%s10578_s5 + $0x58] sm:$0xff]   ;;  %v8346_v4 = vld [vmem:[%s10578_s5 + $0x60] sm:$0xff]   ;;  %vm6252_vm2 = vcmask 1024   ;;  %vm6285_vm4 = vcmask 0  }
  0xce   :  { %7576 = vmatpush3.bf16.msra.mxu0 %v8340_v62  ;;  %v8347_v5 = vld [vmem:[%s10578_s5 + $0x68] sm:$0xff]   ;;  %v8348_v6 = vld [vmem:[%s10578_s5 + $0x70] sm:$0xff]   ;;  %v8349_v7 = vld [vmem:[%s10578_s5 + $0x78] sm:$0xff]  }
  0xcf   :  { %7577 = vmatprep.subr.bf16.mxu0 %v8341_v63  ;;  %v9163_v38 = vld [vmem:[%s10574_s1] sm:$0xff]  ;;  %v9168_v43 = vld [vmem:[%s10574_s1 + $0x8] sm:$0xff]  ;;  %v9173_v44 = vld [vmem:[%s10574_s1 + $0x10] sm:$0xff] }
  0xd0   :  { %v9179_v48 = vld [vmem:[%s10574_s1 + $0x18] sm:$0xff] }
  0xd2   :  { %7578 = vmatpush3.bf16.msra.mxu0 %v8341_v63 }
  0xd3   :  { %7619 = vmatprep.subr.bf16.mxu0 %v8342_v0 }
  0xd5   :  { %7580 = vmatmul.mubr.bf16.vlgmr.msra.gmra.mrb[4].mxu0 %v9093_v55 }
  0xd6   :  { %7620 = vmatpush3.bf16.msra.mxu0 %v8342_v0  ;;  %7635 = vmatprep.mubr.bf16.mxu0 %v9098_v57 }
  0xd7   :  { %7621 = vmatprep.subr.bf16.mxu0 %v8343_v1 }
  0xda   :  { %7622 = vmatpush3.bf16.msra.mxu0 %v8343_v1 }
  0xdb   :  { %7623 = vmatprep.subr.bf16.mxu0 %v8344_v2 }
  0xde   :  { %7624 = vmatpush3.bf16.msra.mxu0 %v8344_v2 }
  0xdf   :  { %7625 = vmatprep.subr.bf16.mxu0 %v8345_v3 }
  0xe2   :  { %7626 = vmatpush3.bf16.msra.mxu0 %v8345_v3 }
  0xe3   :  { %7627 = vmatprep.subr.bf16.mxu0 %v8346_v4 }
  0xe6   :  { %7628 = vmatpush3.bf16.msra.mxu0 %v8346_v4 }
  0xe7   :  { %7629 = vmatprep.subr.bf16.mxu0 %v8347_v5 }
  0xea   :  { %7630 = vmatpush3.bf16.msra.mxu0 %v8347_v5 }
  0xeb   :  { %7631 = vmatprep.subr.bf16.mxu0 %v8348_v6 }
  0xee   :  { %7632 = vmatpush3.bf16.msra.mxu0 %v8348_v6 }
  0xef   :  { %7633 = vmatprep.subr.bf16.mxu0 %v8349_v7 }
  0xf2   :  { %7634 = vmatpush3.bf16.msra.mxu0 %v8349_v7 }
  0xf5   :  { %7636 = vmatmul.mubr.bf16.vlgmr.msra.gmra.mrb[8].mxu0 %v9093_v55 }
 0x188   :  { %v7541_v8 = vpop.f32.mrb[0].mxu0  ;;  %v7561_v9 = vpop.f32.mrb[0].mxu1 }
 0x189   :  { %v204_v10 = vpop.f32.mrb[1].mxu0  ;;  %v317_v11 = vpop.f32.mrb[1].mxu1 }
 0x18a   :  { %v7542_v12 = vpop.f32.mrb[2].mxu0  ;;  %v7562_v13 = vpop.f32.mrb[2].mxu1 }
 0x18b   :  { %v446_v14 = vpack.c.bf16 %v7542_v12, %v7541_v8  ;;  %v448_v15 = vpack.c.bf16 %v7562_v13, %v7561_v9  ;;  %v207_v16 = vpop.f32.mrb[3].mxu0  ;;  %v320_v17 = vpop.f32.mrb[3].mxu1 }
 0x18c   :  { %v445_v18 = vpack.c.bf16 %v207_v16, %v204_v10  ;;  %v447_v19 = vpack.c.bf16 %v320_v17, %v317_v11 }
 0x18d   :  { %v460_v21 = vsel %vm449_vm0, %v448_v15, 0 }
 0x18e   :  { %v457_v20 = vsel %vm449_vm0, %v447_v19, 0  ;;  %8295 = vmatprep.subr.msk.bf16.mxu1 %vm449_vm0, %v447_v19  ;;  %7587 = vmatprep.mubr.msk.bf16.mxu1 %vm449_vm0, %v445_v18 }
 0x18f   :  { %7584 = vmatpush3.bf16.xpose.msra.mxu1 %v457_v20 }
 0x190   :  { %8296 = vmatprep.subr.msk.bf16.mxu1 %vm449_vm0, %v448_v15 }
 0x197   :  { %7586 = vmatpush3.bf16.xpose.msra.mxu1 %v460_v21 }
 0x19e   :  { %7588 = vmatmul.mubr.msk.bf16.vlgmr.msra.gmra.mrb[4].mxu1 %vm449_vm0, %v446_v14  ;;  %v8350_v14 = vld [vmem:[%s10577_s4 + $0x40] sm:$0xff]  }
 0x1a8   :  { %v7581_v22 = vpop.f32.mrb[4].mxu0 }
 0x1a9   :  { %v430_v23 = vpop.f32.mrb[5].mxu0 }
 0x1aa   :  { %v7582_v24 = vpop.f32.mrb[6].mxu0 }
 0x1ab   :  { %v566_v25 = vpack.c.bf16 %v7582_v24, %v7581_v22  ;;  %v433_v26 = vpop.f32.mrb[7].mxu0 }
 0x1ac   :  { %v565_v27 = vpack.c.bf16 %v433_v26, %v430_v23 }
 0x1ae   :  { %7591 = vmatprep.subr.bf16.mxu1 %v565_v27 }
 0x1af   :  { %7592 = vmatpush3.bf16.msra.mxu1 %v565_v27 }
 0x1b0   :  { %7593 = vmatprep.subr.bf16.mxu1 %v566_v25 }
 0x1b3   :  { %7594 = vmatpush3.bf16.msra.mxu1 %v566_v25 }
 0x1b4   :  { %7599 = vmatprep.subr.bf16.mxu1 %v8350_v14 }
 0x1c8   :  { %v7637_v28 = vpop.f32.mrb[8].mxu0 }
 0x1c9   :  { %v841_v29 = vpop.f32.mrb[9].mxu0 }
 0x1ca   :  { %v7638_v30 = vpop.f32.mrb[10].mxu0 }
 0x1cb   :  { %v973_v31 = vpack.c.bf16 %v7638_v30, %v7637_v28  ;;  %v844_v32 = vpop.f32.mrb[11].mxu0  ;;  %v8352_v30 = vld [vmem:[%s10577_s4 + $0x50] sm:$0xff]  }
 0x1cc   :  { %v972_v33 = vpack.c.bf16 %v844_v32, %v841_v29  ;;  %v8351_v29 = vld [vmem:[%s10577_s4 + $0x48] sm:$0xff]   ;;  %v8354_v32 = vld [vmem:[%s10577_s4 + $0x60] sm:$0xff]  }
 0x1cd   :  { %v984_v35 = vsel %vm449_vm0, %v973_v31, 0 }
 0x1ce   :  { %v981_v34 = vsel %vm449_vm0, %v972_v33, 0  ;;  %8297 = vmatprep.subr.msk.bf16.mxu0 %vm449_vm0, %v972_v33  ;;  %v8355_v33 = vld [vmem:[%s10577_s4 + $0x68] sm:$0xff]  }
 0x1cf   :  { %7660 = vmatpush3.bf16.xpose.msra.mxu0 %v981_v34  ;;  %v8356_v34 = vld [vmem:[%s10577_s4 + $0x70] sm:$0xff]  }
 0x1d0   :  { %8298 = vmatprep.subr.msk.bf16.mxu0 %vm449_vm0, %v973_v31  ;;  %v8353_v31 = vld [vmem:[%s10577_s4 + $0x58] sm:$0xff]  }
 0x1d7   :  { %7662 = vmatpush3.bf16.xpose.msra.mxu0 %v984_v35  ;;  %v8357_v35 = vld [vmem:[%s10577_s4 + $0x78] sm:$0xff]  }
 0x271   :  { %v7589_v36 = vpop.f32.mrb[4].mxu1 }
 0x272   :  { %v496_v37 = vpop.f32.mrb[5].mxu1  ;;  %v513_v39 = vmul.f32 0.17677669, %v7589_v36  ;;  %v8358_v36 = vld [vmem:[%s10579_s6 + $0x40] sm:$0xff]  }
 0x273   :  { %v511_v40 = vmul.f32 0.17677669, %v496_v37  ;;  %v7590_v41 = vpop.f32.mrb[6].mxu1  ;;  %v8359_v37 = vld [vmem:[%s10579_s6 + $0x48] sm:$0xff]  }
 0x274   :  { %v499_v42 = vpop.f32.mrb[7].mxu1  ;;  %v514_v45 = vmul.f32 0.17677669, %v7590_v41  ;;  %v517_v51 = vadd.f32 %v513_v39, %v9173_v44  ;;  %v8360_v39 = vld [vmem:[%s10579_s6 + $0x50] sm:$0xff]   ;;  %v8362_v41 = vld [vmem:[%s10579_s6 + $0x60] sm:$0xff]  }
 0x275   :  { %v512_v46 = vmul.f32 0.17677669, %v499_v42  ;;  %v515_v47 = vadd.f32 %v511_v40, %v9163_v38  ;;  %v8361_v40 = vld [vmem:[%s10579_s6 + $0x58] sm:$0xff]   ;;  %v8363_v42 = vld [vmem:[%s10579_s6 + $0x68] sm:$0xff]  }
 0x276   :  { %v518_v53 = vadd.f32 %v514_v45, %v9179_v48  ;;  %v525_v54 = vsel %vm449_vm0, %v517_v51, -inf  ;;  %v8364_v45 = vld [vmem:[%s10579_s6 + $0x70] sm:$0xff]  }
 0x277   :  { %v519_v49 = vsel %vm449_vm0, %v515_v47, -inf  ;;  %v516_v50 = vadd.f32 %v512_v46, %v9168_v43  ;;  %v8365_v46 = vld [vmem:[%s10579_s6 + $0x78] sm:$0xff]  }
 0x278   :  { %520 = vmax.xlane.f32.xlu0 %v519_v49  ;;  %v528_v56 = vsel %vm449_vm0, %v518_v53, -inf  ;;  %v8367_v49 = vld [vmem:[%s10577_s4 + $0x88] sm:$0xff]  }
 0x279   :  { %v522_v52 = vsel %vm449_vm0, %v516_v50, -inf }
 0x27a   :  { %523 = vmax.xlane.f32.xlu1 %v522_v52  ;;  %v8370_v52 = vld [vmem:[%s10577_s4 + $0xa0] sm:$0xff]  }
 0x27c   :  { %526 = vmax.xlane.f32.xlu0 %v525_v54  ;;  %v8372_v54 = vld [vmem:[%s10577_s4 + $0xb0] sm:$0xff]  }
 0x27e   :  { %529 = vmax.xlane.f32.xlu1 %v528_v56  ;;  %v8373_v56 = vld [vmem:[%s10577_s4 + $0xb8] sm:$0xff]  }
 0x305   :  { %v521_v58 = vpop.xlane.xlu0 %520 }
 0x306   :  { %v531_v59 = vsub.f32 %v515_v47, %v521_v58  ;;  %v8366_v47 = vld [vmem:[%s10577_s4 + $0x80] sm:$0xff]  }
 0x307   :  { %v524_v60 = vpop.xlane.xlu1 %523  ;;  %v8374_v58 = vld [vmem:[%s10579_s6 + $0x80] sm:$0xff]  }
 0x308   :  { %v535_v61 = vmul.f32 1.442695, %v531_v59  ;;  %v532_v62 = vsub.f32 %v516_v50, %v524_v60  ;;  %v8368_v50 = vld [vmem:[%s10577_s4 + $0x90] sm:$0xff]   ;;  %v8375_v59 = vld [vmem:[%s10579_s6 + $0x88] sm:$0xff]  }
 0x309   :  { %v527_v63 = vpop.xlane.xlu0 %526  ;;  %v8376_v60 = vld [vmem:[%s10579_s6 + $0x90] sm:$0xff]  }
 0x30a   :  { %8662 = vpow2.f32 %v535_v61  ;;  %v537_v0 = vmul.f32 1.442695, %v532_v62  ;;  %v533_v1 = vsub.f32 %v517_v51, %v527_v63  ;;  %v8369_v51 = vld [vmem:[%s10577_s4 + $0x98] sm:$0xff]   ;;  %v8378_v62 = vld [vmem:[%s10579_s6 + $0xa0] sm:$0xff]   ;;  %v8379_v63 = vld [vmem:[%s10579_s6 + $0xa8] sm:$0xff]  }
 0x30b   :  { %v530_v2 = vpop.xlane.xlu1 %529  ;;  %v8377_v61 = vld [vmem:[%s10579_s6 + $0x98] sm:$0xff]  }
 0x30c   :  { %8664 = vpow2.f32 %v537_v0  ;;  %v539_v3 = vmul.f32 1.442695, %v533_v1  ;;  %v534_v4 = vsub.f32 %v518_v53, %v530_v2  ;;  %v8371_v53 = vld [vmem:[%s10577_s4 + $0xa8] sm:$0xff]   ;;  %v8380_v0 = vld [vmem:[%s10579_s6 + $0xb0] sm:$0xff]   ;;  %v8381_v1 = vld [vmem:[%s10579_s6 + $0xb8] sm:$0xff]  }
 0x30d   :  { %v8382_v2 = vld [vmem:[%s10577_s4 + $0xc0] sm:$0xff]  }
 0x30e   :  { %8666 = vpow2.f32 %v539_v3  ;;  %v541_v5 = vmul.f32 1.442695, %v534_v4  ;;  %v8383_v3 = vld [vmem:[%s10577_s4 + $0xc8] sm:$0xff]   ;;  %v8384_v4 = vld [vmem:[%s10577_s4 + $0xd0] sm:$0xff]  }
 0x310   :  { %8668 = vpow2.f32 %v541_v5  ;;  %v8385_v5 = vld [vmem:[%s10577_s4 + $0xd8] sm:$0xff]  }
 0x314   :  { %v8663_v6 = vpop.eup %8662 }
 0x315   :  { %v543_v7 = vsel %vm449_vm0, %v8663_v6, 0.0 }
 0x316   :  { %v8665_v8 = vpop.eup %8664  ;;  %544 = vadd.xlane.f32.xlu0 %v543_v7  ;;  %v8387_v7 = vld [vmem:[%s10577_s4 + $0xe8] sm:$0xff]  }
 0x317   :  { %v546_v9 = vsel %vm449_vm0, %v8665_v8, 0.0 }
 0x318   :  { %v8667_v10 = vpop.eup %8666  ;;  %547 = vadd.xlane.f32.xlu1 %v546_v9  ;;  %v8389_v9 = vld [vmem:[%s10577_s4 + $0xf8] sm:$0xff]  }
 0x319   :  { %v549_v11 = vsel %vm449_vm0, %v8667_v10, 0.0 }
 0x31a   :  { %v8669_v12 = vpop.eup %8668  ;;  %550 = vadd.xlane.f32.xlu0 %v549_v11  ;;  %v8391_v11 = vld [vmem:[%s10579_s6 + $0xc8] sm:$0xff]  }
 0x31b   :  { %v552_v13 = vsel %vm449_vm0, %v8669_v12, 0.0 }
 0x31c   :  { %553 = vadd.xlane.f32.xlu1 %v552_v13  ;;  %v8393_v13 = vld [vmem:[%s10579_s6 + $0xd8] sm:$0xff]  }
 0x3a3   :  { %v545_v15 = vpop.xlane.xlu0 %544 }
 0x3a4   :  { %8670 = vrcp.f32 %v545_v15  ;;  %v8395_v15 = vld [vmem:[%s10579_s6 + $0xe8] sm:$0xff]  }
 0x3a5   :  { %v548_v16 = vpop.xlane.xlu1 %547 }
 0x3a6   :  { %8672 = vrcp.f32 %v548_v16  ;;  %v8396_v16 = vld [vmem:[%s10579_s6 + $0xf0] sm:$0xff]  }
 0x3a7   :  { %v551_v17 = vpop.xlane.xlu0 %550 }
 0x3a8   :  { %8674 = vrcp.f32 %v551_v17  ;;  %v8397_v17 = vld [vmem:[%s10579_s6 + $0xf8] sm:$0xff]  }
 0x3a9   :  { %v554_v18 = vpop.xlane.xlu1 %553 }
 0x3aa   :  { %8676 = vrcp.f32 %v554_v18 }
 0x3ae   :  { %v8671_v19 = vpop.eup %8670 }
 0x3af   :  { %v559_v21 = vmul.f32 %v8671_v19, %v8663_v6  ;;  %v8386_v6 = vld [vmem:[%s10577_s4 + $0xe0] sm:$0xff]  }
 0x3b0   :  { %v8673_v20 = vpop.eup %8672 }
 0x3b1   :  { %v560_v22 = vmul.f32 %v8673_v20, %v8665_v8  ;;  %v8388_v8 = vld [vmem:[%s10577_s4 + $0xf0] sm:$0xff]  }
 0x3b2   :  { %v8675_v23 = vpop.eup %8674 }
 0x3b3   :  { %v563_v24 = vpack.c.bf16 %v560_v22, %v559_v21  ;;  %v561_v26 = vmul.f32 %v8675_v23, %v8667_v10  ;;  %v8390_v10 = vld [vmem:[%s10579_s6 + $0xc0] sm:$0xff]  }
 0x3b4   :  { %v8677_v25 = vpop.eup %8676 }
 0x3b5   :  { %v562_v27 = vmul.f32 %v8677_v25, %v8669_v12  ;;  %7595 = vmatprep.mubr.msk.bf16.mxu1 %vm449_vm0, %v563_v24  ;;  %v8392_v12 = vld [vmem:[%s10579_s6 + $0xd0] sm:$0xff]  }
 0x3b7   :  { %v564_v28 = vpack.c.bf16 %v562_v27, %v561_v26 }
 0x3b9   :  { %7596 = vmatmul.mubr.msk.bf16.vlgmr.msra.gmra.mrb[8].mxu1 %vm449_vm0, %v564_v28 }
 0x3ba   :  { %7600 = vmatpush3.bf16.msra.mxu1 %v8350_v14  ;;  %7615 = vmatprep.mubr.bf16.mxu1 %v9098_v57  ;;  %v8394_v14 = vld [vmem:[%s10579_s6 + $0xe0] sm:$0xff]  }
 0x3bb   :  { %7601 = vmatprep.subr.bf16.mxu1 %v8351_v29 }
 0x3be   :  { %7602 = vmatpush3.bf16.msra.mxu1 %v8351_v29 }
 0x3bf   :  { %7603 = vmatprep.subr.bf16.mxu1 %v8352_v30 }
 0x3c2   :  { %7604 = vmatpush3.bf16.msra.mxu1 %v8352_v30 }
 0x3c3   :  { %7605 = vmatprep.subr.bf16.mxu1 %v8353_v31 }
 0x3c6   :  { %7606 = vmatpush3.bf16.msra.mxu1 %v8353_v31 }
 0x3c7   :  { %7607 = vmatprep.subr.bf16.mxu1 %v8354_v32 }
 0x3ca   :  { %7608 = vmatpush3.bf16.msra.mxu1 %v8354_v32 }
 0x3cb   :  { %7609 = vmatprep.subr.bf16.mxu1 %v8355_v33 }
 0x3ce   :  { %7610 = vmatpush3.bf16.msra.mxu1 %v8355_v33 }
 0x3cf   :  { %7611 = vmatprep.subr.bf16.mxu1 %v8356_v34 }
 0x3d2   :  { %7612 = vmatpush3.bf16.msra.mxu1 %v8356_v34 }
 0x3d3   :  { %7613 = vmatprep.subr.bf16.mxu1 %v8357_v35 }
 0x3d6   :  { %7614 = vmatpush3.bf16.msra.mxu1 %v8357_v35 }
 0x3d7   :  { %7639 = vmatprep.subr.bf16.mxu1 %v8358_v36 }
 0x3d9   :  { %7616 = vmatmul.mubr.bf16.vlgmr.msra.gmra.mrb[12].mxu1 %v9093_v55 }
 0x3da   :  { %7640 = vmatpush3.bf16.msra.mxu1 %v8358_v36  ;;  %7655 = vmatprep.mubr.bf16.mxu1 %v9098_v57 }
 0x3db   :  { %7641 = vmatprep.subr.bf16.mxu1 %v8359_v37 }
 0x3de   :  { %7642 = vmatpush3.bf16.msra.mxu1 %v8359_v37 }
 0x3df   :  { %7643 = vmatprep.subr.bf16.mxu1 %v8360_v39 }
 0x3e2   :  { %7644 = vmatpush3.bf16.msra.mxu1 %v8360_v39 }
 0x3e3   :  { %7645 = vmatprep.subr.bf16.mxu1 %v8361_v40 }
 0x3e6   :  { %7646 = vmatpush3.bf16.msra.mxu1 %v8361_v40 }
 0x3e7   :  { %7647 = vmatprep.subr.bf16.mxu1 %v8362_v41 }
 0x3ea   :  { %7648 = vmatpush3.bf16.msra.mxu1 %v8362_v41 }
 0x3eb   :  { %7649 = vmatprep.subr.bf16.mxu1 %v8363_v42 }
 0x3ee   :  { %7650 = vmatpush3.bf16.msra.mxu1 %v8363_v42 }
 0x3ef   :  { %7651 = vmatprep.subr.bf16.mxu1 %v8364_v45 }
 0x3f2   :  { %7652 = vmatpush3.bf16.msra.mxu1 %v8364_v45 }
 0x3f3   :  { %7653 = vmatprep.subr.bf16.mxu1 %v8365_v46 }
 0x3f6   :  { %7654 = vmatpush3.bf16.msra.mxu1 %v8365_v46 }
 0x3f7   :  { %7691 = vmatprep.subr.bf16.mxu1 %v8366_v47 }
 0x3f9   :  { %7656 = vmatmul.mubr.bf16.vlgmr.msra.gmra.mrb[16].mxu1 %v9093_v55 }
 0x3fa   :  { %7692 = vmatpush3.bf16.msra.mxu1 %v8366_v47  ;;  %7707 = vmatprep.mubr.bf16.mxu1 %v9098_v57 }
 0x3fb   :  { %7693 = vmatprep.subr.bf16.mxu1 %v8367_v49 }
 0x3fe   :  { %7694 = vmatpush3.bf16.msra.mxu1 %v8367_v49 }
 0x3ff   :  { %7695 = vmatprep.subr.bf16.mxu1 %v8368_v50 }
 0x402   :  { %7696 = vmatpush3.bf16.msra.mxu1 %v8368_v50 }
 0x403   :  { %7697 = vmatprep.subr.bf16.mxu1 %v8369_v51 }
 0x406   :  { %7698 = vmatpush3.bf16.msra.mxu1 %v8369_v51 }
 0x407   :  { %7699 = vmatprep.subr.bf16.mxu1 %v8370_v52 }
 0x40a   :  { %7700 = vmatpush3.bf16.msra.mxu1 %v8370_v52 }
 0x40b   :  { %7701 = vmatprep.subr.bf16.mxu1 %v8371_v53 }
 0x40e   :  { %7702 = vmatpush3.bf16.msra.mxu1 %v8371_v53 }
 0x40f   :  { %7703 = vmatprep.subr.bf16.mxu1 %v8372_v54 }
 0x412   :  { %7704 = vmatpush3.bf16.msra.mxu1 %v8372_v54 }
 0x413   :  { %7705 = vmatprep.subr.bf16.mxu1 %v8373_v56 }
 0x416   :  { %7706 = vmatpush3.bf16.msra.mxu1 %v8373_v56 }
 0x417   :  { %7731 = vmatprep.subr.bf16.mxu1 %v8374_v58 }
 0x419   :  { %7708 = vmatmul.mubr.bf16.vlgmr.msra.gmra.mrb[20].mxu1 %v9093_v55 }
 0x41a   :  { %7732 = vmatpush3.bf16.msra.mxu1 %v8374_v58  ;;  %7747 = vmatprep.mubr.bf16.mxu1 %v9098_v57 }
 0x41b   :  { %7733 = vmatprep.subr.bf16.mxu1 %v8375_v59 }
 0x41e   :  { %7734 = vmatpush3.bf16.msra.mxu1 %v8375_v59 }
 0x41f   :  { %7735 = vmatprep.subr.bf16.mxu1 %v8376_v60 }
 0x422   :  { %7736 = vmatpush3.bf16.msra.mxu1 %v8376_v60 }
 0x423   :  { %7737 = vmatprep.subr.bf16.mxu1 %v8377_v61 }
 0x426   :  { %7738 = vmatpush3.bf16.msra.mxu1 %v8377_v61 }
 0x427   :  { %7739 = vmatprep.subr.bf16.mxu1 %v8378_v62 }
 0x42a   :  { %7740 = vmatpush3.bf16.msra.mxu1 %v8378_v62 }
 0x42b   :  { %7741 = vmatprep.subr.bf16.mxu1 %v8379_v63 }
 0x42e   :  { %7742 = vmatpush3.bf16.msra.mxu1 %v8379_v63 }
 0x42f   :  { %7743 = vmatprep.subr.bf16.mxu1 %v8380_v0 }
 0x432   :  { %7744 = vmatpush3.bf16.msra.mxu1 %v8380_v0 }
 0x433   :  { %7745 = vmatprep.subr.bf16.mxu1 %v8381_v1 }
 0x436   :  { %7746 = vmatpush3.bf16.msra.mxu1 %v8381_v1 }
 0x437   :  { %7775 = vmatprep.subr.bf16.mxu1 %v8382_v2 }
 0x439   :  { %7748 = vmatmul.mubr.bf16.vlgmr.msra.gmra.mrb[24].mxu1 %v9093_v55 }
 0x43a   :  { %7776 = vmatpush3.bf16.msra.mxu1 %v8382_v2  ;;  %7791 = vmatprep.mubr.bf16.mxu1 %v9098_v57 }
 0x43b   :  { %7777 = vmatprep.subr.bf16.mxu1 %v8383_v3 }
 0x43e   :  { %7778 = vmatpush3.bf16.msra.mxu1 %v8383_v3 }
 0x43f   :  { %7779 = vmatprep.subr.bf16.mxu1 %v8384_v4 }
 0x442   :  { %7780 = vmatpush3.bf16.msra.mxu1 %v8384_v4 }
 0x443   :  { %7781 = vmatprep.subr.bf16.mxu1 %v8385_v5 }
 0x446   :  { %7782 = vmatpush3.bf16.msra.mxu1 %v8385_v5 }
 0x447   :  { %7783 = vmatprep.subr.bf16.mxu1 %v8386_v6 }
 0x44a   :  { %7784 = vmatpush3.bf16.msra.mxu1 %v8386_v6 }
 0x44b   :  { %7785 = vmatprep.subr.bf16.mxu1 %v8387_v7 }
 0x44e   :  { %7786 = vmatpush3.bf16.msra.mxu1 %v8387_v7 }
 0x44f   :  { %7787 = vmatprep.subr.bf16.mxu1 %v8388_v8 }
 0x452   :  { %7788 = vmatpush3.bf16.msra.mxu1 %v8388_v8 }
 0x453   :  { %7789 = vmatprep.subr.bf16.mxu1 %v8389_v9 }
 0x456   :  { %7790 = vmatpush3.bf16.msra.mxu1 %v8389_v9 }
 0x457   :  { %7815 = vmatprep.subr.bf16.mxu1 %v8390_v10 }
 0x459   :  { %7792 = vmatmul.mubr.bf16.vlgmr.msra.gmra.mrb[28].mxu1 %v9093_v55 }
 0x45a   :  { %7816 = vmatpush3.bf16.msra.mxu1 %v8390_v10  ;;  %7831 = vmatprep.mubr.bf16.mxu1 %v9098_v57 }
 0x45b   :  { %7817 = vmatprep.subr.bf16.mxu1 %v8391_v11 }
 0x45e   :  { %7818 = vmatpush3.bf16.msra.mxu1 %v8391_v11 }
 0x45f   :  { %7819 = vmatprep.subr.bf16.mxu1 %v8392_v12 }
 0x462   :  { %7820 = vmatpush3.bf16.msra.mxu1 %v8392_v12 }
 0x463   :  { %7821 = vmatprep.subr.bf16.mxu1 %v8393_v13 }
 0x466   :  { %7822 = vmatpush3.bf16.msra.mxu1 %v8393_v13 }
 0x467   :  { %7823 = vmatprep.subr.bf16.mxu1 %v8394_v14 }
 0x46a   :  { %7824 = vmatpush3.bf16.msra.mxu1 %v8394_v14 }
 0x46b   :  { %7825 = vmatprep.subr.bf16.mxu1 %v8395_v15 }
 0x46e   :  { %7826 = vmatpush3.bf16.msra.mxu1 %v8395_v15 }
 0x46f   :  { %7827 = vmatprep.subr.bf16.mxu1 %v8396_v16 }
 0x472   :  { %7828 = vmatpush3.bf16.msra.mxu1 %v8396_v16 }
 0x473   :  { %7829 = vmatprep.subr.bf16.mxu1 %v8397_v17 }
 0x476   :  { %7830 = vmatpush3.bf16.msra.mxu1 %v8397_v17 }
 0x479   :  { %7832 = vmatmul.mubr.bf16.vlgmr.msra.gmra.mrb[32].mxu1 %v9093_v55 }
 0x48c   :  { %v9350_v18 = vpop.f32.mrb[8].mxu1 }
 0x48d   :  { %v9352_v19 = vpop.f32.mrb[9].mxu1 }
 0x48e   :  { %v9354_v20 = vpop.f32.mrb[10].mxu1 }
 0x48f   :  { %v623_v21 = vpack.c.bf16 %v9354_v20, %v9350_v18  ;;  %v9358_v22 = vpop.f32.mrb[11].mxu1  ;;  %v8406_v18 = vld [vmem:[%s10578_s5 + $0xa0] sm:$0xff]   ;;  %v8407_v20 = vld [vmem:[%s10578_s5 + $0xa8] sm:$0xff]  }
 0x490   :  { %v622_v23 = vpack.c.bf16 %v9358_v22, %v9352_v19  ;;  %v8404_v19 = vld [vmem:[%s10578_s5 + $0x90] sm:$0xff]   ;;  %v8405_v22 = vld [vmem:[%s10578_s5 + $0x98] sm:$0xff]  }
 0x4ac   :  { %v7617_v24 = vpop.f32.mrb[12].mxu1 }
 0x4ad   :  { %v727_v25 = vpop.f32.mrb[13].mxu1 }
 0x4ae   :  { %v7618_v26 = vpop.f32.mrb[14].mxu1 }
 0x4af   :  { %v971_v27 = vpack.c.bf16 %v7618_v26, %v7617_v24  ;;  %v730_v28 = vpop.f32.mrb[15].mxu1 }
 0x4b0   :  { %v970_v29 = vpack.c.bf16 %v730_v28, %v727_v25 }
 0x4b2   :  { %7663 = vmatprep.mubr.msk.bf16.mxu0 %vm449_vm0, %v970_v29 }
 0x4b3   :  { %7664 = vmatmul.mubr.msk.bf16.vlgmr.msra.gmra.mrb[12].mxu0 %vm449_vm0, %v971_v27 }
 0x4cc   :  { %v7657_v30 = vpop.f32.mrb[16].mxu1 }
 0x4cd   :  { %v955_v31 = vpop.f32.mrb[17].mxu1 }
 0x4ce   :  { %v7658_v32 = vpop.f32.mrb[18].mxu1 }
 0x4cf   :  { %v1090_v33 = vpack.c.bf16 %v7658_v32, %v7657_v30  ;;  %v958_v34 = vpop.f32.mrb[19].mxu1 }
 0x4d0   :  { %v1089_v35 = vpack.c.bf16 %v958_v34, %v955_v31 }
 0x4d2   :  { %7667 = vmatprep.subr.bf16.mxu0 %v1089_v35 }
 0x4d3   :  { %7668 = vmatpush3.bf16.msra.mxu0 %v1089_v35 }
 0x4d4   :  { %7669 = vmatprep.subr.bf16.mxu0 %v1090_v33 }
 0x4d7   :  { %7670 = vmatpush3.bf16.msra.mxu0 %v1090_v33 }
 0x4ec   :  { %v9364_v36 = vpop.f32.mrb[20].mxu1 }
 0x4ed   :  { %v9366_v37 = vpop.f32.mrb[21].mxu1 }
 0x4ee   :  { %v9368_v39 = vpop.f32.mrb[22].mxu1 }
 0x4ef   :  { %v1630_v40 = vpack.c.bf16 %v9368_v39, %v9364_v36  ;;  %v9372_v41 = vpop.f32.mrb[23].mxu1 }
 0x4f0   :  { %v1629_v42 = vpack.c.bf16 %v9372_v41, %v9366_v37 }
 0x50c   :  { %v7749_v45 = vpop.f32.mrb[24].mxu1 }
 0x50d   :  { %v1614_v46 = vpop.f32.mrb[25].mxu1 }
 0x50e   :  { %v7750_v47 = vpop.f32.mrb[26].mxu1 }
 0x50f   :  { %v9376_v49 = vpack.c.bf16 %v7750_v47, %v7749_v45  ;;  %v1617_v50 = vpop.f32.mrb[27].mxu1 }
 0x510   :  { %v9378_v51 = vpack.c.bf16 %v1617_v50, %v1614_v46 }
 0x52c   :  { %v9380_v52 = vpop.f32.mrb[28].mxu1 }
 0x52d   :  { %v9382_v53 = vpop.f32.mrb[29].mxu1 }
 0x52e   :  { %v9384_v54 = vpop.f32.mrb[30].mxu1 }
 0x52f   :  { %v2226_v56 = vpack.c.bf16 %v9384_v54, %v9380_v52  ;;  %v9388_v58 = vpop.f32.mrb[31].mxu1  ;;  %v8886_v52 = vld [vmem:[%s10574_s1] sm:$0xff] }
 0x530   :  { %v2225_v59 = vpack.c.bf16 %v9388_v58, %v9382_v53 }
 0x54c   :  { %v7833_v60 = vpop.f32.mrb[32].mxu1 }
 0x54d   :  { %v2210_v61 = vpop.f32.mrb[33].mxu1 }
 0x54e   :  { %v7834_v62 = vpop.f32.mrb[34].mxu1 }
 0x54f   :  { %v9392_v63 = vpack.c.bf16 %v7834_v62, %v7833_v60  ;;  %v2213_v0 = vpop.f32.mrb[35].mxu1 }
 0x550   :  { %v9394_v1 = vpack.c.bf16 %v2213_v0, %v2210_v61 }
 0x586   :  { %v7665_v2 = vpop.f32.mrb[12].mxu0 }
 0x587   :  { %v1020_v3 = vpop.f32.mrb[13].mxu0  ;;  %v1037_v4 = vmul.f32 0.17677669, %v7665_v2  ;;  %v8398_v2 = vld [vmem:[%s10580_s7 + $0x10] sm:$0xff]  }
 0x588   :  { %v1035_v5 = vmul.f32 0.17677669, %v1020_v3  ;;  %v7666_v6 = vpop.f32.mrb[14].mxu0  ;;  %7675 = vmatprep.subr.bf16.mxu0 %v8398_v2 }
 0x589   :  { %v1023_v7 = vpop.f32.mrb[15].mxu0  ;;  %v1038_v8 = vmul.f32 0.17677669, %v7666_v6  ;;  %v1041_v13 = vadd.f32 %v1037_v4, %v9173_v44 }
 0x58a   :  { %v1036_v9 = vmul.f32 0.17677669, %v1023_v7  ;;  %v1039_v10 = vadd.f32 %v1035_v5, %v9163_v38 }
 0x58b   :  { %v1042_v15 = vadd.f32 %v1038_v8, %v9179_v48  ;;  %v1049_v16 = vsel %vm449_vm0, %v1041_v13, -inf }
 0x58c   :  { %v1043_v11 = vsel %vm449_vm0, %v1039_v10, -inf  ;;  %v1040_v12 = vadd.f32 %v1036_v9, %v9168_v43 }
 0x58d   :  { %1044 = vmax.xlane.f32.xlu0 %v1043_v11  ;;  %v1052_v17 = vsel %vm449_vm0, %v1042_v15, -inf }
 0x58e   :  { %v1046_v14 = vsel %vm449_vm0, %v1040_v12, -inf }
 0x58f   :  { %1047 = vmax.xlane.f32.xlu1 %v1046_v14 }
 0x591   :  { %1050 = vmax.xlane.f32.xlu0 %v1049_v16 }
 0x593   :  { %1053 = vmax.xlane.f32.xlu1 %v1052_v17  ;;  %v8399_v17 = vld [vmem:[%s10580_s7 + $0x18] sm:$0xff]  }
 0x61a   :  { %v1045_v24 = vpop.xlane.xlu0 %1044 }
 0x61b   :  { %v1055_v25 = vsub.f32 %v1039_v10, %v1045_v24  ;;  %v8400_v24 = vld [vmem:[%s10580_s7] sm:$0xff]  }
 0x61c   :  { %v1048_v26 = vpop.xlane.xlu1 %1047 }
 0x61d   :  { %v1059_v27 = vmul.f32 1.442695, %v1055_v25  ;;  %v1056_v28 = vsub.f32 %v1040_v12, %v1048_v26 }
 0x61e   :  { %v1051_v29 = vpop.xlane.xlu0 %1050 }
 0x61f   :  { %8678 = vpow2.f32 %v1059_v27  ;;  %v1061_v30 = vmul.f32 1.442695, %v1056_v28  ;;  %v1057_v31 = vsub.f32 %v1041_v13, %v1051_v29 }
 0x620   :  { %v1054_v32 = vpop.xlane.xlu1 %1053 }
 0x621   :  { %8680 = vpow2.f32 %v1061_v30  ;;  %v1063_v33 = vmul.f32 1.442695, %v1057_v31  ;;  %v1058_v34 = vsub.f32 %v1042_v15, %v1054_v32  ;;  %v8401_v31 = vld [vmem:[%s10580_s7 + $0x8] sm:$0xff]   ;;  %v8402_v32 = vld [vmem:[%s10578_s5 + $0x80] sm:$0xff]  }
 0x623   :  { %8682 = vpow2.f32 %v1063_v33  ;;  %v1065_v35 = vmul.f32 1.442695, %v1058_v34  ;;  %v8403_v33 = vld [vmem:[%s10578_s5 + $0x88] sm:$0xff]  }
 0x625   :  { %8684 = vpow2.f32 %v1065_v35 }
 0x629   :  { %v8679_v45 = vpop.eup %8678 }
 0x62a   :  { %v1067_v46 = vsel %vm449_vm0, %v8679_v45, 0.0 }
 0x62b   :  { %v8681_v47 = vpop.eup %8680  ;;  %1068 = vadd.xlane.f32.xlu0 %v1067_v46 }
 0x62c   :  { %v1070_v50 = vsel %vm449_vm0, %v8681_v47, 0.0 }
 0x62d   :  { %v8683_v60 = vpop.eup %8682  ;;  %1071 = vadd.xlane.f32.xlu1 %v1070_v50 }
 0x62e   :  { %v1073_v61 = vsel %vm449_vm0, %v8683_v60, 0.0 }
 0x62f   :  { %v8685_v62 = vpop.eup %8684  ;;  %1074 = vadd.xlane.f32.xlu0 %v1073_v61 }
 0x630   :  { %v1076_v0 = vsel %vm449_vm0, %v8685_v62, 0.0 }
 0x631   :  { %1077 = vadd.xlane.f32.xlu1 %v1076_v0 }
 0x6b8   :  { %v1069_v3 = vpop.xlane.xlu0 %1068 }
 0x6b9   :  { %8686 = vrcp.f32 %v1069_v3 }
 0x6ba   :  { %v1072_v4 = vpop.xlane.xlu1 %1071 }
 0x6bb   :  { %8688 = vrcp.f32 %v1072_v4 }
 0x6bc   :  { %v1075_v5 = vpop.xlane.xlu0 %1074 }
 0x6bd   :  { %8690 = vrcp.f32 %v1075_v5 }
 0x6be   :  { %v1078_v6 = vpop.xlane.xlu1 %1077 }
 0x6bf   :  { %8692 = vrcp.f32 %v1078_v6 }
 0x6c3   :  { %v8687_v7 = vpop.eup %8686 }
 0x6c4   :  { %v1083_v9 = vmul.f32 %v8687_v7, %v8679_v45 }
 0x6c5   :  { %v8689_v8 = vpop.eup %8688 }
 0x6c6   :  { %v1084_v10 = vmul.f32 %v8689_v8, %v8681_v47 }
 0x6c7   :  { %v8691_v11 = vpop.eup %8690 }
 0x6c8   :  { %v1087_v12 = vpack.c.bf16 %v1084_v10, %v1083_v9  ;;  %v1085_v14 = vmul.f32 %v8691_v11, %v8683_v60 }
 0x6c9   :  { %v8693_v13 = vpop.eup %8692 }
 0x6ca   :  { %v1086_v15 = vmul.f32 %v8693_v13, %v8685_v62  ;;  %7671 = vmatprep.mubr.msk.bf16.mxu0 %vm449_vm0, %v1087_v12 }
 0x6cc   :  { %v1088_v16 = vpack.c.bf16 %v1086_v15, %v1085_v14 }
 0x6ce   :  { %7672 = vmatmul.mubr.msk.bf16.vlgmr.msra.gmra.mrb[16].mxu0 %vm449_vm0, %v1088_v16 }
 0x6cf   :  { %7676 = vmatpush3.bf16.msra.mxu0 %v8398_v2 }
 0x6d0   :  { %7677 = vmatprep.subr.bf16.mxu0 %v8399_v17 }
 0x6d3   :  { %7678 = vmatpush3.bf16.msra.mxu0 %v8399_v17 }
 0x6d4   :  { %7683 = vmatprep.subr.bf16.mxu0 %v8400_v24 }
 0x7a1   :  { %v7673_v25 = vpop.f32.mrb[16].mxu0 }
 0x7a2   :  { %v1131_v26 = vpop.f32.mrb[17].mxu0 }
 0x7a3   :  { %v7674_v27 = vpop.f32.mrb[18].mxu0 }
 0x7a4   :  { %v1147_v28 = vpack.c.bf16 %v7674_v27, %v7673_v25  ;;  %v1134_v29 = vpop.f32.mrb[19].mxu0 }
 0x7a5   :  { %v1146_v30 = vpack.c.bf16 %v1134_v29, %v1131_v26 }
 0x7a7   :  { %7679 = vmatprep.mubr.msk.bf16.mxu0 %vm449_vm0, %v1146_v30  ;;  %v8410_v30 = vld [vmem:[%s10580_s7 + $0x20] sm:$0xff]  }
 0x7a8   :  { %7680 = vmatmul.mubr.msk.bf16.vlgmr.msra.gmra.mrb[20].mxu0 %vm449_vm0, %v1147_v28 }
 0x7a9   :  { %7687 = vmatprep.mubr.msk.bf16.mxu0 %vm449_vm0, %v622_v23  ;;  %7684 = vmatpush3.bf16.msra.mxu0 %v8400_v24  ;;  %v8409_v23 = vld [vmem:[%s10578_s5 + $0xb8] sm:$0xff]  }
 0x7aa   :  { %7685 = vmatprep.subr.bf16.mxu0 %v8401_v31 }
 0x7ad   :  { %7686 = vmatpush3.bf16.msra.mxu0 %v8401_v31 }
 0x7ae   :  { %7711 = vmatprep.subr.bf16.mxu0 %v8402_v32 }
 0x7b4   :  { %7688 = vmatmul.mubr.msk.bf16.vlgmr.msra.gmra.mrb[20].mxu0 %vm449_vm0, %v623_v21  ;;  %v8408_v21 = vld [vmem:[%s10578_s5 + $0xb0] sm:$0xff]  }
 0x7b5   :  { %7712 = vmatpush3.bf16.msra.mxu0 %v8402_v32  ;;  %7727 = vmatprep.mubr.bf16.mxu0 %v9098_v57 }
 0x7b6   :  { %7713 = vmatprep.subr.bf16.mxu0 %v8403_v33 }
 0x7b9   :  { %7714 = vmatpush3.bf16.msra.mxu0 %v8403_v33 }
 0x7ba   :  { %7715 = vmatprep.subr.bf16.mxu0 %v8404_v19 }
 0x7bd   :  { %7716 = vmatpush3.bf16.msra.mxu0 %v8404_v19 }
 0x7be   :  { %7717 = vmatprep.subr.bf16.mxu0 %v8405_v22 }
 0x7c1   :  { %7718 = vmatpush3.bf16.msra.mxu0 %v8405_v22 }
 0x7c2   :  { %7719 = vmatprep.subr.bf16.mxu0 %v8406_v18 }
 0x7c5   :  { %7720 = vmatpush3.bf16.msra.mxu0 %v8406_v18 }
 0x7c6   :  { %7721 = vmatprep.subr.bf16.mxu0 %v8407_v20 }
 0x7c9   :  { %7722 = vmatpush3.bf16.msra.mxu0 %v8407_v20 }
 0x7ca   :  { %7723 = vmatprep.subr.bf16.mxu0 %v8408_v21 }
 0x7cd   :  { %7724 = vmatpush3.bf16.msra.mxu0 %v8408_v21 }
 0x7ce   :  { %7725 = vmatprep.subr.bf16.mxu0 %v8409_v23 }
 0x7d1   :  { %7726 = vmatpush3.bf16.msra.mxu0 %v8409_v23 }
 0x7d4   :  { %7728 = vmatmul.mubr.bf16.vlgmr.msra.gmra.mrb[24].mxu0 %v9093_v55 }
 0x7d5   :  { %7755 = vmatprep.mubr.msk.bf16.mxu0 %vm449_vm0, %v1629_v42 }
 0x8a7   :  { %v7729_v34 = vpop.f32.mrb[24].mxu0 }
 0x8a8   :  { %v1500_v35 = vpop.f32.mrb[25].mxu0 }
 0x8a9   :  { %v7730_v45 = vpop.f32.mrb[26].mxu0 }
 0x8aa   :  { %v1632_v46 = vpack.c.bf16 %v7730_v45, %v7729_v34  ;;  %v1503_v47 = vpop.f32.mrb[27].mxu0 }
 0x8ab   :  { %v1631_v50 = vpack.c.bf16 %v1503_v47, %v1500_v35 }
 0x8ac   :  { %v1643_v61 = vsel %vm449_vm0, %v1632_v46, 0 }
 0x8ad   :  { %v1640_v60 = vsel %vm449_vm0, %v1631_v50, 0  ;;  %8299 = vmatprep.subr.msk.bf16.mxu0 %vm449_vm0, %v1631_v50  ;;  %v8411_v50 = vld [vmem:[%s10580_s7 + $0x28] sm:$0xff]  }
 0x8ae   :  { %7752 = vmatpush3.bf16.xpose.msra.mxu0 %v1640_v60  ;;  %v8412_v60 = vld [vmem:[%s10578_s5 + $0xc0] sm:$0xff]  }
 0x8af   :  { %8300 = vmatprep.subr.msk.bf16.mxu0 %vm449_vm0, %v1632_v46 }
 0x8b6   :  { %7754 = vmatpush3.bf16.xpose.msra.mxu0 %v1643_v61 }
 0x8b7   :  { %7759 = vmatprep.subr.bf16.mxu0 %v9378_v51 }
 0x8bd   :  { %7756 = vmatmul.mubr.msk.bf16.vlgmr.msra.gmra.mrb[28].mxu0 %vm449_vm0, %v1630_v40 }
 0x8be   :  { %7760 = vmatpush3.bf16.msra.mxu0 %v9378_v51 }
 0x8bf   :  { %7761 = vmatprep.subr.bf16.mxu0 %v9376_v49 }
 0x8c2   :  { %7762 = vmatpush3.bf16.msra.mxu0 %v9376_v49 }
 0x8c3   :  { %7767 = vmatprep.subr.bf16.mxu0 %v8410_v30 }
 0x990   :  { %v7757_v37 = vpop.f32.mrb[28].mxu0 }
 0x991   :  { %v1679_v41 = vpop.f32.mrb[29].mxu0  ;;  %v1696_v42 = vmul.f32 0.17677669, %v7757_v37 }
 0x992   :  { %v1694_v62 = vmul.f32 0.17677669, %v1679_v41  ;;  %v7758_v0 = vpop.f32.mrb[30].mxu0 }
 0x993   :  { %v1682_v2 = vpop.f32.mrb[31].mxu0  ;;  %v1697_v3 = vmul.f32 0.17677669, %v7758_v0  ;;  %v1700_v40 = vadd.f32 %v1696_v42, %v9173_v44 }
 0x994   :  { %v1695_v4 = vmul.f32 0.17677669, %v1682_v2  ;;  %v1698_v5 = vadd.f32 %v1694_v62, %v9163_v38  ;;  %v8413_v2 = vld [vmem:[%s10578_s5 + $0xc8] sm:$0xff]  }
 0x995   :  { %v1701_v49 = vadd.f32 %v1697_v3, %v9179_v48  ;;  %v1708_v6 = vsel %vm449_vm0, %v1700_v40, -inf  ;;  %v8414_v3 = vld [vmem:[%s10578_s5 + $0xd0] sm:$0xff]  }
 0x996   :  { %v1702_v36 = vsel %vm449_vm0, %v1698_v5, -inf  ;;  %v1699_v39 = vadd.f32 %v1695_v4, %v9168_v43  ;;  %v8415_v4 = vld [vmem:[%s10578_s5 + $0xd8] sm:$0xff]  }
 0x997   :  { %1703 = vmax.xlane.f32.xlu0 %v1702_v36  ;;  %v1711_v7 = vsel %vm449_vm0, %v1701_v49, -inf  ;;  %v8418_v36 = vld [vmem:[%s10578_s5 + $0xf0] sm:$0xff]  }
 0x998   :  { %v1705_v51 = vsel %vm449_vm0, %v1699_v39, -inf }
 0x999   :  { %1706 = vmax.xlane.f32.xlu1 %v1705_v51 }
 0x99b   :  { %1709 = vmax.xlane.f32.xlu0 %v1708_v6 }
 0x99d   :  { %1712 = vmax.xlane.f32.xlu1 %v1711_v7 }
 0xa24   :  { %v1704_v8 = vpop.xlane.xlu0 %1703 }
 0xa25   :  { %v1714_v38 = vsub.f32 %v1698_v5, %v1704_v8  ;;  %v8416_v5 = vld [vmem:[%s10578_s5 + $0xe0] sm:$0xff]  }
 0xa26   :  { %v1707_v9 = vpop.xlane.xlu1 %1706 }
 0xa27   :  { %v1718_v10 = vmul.f32 1.442695, %v1714_v38  ;;  %v1715_v11 = vsub.f32 %v1699_v39, %v1707_v9  ;;  %v8419_v39 = vld [vmem:[%s10578_s5 + $0xf8] sm:$0xff]  }
 0xa28   :  { %v1710_v43 = vpop.xlane.xlu0 %1709 }
 0xa29   :  { %8694 = vpow2.f32 %v1718_v10  ;;  %v1720_v44 = vmul.f32 1.442695, %v1715_v11  ;;  %v1716_v12 = vsub.f32 %v1700_v40, %v1710_v43 }
 0xa2a   :  { %v1713_v13 = vpop.xlane.xlu1 %1712 }
 0xa2b   :  { %8696 = vpow2.f32 %v1720_v44  ;;  %v1722_v14 = vmul.f32 1.442695, %v1716_v12  ;;  %v1717_v48 = vsub.f32 %v1701_v49, %v1713_v13  ;;  %v8888_v12 = vld [vmem:[%s10574_s1 + $0x10] sm:$0xff] }
 0xa2d   :  { %8698 = vpow2.f32 %v1722_v14  ;;  %v1724_v15 = vmul.f32 1.442695, %v1717_v48  ;;  %v8889_v48 = vld [vmem:[%s10574_s1 + $0x18] sm:$0xff] }
 0xa2f   :  { %8700 = vpow2.f32 %v1724_v15 }
 0xa33   :  { %v8695_v16 = vpop.eup %8694 }
 0xa34   :  { %v1726_v17 = vsel %vm449_vm0, %v8695_v16, 0.0 }
 0xa35   :  { %v8697_v24 = vpop.eup %8696  ;;  %1727 = vadd.xlane.f32.xlu0 %v1726_v17 }
 0xa36   :  { %v1729_v25 = vsel %vm449_vm0, %v8697_v24, 0.0 }
 0xa37   :  { %v8699_v26 = vpop.eup %8698  ;;  %1730 = vadd.xlane.f32.xlu1 %v1729_v25 }
 0xa38   :  { %v1732_v27 = vsel %vm449_vm0, %v8699_v26, 0.0 }
 0xa39   :  { %v8701_v28 = vpop.eup %8700  ;;  %1733 = vadd.xlane.f32.xlu0 %v1732_v27 }
 0xa3a   :  { %v1735_v29 = vsel %vm449_vm0, %v8701_v28, 0.0 }
 0xa3b   :  { %1736 = vadd.xlane.f32.xlu1 %v1735_v29 }
 0xac2   :  { %v1728_v31 = vpop.xlane.xlu0 %1727 }
 0xac3   :  { %8702 = vrcp.f32 %v1728_v31 }
 0xac4   :  { %v1731_v32 = vpop.xlane.xlu1 %1730 }
 0xac5   :  { %8704 = vrcp.f32 %v1731_v32 }
 0xac6   :  { %v1734_v33 = vpop.xlane.xlu0 %1733 }
 0xac7   :  { %8706 = vrcp.f32 %v1734_v33 }
 0xac8   :  { %v1737_v19 = vpop.xlane.xlu1 %1736 }
 0xac9   :  { %8708 = vrcp.f32 %v1737_v19 }
 0xacd   :  { %v8703_v22 = vpop.eup %8702 }
 0xace   :  { %v1742_v20 = vmul.f32 %v8703_v22, %v8695_v16 }
 0xacf   :  { %v8705_v18 = vpop.eup %8704 }
 0xad0   :  { %v1743_v21 = vmul.f32 %v8705_v18, %v8697_v24 }
 0xad1   :  { %v8707_v23 = vpop.eup %8706 }
 0xad2   :  { %v1746_v34 = vpack.c.bf16 %v1743_v21, %v1742_v20  ;;  %v1744_v45 = vmul.f32 %v8707_v23, %v8699_v26 }
 0xad3   :  { %v8709_v35 = vpop.eup %8708 }
 0xad4   :  { %v1745_v46 = vmul.f32 %v8709_v35, %v8701_v28  ;;  %7763 = vmatprep.mubr.msk.bf16.mxu0 %vm449_vm0, %v1746_v34 }
 0xad6   :  { %v1747_v47 = vpack.c.bf16 %v1745_v46, %v1744_v45 }
 0xad8   :  { %7764 = vmatmul.mubr.msk.bf16.vlgmr.msra.gmra.mrb[32].mxu0 %vm449_vm0, %v1747_v47  ;;  %v8420_v47 = vld [vmem:[%s10580_s7 + $0x30] sm:$0xff]  }
 0xad9   :  { %7768 = vmatpush3.bf16.msra.mxu0 %v8410_v30 }
 0xada   :  { %7769 = vmatprep.subr.bf16.mxu0 %v8411_v50 }
 0xadd   :  { %7770 = vmatpush3.bf16.msra.mxu0 %v8411_v50 }
 0xade   :  { %7795 = vmatprep.subr.bf16.mxu0 %v8412_v60 }
 0xbab   :  { %v7765_v61 = vpop.f32.mrb[32].mxu0 }
 0xbac   :  { %v1790_v37 = vpop.f32.mrb[33].mxu0 }
 0xbad   :  { %v7766_v41 = vpop.f32.mrb[34].mxu0 }
 0xbae   :  { %v1806_v42 = vpack.c.bf16 %v7766_v41, %v7765_v61  ;;  %v1793_v62 = vpop.f32.mrb[35].mxu0 }
 0xbaf   :  { %v1805_v0 = vpack.c.bf16 %v1793_v62, %v1790_v37 }
 0xbb1   :  { %7771 = vmatprep.mubr.msk.bf16.mxu0 %vm449_vm0, %v1805_v0 }
 0xbb2   :  { %7772 = vmatmul.mubr.msk.bf16.vlgmr.msra.gmra.mrb[20].mxu0 %vm449_vm0, %v1806_v42 }
 0xbb3   :  { %7796 = vmatpush3.bf16.msra.mxu0 %v8412_v60  ;;  %7811 = vmatprep.mubr.bf16.mxu0 %v9098_v57  ;;  %v8417_v57 = vld [vmem:[%s10578_s5 + $0xe8] sm:$0xff]  }
 0xbb4   :  { %7797 = vmatprep.subr.bf16.mxu0 %v8413_v2 }
 0xbb7   :  { %7798 = vmatpush3.bf16.msra.mxu0 %v8413_v2 }
 0xbb8   :  { %7799 = vmatprep.subr.bf16.mxu0 %v8414_v3 }
 0xbbb   :  { %7800 = vmatpush3.bf16.msra.mxu0 %v8414_v3 }
 0xbbc   :  { %7801 = vmatprep.subr.bf16.mxu0 %v8415_v4 }
 0xbbf   :  { %7802 = vmatpush3.bf16.msra.mxu0 %v8415_v4 }
 0xbc0   :  { %7803 = vmatprep.subr.bf16.mxu0 %v8416_v5 }
 0xbc3   :  { %7804 = vmatpush3.bf16.msra.mxu0 %v8416_v5 }
 0xbc4   :  { %7805 = vmatprep.subr.bf16.mxu0 %v8417_v57 }
 0xbc7   :  { %7806 = vmatpush3.bf16.msra.mxu0 %v8417_v57 }
 0xbc8   :  { %7807 = vmatprep.subr.bf16.mxu0 %v8418_v36 }
 0xbcb   :  { %7808 = vmatpush3.bf16.msra.mxu0 %v8418_v36 }
 0xbcc   :  { %7809 = vmatprep.subr.bf16.mxu0 %v8419_v39 }
 0xbcf   :  { %7810 = vmatpush3.bf16.msra.mxu0 %v8419_v39  ;;  %v8421_v39 = vld [vmem:[%s10580_s7 + $0x38] sm:$0xff]  }
 0xbd2   :  { %7812 = vmatmul.mubr.bf16.vlgmr.msra.gmra.mrb[36].mxu0 %v9093_v55 }
 0xbd3   :  { %7839 = vmatprep.mubr.msk.bf16.mxu0 %vm449_vm0, %v2225_v59 }
 0xca5   :  { %v7813_v40 = vpop.f32.mrb[36].mxu0 }
 0xca6   :  { %v2096_v51 = vpop.f32.mrb[37].mxu0 }
 0xca7   :  { %v7814_v49 = vpop.f32.mrb[38].mxu0 }
 0xca8   :  { %v2228_v6 = vpack.c.bf16 %v7814_v49, %v7813_v40  ;;  %v2099_v7 = vpop.f32.mrb[39].mxu0 }
 0xca9   :  { %v2227_v8 = vpack.c.bf16 %v2099_v7, %v2096_v51 }
 0xcaa   :  { %v2239_v55 = vsel %vm449_vm0, %v2228_v6, 0 }
 0xcab   :  { %v2236_v38 = vsel %vm449_vm0, %v2227_v8, 0  ;;  %8301 = vmatprep.subr.msk.bf16.mxu0 %vm449_vm0, %v2227_v8 }
 0xcac   :  { %7836 = vmatpush3.bf16.xpose.msra.mxu0 %v2236_v38  ;;  %v8422_v38 = vld [vmem:[%s10582_s9] ss:$8 sps:$4 sm:$0xff]  }
 0xcad   :  { %8302 = vmatprep.subr.msk.bf16.mxu0 %vm449_vm0, %v2228_v6 }
 0xcb4   :  { %7838 = vmatpush3.bf16.xpose.msra.mxu0 %v2239_v55  ;;  %v8424_v55 = vld [vmem:[%s10582_s9 + $0x4] ss:$8 sps:$4 sm:$0xff]  }
 0xcb5   :  { %7843 = vmatprep.subr.bf16.mxu0 %v9394_v1  ;;  %2620 = vmatprep.subr.bf16.mxu1 %v8424_v55 }
 0xcb6   :  { %2621 = vmatpush1.bf16.msra.mxu1 %v8422_v38  ;;  %v6590_v38 = vld [vmem:[%s10581_s8] ss:$0 sm:$0xff] }
 0xcbb   :  { %7840 = vmatmul.mubr.msk.bf16.vlgmr.msra.gmra.mrb[40].mxu0 %vm449_vm0, %v2226_v56 }
 0xcbc   :  { %7844 = vmatpush3.bf16.msra.mxu0 %v9394_v1  ;;  %v8887_v1 = vld [vmem:[%s10574_s1 + $0x8] sm:$0xff] }
 0xcbd   :  { %7845 = vmatprep.subr.bf16.mxu0 %v9392_v63 }
 0xcc0   :  { %7846 = vmatpush3.bf16.msra.mxu0 %v9392_v63 }
 0xcc1   :  { %7851 = vmatprep.subr.bf16.mxu0 %v8420_v47 }
 0xd8e   :  { %v7841_v53 = vpop.f32.mrb[40].mxu0 }
 0xd8f   :  { %v2275_v58 = vpop.f32.mrb[41].mxu0  ;;  %v2292_v59 = vmul.f32 0.17677669, %v7841_v53  ;;  %v8425_v53 = vld [vmem:[%s10583_s10] ss:$8 sps:$4 sm:$0xff]  }
 0xd90   :  { %v2290_v9 = vmul.f32 0.17677669, %v2275_v58  ;;  %v7842_v10 = vpop.f32.mrb[42].mxu0  ;;  %v8427_v58 = vld [vmem:[%s10583_s10 + $0x4] ss:$8 sps:$4 sm:$0xff]  }
 0xd91   :  { %v2278_v11 = vpop.f32.mrb[43].mxu0  ;;  %v2293_v43 = vmul.f32 0.17677669, %v7842_v10  ;;  %v2296_v13 = vadd.f32 %v8888_v12, %v2292_v59  ;;  %v8430_v59 = vld [vmem:[%s10582_s9 + $0x14] ss:$8 sps:$4 sm:$0xff]  }
 0xd92   :  { %v2291_v44 = vmul.f32 0.17677669, %v2278_v11  ;;  %v2294_v54 = vadd.f32 %v8886_v52, %v2290_v9  ;;  %v8433_v9 = vld [vmem:[%s10583_s10 + $0x14] ss:$8 sps:$4 sm:$0xff]   ;;  %v8428_v10 = vld [vmem:[%s10582_s9 + $0x10] ss:$8 sps:$4 sm:$0xff]   ;;  %2622 = vmatprep.subr.bf16.mxu1 %v8430_v59 }
 0xd93   :  { %v2297_v15 = vadd.f32 %v8889_v48, %v2293_v43  ;;  %v2304_v16 = vsel %vm449_vm0, %v2296_v13, -inf  ;;  %v8431_v11 = vld [vmem:[%s10583_s10 + $0x10] ss:$8 sps:$4 sm:$0xff]   ;;  %v8436_v43 = vld [vmem:[%s10582_s9 + $0x24] ss:$8 sps:$4 sm:$0xff]   ;;  %2623 = vmatpush1.bf16.msra.mxu1 %v8428_v10 }
 0xd94   :  { %v2298_v56 = vsel %vm449_vm0, %v2294_v54, -inf  ;;  %v2295_v63 = vadd.f32 %v8887_v1, %v2291_v44  ;;  %v8439_v44 = vld [vmem:[%s10583_s10 + $0x24] ss:$8 sps:$4 sm:$0xff]   ;;  %v8434_v52 = vld [vmem:[%s10582_s9 + $0x20] ss:$8 sps:$4 sm:$0xff]   ;;  %2624 = vmatprep.subr.bf16.mxu1 %v8436_v43  ;;  %v8891_v48 = vld [vmem:[%s10592_s25 + $0x10] sm:$0xff] }
 0xd95   :  { %2299 = vmax.xlane.f32.xlu0 %v2298_v56  ;;  %v2307_v17 = vsel %vm449_vm0, %v2297_v15, -inf }
 0xd96   :  { %v2301_v14 = vsel %vm449_vm0, %v2295_v63, -inf }
 0xd97   :  { %2302 = vmax.xlane.f32.xlu1 %v2301_v14  ;;  %2625 = vmatpush1.bf16.msra.mxu1 %v8434_v52 }
 0xd99   :  { %2305 = vmax.xlane.f32.xlu0 %v2304_v16  ;;  %v8892_v16 = vld [vmem:[%s10592_s25 + $0x8] sm:$0xff] }
 0xd9b   :  { %2308 = vmax.xlane.f32.xlu1 %v2307_v17 }
 0xe22   :  { %v2300_v24 = vpop.xlane.xlu0 %2299 }
 0xe23   :  { %v2310_v25 = vsub.f32 %v2294_v54, %v2300_v24  ;;  %v8437_v54 = vld [vmem:[%s10583_s10 + $0x20] ss:$8 sps:$4 sm:$0xff]  }
 0xe24   :  { %v2303_v26 = vpop.xlane.xlu1 %2302 }
 0xe25   :  { %v2314_v27 = vmul.f32 1.442695, %v2310_v25  ;;  %v2311_v28 = vsub.f32 %v2295_v63, %v2303_v26  ;;  %v8890_v63 = vld [vmem:[%s10592_s25] sm:$0xff]  ;;  %v8893_v25 = vld [vmem:[%s10592_s25 + $0x18] sm:$0xff] }
 0xe26   :  { %v2306_v29 = vpop.xlane.xlu0 %2305 }
 0xe27   :  { %8710 = vpow2.f32 %v2314_v27  ;;  %v2316_v30 = vmul.f32 1.442695, %v2311_v28  ;;  %v2312_v31 = vsub.f32 %v2296_v13, %v2306_v29 }
 0xe28   :  { %v2309_v32 = vpop.xlane.xlu1 %2308 }
 0xe29   :  { %8712 = vpow2.f32 %v2316_v30  ;;  %v2318_v33 = vmul.f32 1.442695, %v2312_v31  ;;  %v2313_v19 = vsub.f32 %v2297_v15, %v2309_v32  ;;  %v8442_v30 = vld [vmem:[%s10582_s9 + $0x34] ss:$8 sps:$4 sm:$0xff]   ;;  %v8440_v32 = vld [vmem:[%s10582_s9 + $0x30] ss:$8 sps:$4 sm:$0xff]  }
 0xe2a   :  { %v8445_v31 = vld [vmem:[%s10583_s10 + $0x34] ss:$8 sps:$4 sm:$0xff]   ;;  %2626 = vmatprep.subr.bf16.mxu1 %v8442_v30 }
 0xe2b   :  { %8714 = vpow2.f32 %v2318_v33  ;;  %v2320_v22 = vmul.f32 1.442695, %v2313_v19  ;;  %v8443_v33 = vld [vmem:[%s10583_s10 + $0x30] ss:$8 sps:$4 sm:$0xff]   ;;  %2627 = vmatpush1.bf16.msra.mxu1 %v8440_v32  ;;  %v8448_v19 = vld [vmem:[%s10582_s9 + $0x44] ss:$8 sps:$4 sm:$0xff]  }
 0xe2c   :  { %2628 = vmatprep.subr.bf16.mxu1 %v8448_v19  ;;  %v8482_v30 = vld [vmem:[%s10584_s11 + $0x70] sm:$0xff]   ;;  %v8484_v32 = vld [vmem:[%s10584_s11 + $0x78] sm:$0xff]  }
 0xe2d   :  { %8716 = vpow2.f32 %v2320_v22  ;;  %v8451_v22 = vld [vmem:[%s10583_s10 + $0x44] ss:$8 sps:$4 sm:$0xff]  }
 0xe31   :  { %v8711_v18 = vpop.eup %8710 }
 0xe32   :  { %v2322_v20 = vsel %vm449_vm0, %v8711_v18, 0.0 }
 0xe33   :  { %v8713_v21 = vpop.eup %8712  ;;  %2323 = vadd.xlane.f32.xlu0 %v2322_v20  ;;  %v8449_v20 = vld [vmem:[%s10583_s10 + $0x40] ss:$8 sps:$4 sm:$0xff]  }
 0xe34   :  { %v2325_v23 = vsel %vm449_vm0, %v8713_v21, 0.0 }
 0xe35   :  { %v8715_v34 = vpop.eup %8714  ;;  %2326 = vadd.xlane.f32.xlu1 %v2325_v23  ;;  %v8457_v23 = vld [vmem:[%s10583_s10 + $0x54] ss:$8 sps:$4 sm:$0xff]  }
 0xe36   :  { %v2328_v35 = vsel %vm449_vm0, %v8715_v34, 0.0 }
 0xe37   :  { %v8717_v45 = vpop.eup %8716  ;;  %2329 = vadd.xlane.f32.xlu0 %v2328_v35  ;;  %v8455_v35 = vld [vmem:[%s10583_s10 + $0x50] ss:$8 sps:$4 sm:$0xff]  }
 0xe38   :  { %v2331_v46 = vsel %vm449_vm0, %v8717_v45, 0.0 }
 0xe39   :  { %2332 = vadd.xlane.f32.xlu1 %v2331_v46  ;;  %v8463_v46 = vld [vmem:[%s10583_s10 + $0x64] ss:$8 sps:$4 sm:$0xff]  }
 0xec0   :  { %v2324_v50 = vpop.xlane.xlu0 %2323 }
 0xec1   :  { %8718 = vrcp.f32 %v2324_v50  ;;  %v8461_v50 = vld [vmem:[%s10583_s10 + $0x60] ss:$8 sps:$4 sm:$0xff]  }
 0xec2   :  { %v2327_v60 = vpop.xlane.xlu1 %2326 }
 0xec3   :  { %8720 = vrcp.f32 %v2327_v60  ;;  %v8466_v60 = vld [vmem:[%s10582_s9 + $0x74] ss:$8 sps:$4 sm:$0xff]  }
 0xec4   :  { %v2330_v61 = vpop.xlane.xlu0 %2329 }
 0xec5   :  { %8722 = vrcp.f32 %v2330_v61  ;;  %v8469_v61 = vld [vmem:[%s10583_s10 + $0x74] ss:$8 sps:$4 sm:$0xff]  }
 0xec6   :  { %v2333_v37 = vpop.xlane.xlu1 %2332 }
 0xec7   :  { %8724 = vrcp.f32 %v2333_v37  ;;  %v8922_v37 = vmov 0  }
 0xec8   :  { %2652 = vmatprep.mubr.bf16.mxu1 %v8922_v37 }
 0xecb   :  { %v8719_v41 = vpop.eup %8718 }
 0xecc   :  { %v2338_v62 = vmul.f32 %v8719_v41, %v8711_v18  ;;  %v8446_v18 = vld [vmem:[%s10582_s9 + $0x40] ss:$8 sps:$4 sm:$0xff]   ;;  %v8464_v41 = vld [vmem:[%s10582_s9 + $0x70] ss:$8 sps:$4 sm:$0xff]  }
 0xecd   :  { %v8721_v42 = vpop.eup %8720  ;;  %2629 = vmatpush1.bf16.msra.mxu1 %v8446_v18 }
 0xece   :  { %v2339_v0 = vmul.f32 %v8721_v42, %v8713_v21  ;;  %v8454_v21 = vld [vmem:[%s10582_s9 + $0x54] ss:$8 sps:$4 sm:$0xff]   ;;  %v8467_v42 = vld [vmem:[%s10583_s10 + $0x70] ss:$8 sps:$4 sm:$0xff]  }
 0xecf   :  { %v8723_v2 = vpop.eup %8722  ;;  %2630 = vmatprep.subr.bf16.mxu1 %v8454_v21 }
 0xed0   :  { %v2342_v3 = vpack.c.bf16 %v2339_v0, %v2338_v62  ;;  %v2340_v5 = vmul.f32 %v8723_v2, %v8715_v34  ;;  %v8452_v34 = vld [vmem:[%s10582_s9 + $0x50] ss:$8 sps:$4 sm:$0xff]  }
 0xed1   :  { %v8725_v4 = vpop.eup %8724  ;;  %2631 = vmatpush1.bf16.msra.mxu1 %v8452_v34 }
 0xed2   :  { %v2341_v57 = vmul.f32 %v8725_v4, %v8717_v45  ;;  %7847 = vmatprep.mubr.msk.bf16.mxu0 %vm449_vm0, %v2342_v3  ;;  %v8460_v45 = vld [vmem:[%s10582_s9 + $0x64] ss:$8 sps:$4 sm:$0xff]  }
 0xed3   :  { %2632 = vmatprep.subr.bf16.mxu1 %v8460_v45 }
 0xed4   :  { %v2343_v36 = vpack.c.bf16 %v2341_v57, %v2340_v5 }
 0xed6   :  { %7848 = vmatmul.mubr.msk.bf16.vlgmr.msra.gmra.mrb[44].mxu0 %vm449_vm0, %v2343_v36 }
 0xed7   :  { %7852 = vmatpush3.bf16.msra.mxu0 %v8420_v47  ;;  %v8458_v47 = vld [vmem:[%s10582_s9 + $0x60] ss:$8 sps:$4 sm:$0xff]  }
 0xed8   :  { %7853 = vmatprep.subr.bf16.mxu0 %v8421_v39  ;;  %2633 = vmatpush1.bf16.msra.mxu1 %v8458_v47 }
 0xed9   :  { %2634 = vmatprep.subr.bf16.mxu1 %v8466_v60 }
 0xedb   :  { %7854 = vmatpush3.bf16.msra.mxu0 %v8421_v39 }
 0xedc   :  { %2769 = vmatprep.subr.bf16.mxu0 %v8427_v58  ;;  %2635 = vmatpush1.bf16.msra.mxu1 %v8464_v41 }
 0xfa9   :  { %v7849_v40 = vpop.f32.mrb[44].mxu0 }
 0xfaa   :  { %v2386_v51 = vpop.f32.mrb[45].mxu0 }
 0xfab   :  { %v7850_v49 = vpop.f32.mrb[46].mxu0 }
 0xfac   :  { %v2402_v6 = vpack.c.bf16 %v7850_v49, %v7849_v40  ;;  %v2389_v7 = vpop.f32.mrb[47].mxu0 }
 0xfad   :  { %v2401_v8 = vpack.c.bf16 %v2389_v7, %v2386_v51 }
 0xfaf   :  { %7855 = vmatprep.mubr.msk.bf16.mxu0 %vm449_vm0, %v2401_v8 }
 0xfb0   :  { %7856 = vmatmul.mubr.msk.bf16.vlgmr.msra.gmra.mrb[20].mxu0 %vm449_vm0, %v2402_v6 }
 0xfb1   :  { %2770 = vmatpush1.bf16.msra.mxu0 %v8425_v53  ;;  %2801 = vmatprep.mubr.bf16.mxu0 %v8922_v37 }
 0xfb2   :  { %2771 = vmatprep.subr.bf16.mxu0 %v8433_v9 }
 0xfb5   :  { %2772 = vmatpush1.bf16.msra.mxu0 %v8431_v11 }
 0xfb6   :  { %2773 = vmatprep.subr.bf16.mxu0 %v8439_v44 }
 0xfb9   :  { %2774 = vmatpush1.bf16.msra.mxu0 %v8437_v54 }
 0xfba   :  { %2775 = vmatprep.subr.bf16.mxu0 %v8445_v31  ;;  %v8483_v31 = vld [vmem:[%s10584_s11 + $0x30] sm:$0xff]  }
 0xfbd   :  { %2776 = vmatpush1.bf16.msra.mxu0 %v8443_v33  ;;  %v8485_v33 = vld [vmem:[%s10584_s11 + $0x38] sm:$0xff]  }
 0xfbe   :  { %2777 = vmatprep.subr.bf16.mxu0 %v8451_v22 }
 0xfc1   :  { %2778 = vmatpush1.bf16.msra.mxu0 %v8449_v20 }
 0xfc2   :  { %2779 = vmatprep.subr.bf16.mxu0 %v8457_v23 }
 0xfc5   :  { %2780 = vmatpush1.bf16.msra.mxu0 %v8455_v35 }
 0xfc6   :  { %2781 = vmatprep.subr.bf16.mxu0 %v8463_v46 }
 0xfc9   :  { %2782 = vmatpush1.bf16.msra.mxu0 %v8461_v50 }
 0xfca   :  { %2783 = vmatprep.subr.bf16.mxu0 %v8469_v61 }
 0xfcd   :  { %2784 = vmatpush1.bf16.msra.mxu0 %v8467_v42 }
0x1083   :  { %v7857_v56 = vpop.f32.mrb[20].mxu0 }
0x1084   :  { %v2460_v1 = vpop.f32.mrb[21].mxu0  ;;  %v9612_v15 = vadd.f32 %v8891_v48, %v7857_v56  ;;  %v8470_v56 = vld [vmem:[%s10584_s11 + $0x40] sm:$0xff]   ;;  %v8475_v48 = vld [vmem:[%s10584_s11 + $0x10] sm:$0xff]  }
0x1085   :  { %v9607_v12 = vadd.f32 %v8890_v63, %v2460_v1  ;;  %v7858_v13 = vpop.f32.mrb[22].mxu0  ;;  %v8471_v1 = vld [vmem:[%s10584_s11] sm:$0xff]   ;;  %7277 = vmatprep.subr.bf16.mxu1 %v8470_v56  ;;  %v8472_v63 = vld [vmem:[%s10584_s11 + $0x48] sm:$0xff]  }
0x1086   :  { %v2463_v14 = vpop.f32.mrb[23].mxu0  ;;  %v9624_v26 = vadd.f32 %v8893_v25, %v7858_v13  ;;  %v2485_v28 = vmul.f32 %v9612_v15, %v9612_v15  ;;  %v8473_v13 = vld [vmem:[%s10584_s11 + $0x8] sm:$0xff]   ;;  %v8478_v25 = vld [vmem:[%s10584_s11 + $0x60] sm:$0xff]  }
0x1087   :  { %v9617_v17 = vadd.f32 %v8892_v16, %v2463_v14  ;;  %v2483_v24 = vmul.f32 %v9607_v12, %v9607_v12  ;;  %v8474_v14 = vld [vmem:[%s10584_s11 + $0x50] sm:$0xff]   ;;  %v8476_v16 = vld [vmem:[%s10584_s11 + $0x58] sm:$0xff]  }
0x1088   :  { %v2486_v29 = vmul.f32 %v9624_v26, %v9624_v26 }
0x1089   :  { %2487 = vadd.xlane.f32.xlu0 %v2483_v24  ;;  %v2484_v27 = vmul.f32 %v9617_v17, %v9617_v17  ;;  %v8477_v24 = vld [vmem:[%s10584_s11 + $0x18] sm:$0xff]  }
0x108b   :  { %2489 = vadd.xlane.f32.xlu1 %v2484_v27  ;;  %v8479_v27 = vld [vmem:[%s10584_s11 + $0x20] sm:$0xff]  }
0x108d   :  { %2491 = vadd.xlane.f32.xlu0 %v2485_v28  ;;  %v8480_v28 = vld [vmem:[%s10584_s11 + $0x68] sm:$0xff]  }
0x108f   :  { %2493 = vadd.xlane.f32.xlu1 %v2486_v29  ;;  %v8481_v29 = vld [vmem:[%s10584_s11 + $0x28] sm:$0xff]  }
0x1116   :  { %v2488_v62 = vpop.xlane.xlu0 %2487 }
0x1117   :  { %v2495_v0 = vmul.f32 0.0078125, %v2488_v62 }
0x1118   :  { %v2490_v2 = vpop.xlane.xlu1 %2489 }
0x1119   :  { %v2499_v3 = vadd.f32 1e-06, %v2495_v0  ;;  %v2496_v4 = vmul.f32 0.0078125, %v2490_v2 }
0x111a   :  { %v2492_v5 = vpop.xlane.xlu0 %2491 }
0x111b   :  { %8726 = vrsqrt.f32 %v2499_v3  ;;  %v2500_v57 = vadd.f32 1e-06, %v2496_v4  ;;  %v2497_v36 = vmul.f32 0.0078125, %v2492_v5 }
0x111c   :  { %v2494_v39 = vpop.xlane.xlu1 %2493 }
0x111d   :  { %8728 = vrsqrt.f32 %v2500_v57  ;;  %v2501_v40 = vadd.f32 1e-06, %v2497_v36  ;;  %v2498_v51 = vmul.f32 0.0078125, %v2494_v39 }
0x111f   :  { %v2502_v49 = vadd.f32 1e-06, %v2498_v51  ;;  %8730 = vrsqrt.f32 %v2501_v40 }
0x1121   :  { %8732 = vrsqrt.f32 %v2502_v49 }
0x1125   :  { %v8727_v6 = vpop.eup %8726 }
0x1126   :  { %v2507_v7 = vmul.f32 %v8727_v6, %v9607_v12 }
0x1127   :  { %v8729_v8 = vpop.eup %8728 }
0x1128   :  { %v2508_v55 = vmul.f32 %v8729_v8, %v9617_v17  ;;  %v2518_v58 = vmul.f32 %v6590_v38, %v2507_v7 }
0x1129   :  { %v8731_v53 = vpop.eup %8730 }
0x112a   :  { %v2519_v59 = vmul.f32 %v6590_v38, %v2508_v55  ;;  %v2509_v43 = vmul.f32 %v8731_v53, %v9612_v15 }
0x112b   :  { %v8733_v9 = vpop.eup %8732 }
0x112c   :  { %v2522_v10 = vpack.c.bf16 %v2519_v59, %v2518_v58  ;;  %v2510_v11 = vmul.f32 %v8733_v9, %v9624_v26  ;;  %v2520_v52 = vmul.f32 %v6590_v38, %v2509_v43 }
0x112e   :  { %2653 = vmatmul.mubr.bf16.vlgmr.msra.gmra.mrb[36].mxu1 %v2522_v10  ;;  %2802 = vmatmul.mubr.bf16.vlgmr.msra.gmra.mrb[48].mxu0 %v2522_v10  ;;  %v2521_v44 = vmul.f32 %v6590_v38, %v2510_v11 }
0x112f   :  { %2662 = vmatprep.mubr.bf16.mxu1 %v8922_v37  ;;  %2811 = vmatprep.mubr.bf16.mxu0 %v8922_v37 }
0x1130   :  { %v2523_v54 = vpack.c.bf16 %v2521_v44, %v2520_v52  ;;  %7278 = vmatpush3.bf16.msra.mxu1 %v8471_v1 }
0x1131   :  { %7279 = vmatprep.subr.bf16.mxu1 %v8472_v63 }
0x1134   :  { %7280 = vmatpush3.bf16.msra.mxu1 %v8473_v13 }
0x1135   :  { %7281 = vmatprep.subr.bf16.mxu1 %v8474_v14 }
0x1136   :  { %2663 = vmatmul.mubr.bf16.gmra.mrb[40].mxu1 %v2523_v54  ;;  %2812 = vmatmul.mubr.bf16.gmra.mrb[52].mxu0 %v2523_v54 }
0x1138   :  { %7282 = vmatpush3.bf16.msra.mxu1 %v8475_v48 }
0x1139   :  { %7283 = vmatprep.subr.bf16.mxu1 %v8476_v16 }
0x113c   :  { %7284 = vmatpush3.bf16.msra.mxu1 %v8477_v24 }
0x113d   :  { %7285 = vmatprep.subr.bf16.mxu1 %v8478_v25 }
0x1140   :  { %7286 = vmatpush3.bf16.msra.mxu1 %v8479_v27 }
0x1141   :  { %7287 = vmatprep.subr.bf16.mxu1 %v8480_v28 }
0x1144   :  { %7288 = vmatpush3.bf16.msra.mxu1 %v8481_v29 }
0x1145   :  { %7289 = vmatprep.subr.bf16.mxu1 %v8482_v30 }
0x1148   :  { %7290 = vmatpush3.bf16.msra.mxu1 %v8483_v31 }
0x1149   :  { %7291 = vmatprep.subr.bf16.mxu1 %v8484_v32 }
0x114c   :  { %7292 = vmatpush3.bf16.msra.mxu1 %v8485_v33 }
0x1201   :  { %v2654_v19 = vpop.f32.mrb[36].mxu1  ;;  %v2803_v22 = vpop.f32.mrb[48].mxu0 }
0x1202   :  { %v6623_v18 = vmul.f32 -1.442695, %v2654_v19  ;;  %v2656_v20 = vpop.f32.mrb[37].mxu1  ;;  %v2805_v21 = vpop.f32.mrb[49].mxu0 }
0x1203   :  { %v6624_v23 = vmul.f32 -1.442695, %v2656_v20  ;;  %v2658_v34 = vpop.f32.mrb[38].mxu1  ;;  %v2807_v35 = vpop.f32.mrb[50].mxu0 }
0x1204   :  { %8734 = vpow2.f32 %v6623_v18  ;;  %v6625_v45 = vmul.f32 -1.442695, %v2658_v34  ;;  %v2660_v46 = vpop.f32.mrb[39].mxu1  ;;  %v2809_v47 = vpop.f32.mrb[51].mxu0 }
0x1205   :  { %8736 = vpow2.f32 %v6624_v23  ;;  %v6626_v50 = vmul.f32 -1.442695, %v2660_v46 }
0x1206   :  { %8738 = vpow2.f32 %v6625_v45 }
0x1207   :  { %8740 = vpow2.f32 %v6626_v50 }
0x1209   :  { %v2664_v60 = vpop.f32.mrb[40].mxu1  ;;  %v2813_v61 = vpop.f32.mrb[52].mxu0 }
0x120a   :  { %v6627_v41 = vmul.f32 -1.442695, %v2664_v60  ;;  %v2666_v42 = vpop.f32.mrb[41].mxu1  ;;  %v2815_v62 = vpop.f32.mrb[53].mxu0 }
0x120b   :  { %v6628_v0 = vmul.f32 -1.442695, %v2666_v42  ;;  %v2668_v2 = vpop.f32.mrb[42].mxu1  ;;  %v2817_v3 = vpop.f32.mrb[54].mxu0 }
0x120c   :  { %8742 = vpow2.f32 %v6627_v41  ;;  %v6629_v4 = vmul.f32 -1.442695, %v2668_v2  ;;  %v2670_v5 = vpop.f32.mrb[43].mxu1  ;;  %v2819_v57 = vpop.f32.mrb[55].mxu0 }
0x120d   :  { %8744 = vpow2.f32 %v6628_v0  ;;  %v6630_v36 = vmul.f32 -1.442695, %v2670_v5 }
0x120e   :  { %v8735_v39 = vpop.eup %8734  ;;  %8746 = vpow2.f32 %v6629_v4 }
0x120f   :  { %v8737_v40 = vpop.eup %8736  ;;  %v2846_v51 = vadd.f32 1.0, %v8735_v39  ;;  %8748 = vpow2.f32 %v6630_v36 }
0x1210   :  { %v8739_v49 = vpop.eup %8738  ;;  %v2847_v6 = vadd.f32 1.0, %v8737_v40 }
0x1211   :  { %v8741_v7 = vpop.eup %8740  ;;  %8750 = vrcp.f32 %v2846_v51  ;;  %v2848_v8 = vadd.f32 1.0, %v8739_v49 }
0x1212   :  { %8752 = vrcp.f32 %v2847_v6  ;;  %v2849_v38 = vadd.f32 1.0, %v8741_v7  ;;  %v8488_v7 = vld [vmem:[%s10577_s4 + $0x108] sm:$0xff]  }
0x1213   :  { %8754 = vrcp.f32 %v2848_v8  ;;  %v8491_v8 = vld [vmem:[%s10578_s5 + $0x110] sm:$0xff]  }
0x1214   :  { %8756 = vrcp.f32 %v2849_v38  ;;  %v8492_v38 = vld [vmem:[%s10577_s4 + $0x118] sm:$0xff]  }
0x1216   :  { %v8743_v55 = vpop.eup %8742 }
0x1217   :  { %v8745_v53 = vpop.eup %8744  ;;  %v2850_v58 = vadd.f32 1.0, %v8743_v55  ;;  %v8493_v55 = vld [vmem:[%s10578_s5 + $0x118] sm:$0xff]  }
0x1218   :  { %v8747_v59 = vpop.eup %8746  ;;  %v2851_v9 = vadd.f32 1.0, %v8745_v53  ;;  %v8494_v53 = vld [vmem:[%s10577_s4 + $0x120] sm:$0xff]  }
0x1219   :  { %v8749_v10 = vpop.eup %8748  ;;  %8758 = vrcp.f32 %v2850_v58  ;;  %v2852_v11 = vadd.f32 1.0, %v8747_v59  ;;  %v8495_v58 = vld [vmem:[%s10578_s5 + $0x120] sm:$0xff]   ;;  %v8496_v59 = vld [vmem:[%s10577_s4 + $0x128] sm:$0xff]  }
0x121a   :  { %8760 = vrcp.f32 %v2851_v9  ;;  %v2853_v43 = vadd.f32 1.0, %v8749_v10  ;;  %v8497_v9 = vld [vmem:[%s10578_s5 + $0x128] sm:$0xff]   ;;  %v8498_v10 = vld [vmem:[%s10577_s4 + $0x130] sm:$0xff]  }
0x121b   :  { %v8751_v44 = vpop.eup %8750  ;;  %8762 = vrcp.f32 %v2852_v11  ;;  %v8499_v11 = vld [vmem:[%s10578_s5 + $0x130] sm:$0xff]  }
0x121c   :  { %v8753_v52 = vpop.eup %8752  ;;  %v2870_v54 = vmul.f32 %v8751_v44, %v2654_v19  ;;  %8764 = vrcp.f32 %v2853_v43  ;;  %v8500_v43 = vld [vmem:[%s10577_s4 + $0x138] sm:$0xff]  }
0x121d   :  { %v8755_v56 = vpop.eup %8754  ;;  %v2871_v1 = vmul.f32 %v8753_v52, %v2656_v20  ;;  %v8501_v44 = vld [vmem:[%s10578_s5 + $0x138] sm:$0xff]   ;;  %v8502_v52 = vld [vmem:[%s10579_s6 + $0x100] sm:$0xff]  }
0x121e   :  { %v8757_v63 = vpop.eup %8756  ;;  %v2878_v13 = vmul.f32 %v2870_v54, %v2803_v22  ;;  %v2872_v14 = vmul.f32 %v8755_v56, %v2658_v34 }
0x121f   :  { %v2879_v48 = vmul.f32 %v2871_v1, %v2805_v21  ;;  %v2873_v16 = vmul.f32 %v8757_v63, %v2660_v46 }
0x1220   :  { %v2880_v24 = vmul.f32 %v2872_v14, %v2807_v35  ;;  %v8486_v35 = vld [vmem:[%s10577_s4 + $0x100] sm:$0xff]  }
0x1221   :  { %v2881_v25 = vmul.f32 %v2873_v16, %v2809_v47  ;;  %v8487_v47 = vld [vmem:[%s10578_s5 + $0x100] sm:$0xff]   ;;  %7859 = vmatprep.subr.bf16.mxu0 %v8486_v35 }
0x1222   :  { %v2886_v27 = vpack.c.bf16 %v2880_v24, %v2878_v13  ;;  %7879 = vmatprep.subr.bf16.mxu1 %v8487_v47  ;;  %7860 = vmatpush3.bf16.msra.mxu0 %v8486_v35 }
0x1223   :  { %v8759_v28 = vpop.eup %8758  ;;  %v2887_v29 = vpack.c.bf16 %v2881_v25, %v2879_v48  ;;  %7861 = vmatprep.subr.bf16.mxu0 %v8488_v7 }
0x1224   :  { %v8761_v30 = vpop.eup %8760  ;;  %v2874_v31 = vmul.f32 %v8759_v28, %v2664_v60 }
0x1225   :  { %v8763_v32 = vpop.eup %8762  ;;  %v2875_v33 = vmul.f32 %v8761_v30, %v2666_v42  ;;  %3050 = vmatprep.mubr.bf16.mxu1 %v2887_v29 }
0x1226   :  { %v8765_v18 = vpop.eup %8764  ;;  %v2882_v19 = vmul.f32 %v2874_v31, %v2813_v61  ;;  %v2876_v23 = vmul.f32 %v8763_v32, %v2668_v2  ;;  %3051 = vmatmul.mubr.bf16.vlgmr.msra.gmra.mrb[44].mxu1 %v2886_v27  ;;  %7862 = vmatpush3.bf16.msra.mxu0 %v8488_v7  ;;  %v6648_v32 = vld [vmem:[%s10576_s3 + $0x1] ss:$0 sm:$0xff] }
0x1227   :  { %v2883_v20 = vmul.f32 %v2875_v33, %v2815_v62  ;;  %v2877_v45 = vmul.f32 %v8765_v18, %v2670_v5  ;;  %7880 = vmatpush3.bf16.msra.mxu1 %v8487_v47  ;;  %v8503_v47 = vld [vmem:[%s10579_s6 + $0x108] sm:$0xff]  }
0x1228   :  { %v2884_v22 = vmul.f32 %v2876_v23, %v2817_v3 }
0x1229   :  { %v2885_v34 = vmul.f32 %v2877_v45, %v2819_v57 }
0x122a   :  { %v2888_v21 = vpack.c.bf16 %v2884_v22, %v2882_v19 }
0x122b   :  { %v2889_v46 = vpack.c.bf16 %v2885_v34, %v2883_v20 }
0x122d   :  { %3058 = vmatprep.mubr.bf16.mxu1 %v2889_v46 }
0x122e   :  { %3059 = vmatmul.mubr.bf16.gmra.mrb[48].mxu1 %v2888_v21 }
0x12f9   :  { %v7293_v50 = vpop.f32.mrb[44].mxu1 }
0x12fa   :  { %v7294_v60 = vpop.f32.mrb[45].mxu1 }
0x12fb   :  { %v7295_v61 = vadd.f32 %v7294_v60, %v7293_v50  ;;  %v7296_v41 = vpop.f32.mrb[46].mxu1  ;;  %v8504_v50 = vld [vmem:[%s10579_s6 + $0x110] sm:$0xff]   ;;  %v8505_v60 = vld [vmem:[%s10579_s6 + $0x118] sm:$0xff]  }
0x12fc   :  { %v7297_v42 = vpop.f32.mrb[47].mxu1 }
0x12fd   :  { %v9758_v62 = vadd.f32 %v7295_v61, %v9607_v12  ;;  %v7298_v0 = vadd.f32 %v7297_v42, %v7296_v41  ;;  %v8506_v61 = vld [vmem:[%s10579_s6 + $0x120] sm:$0xff]   ;;  %v8507_v41 = vld [vmem:[%s10579_s6 + $0x128] sm:$0xff]   ;;  %v8508_v42 = vld [vmem:[%s10579_s6 + $0x130] sm:$0xff]  }
0x12ff   :  { %v9761_v2 = vadd.f32 %v7298_v0, %v9617_v17  ;;  %v3071_v3 = vmul.f32 %v9758_v62, %v9758_v62  ;;  %v8509_v0 = vld [vmem:[%s10579_s6 + $0x138] sm:$0xff]  }
0x1301   :  { %3075 = vadd.xlane.f32.xlu0 %v3071_v3  ;;  %v7299_v4 = vpop.f32.mrb[48].mxu1  ;;  %v3072_v5 = vmul.f32 %v9761_v2, %v9761_v2 }
0x1302   :  { %v7300_v57 = vpop.f32.mrb[49].mxu1 }
0x1303   :  { %v7301_v36 = vadd.f32 %v7300_v57, %v7299_v4  ;;  %3077 = vadd.xlane.f32.xlu1 %v3072_v5  ;;  %v7302_v39 = vpop.f32.mrb[50].mxu1 }
0x1304   :  { %v7303_v40 = vpop.f32.mrb[51].mxu1 }
0x1305   :  { %v9768_v12 = vadd.f32 %v7301_v36, %v9612_v15  ;;  %v7304_v51 = vadd.f32 %v7303_v40, %v7302_v39  ;;  %v8489_v15 = vld [vmem:[%s10578_s5 + $0x108] sm:$0xff]  }
0x1306   :  { %7881 = vmatprep.subr.bf16.mxu1 %v8489_v15 }
0x1307   :  { %v9771_v17 = vadd.f32 %v7304_v51, %v9624_v26  ;;  %v3073_v49 = vmul.f32 %v9768_v12, %v9768_v12  ;;  %7882 = vmatpush3.bf16.msra.mxu1 %v8489_v15  ;;  %v8490_v26 = vld [vmem:[%s10577_s4 + $0x110] sm:$0xff]  }
0x1308   :  { %7863 = vmatprep.subr.bf16.mxu0 %v8490_v26  ;;  %7883 = vmatprep.subr.bf16.mxu1 %v8491_v8 }
0x1309   :  { %3079 = vadd.xlane.f32.xlu0 %v3073_v49  ;;  %v3074_v6 = vmul.f32 %v9771_v17, %v9771_v17  ;;  %7864 = vmatpush3.bf16.msra.mxu0 %v8490_v26 }
0x130a   :  { %7865 = vmatprep.subr.bf16.mxu0 %v8492_v38 }
0x130b   :  { %3081 = vadd.xlane.f32.xlu1 %v3074_v6  ;;  %7884 = vmatpush3.bf16.msra.mxu1 %v8491_v8  ;;  %v8510_v8 = vld [vmem:[%s10577_s4 + $0x140] sm:$0xff]  }
0x130c   :  { %7885 = vmatprep.subr.bf16.mxu1 %v8493_v55 }
0x130d   :  { %7866 = vmatpush3.bf16.msra.mxu0 %v8492_v38 }
0x130e   :  { %7867 = vmatprep.subr.bf16.mxu0 %v8494_v53 }
0x130f   :  { %7886 = vmatpush3.bf16.msra.mxu1 %v8493_v55  ;;  %v8511_v55 = vld [vmem:[%s10577_s4 + $0x148] sm:$0xff]  }
0x1310   :  { %7887 = vmatprep.subr.bf16.mxu1 %v8495_v58 }
0x1311   :  { %7868 = vmatpush3.bf16.msra.mxu0 %v8494_v53  ;;  %v8512_v53 = vld [vmem:[%s10577_s4 + $0x150] sm:$0xff]  }
0x1312   :  { %7869 = vmatprep.subr.bf16.mxu0 %v8496_v59 }
0x1313   :  { %7888 = vmatpush3.bf16.msra.mxu1 %v8495_v58  ;;  %v8513_v58 = vld [vmem:[%s10577_s4 + $0x158] sm:$0xff]  }
0x1314   :  { %7889 = vmatprep.subr.bf16.mxu1 %v8497_v9 }
0x1315   :  { %7870 = vmatpush3.bf16.msra.mxu0 %v8496_v59 }
0x1316   :  { %7871 = vmatprep.subr.bf16.mxu0 %v8498_v10 }
0x1317   :  { %7890 = vmatpush3.bf16.msra.mxu1 %v8497_v9  ;;  %v8514_v9 = vld [vmem:[%s10577_s4 + $0x160] sm:$0xff]  }
0x1318   :  { %7891 = vmatprep.subr.bf16.mxu1 %v8499_v11 }
0x1319   :  { %7872 = vmatpush3.bf16.msra.mxu0 %v8498_v10 }
0x131a   :  { %7873 = vmatprep.subr.bf16.mxu0 %v8500_v43 }
0x131b   :  { %7892 = vmatpush3.bf16.msra.mxu1 %v8499_v11 }
0x131c   :  { %7893 = vmatprep.subr.bf16.mxu1 %v8501_v44 }
0x131d   :  { %7874 = vmatpush3.bf16.msra.mxu0 %v8500_v43 }
0x131e   :  { %7899 = vmatprep.subr.bf16.mxu0 %v8502_v52 }
0x131f   :  { %7894 = vmatpush3.bf16.msra.mxu1 %v8501_v44 }
0x138e   :  { %v3076_v54 = vpop.xlane.xlu0 %3075 }
0x138f   :  { %v3083_v56 = vmul.f32 0.0078125, %v3076_v54  ;;  %v8515_v54 = vld [vmem:[%s10577_s4 + $0x168] sm:$0xff]  }
0x1390   :  { %v3078_v1 = vpop.xlane.xlu1 %3077 }
0x1391   :  { %v3087_v63 = vadd.f32 1e-06, %v3083_v56  ;;  %v3084_v13 = vmul.f32 0.0078125, %v3078_v1  ;;  %v8516_v56 = vld [vmem:[%s10577_s4 + $0x170] sm:$0xff]   ;;  %v8517_v1 = vld [vmem:[%s10577_s4 + $0x178] sm:$0xff]  }
0x1393   :  { %8766 = vrsqrt.f32 %v3087_v63  ;;  %v3088_v14 = vadd.f32 1e-06, %v3084_v13  ;;  %v8518_v63 = vld [vmem:[%s10579_s6 + $0x140] sm:$0xff]   ;;  %v8519_v13 = vld [vmem:[%s10579_s6 + $0x148] sm:$0xff]  }
0x1395   :  { %8768 = vrsqrt.f32 %v3088_v14  ;;  %v8520_v14 = vld [vmem:[%s10579_s6 + $0x150] sm:$0xff]  }
0x1396   :  { %v3080_v48 = vpop.xlane.xlu0 %3079 }
0x1397   :  { %v3085_v16 = vmul.f32 0.0078125, %v3080_v48  ;;  %v8521_v48 = vld [vmem:[%s10579_s6 + $0x158] sm:$0xff]  }
0x1398   :  { %v3082_v24 = vpop.xlane.xlu1 %3081 }
0x1399   :  { %v3089_v25 = vadd.f32 1e-06, %v3085_v16  ;;  %v3086_v27 = vmul.f32 0.0078125, %v3082_v24  ;;  %v8522_v16 = vld [vmem:[%s10579_s6 + $0x160] sm:$0xff]   ;;  %v8523_v24 = vld [vmem:[%s10579_s6 + $0x168] sm:$0xff]  }
0x139b   :  { %8770 = vrsqrt.f32 %v3089_v25  ;;  %v3090_v28 = vadd.f32 1e-06, %v3086_v27  ;;  %v8524_v25 = vld [vmem:[%s10579_s6 + $0x170] sm:$0xff]   ;;  %v8525_v27 = vld [vmem:[%s10579_s6 + $0x178] sm:$0xff]  }
0x139d   :  { %v8767_v29 = vpop.eup %8766  ;;  %8772 = vrsqrt.f32 %v3090_v28  ;;  %v8526_v28 = vld [vmem:[%s10577_s4 + $0x180] sm:$0xff]  }
0x139e   :  { %v3095_v30 = vmul.f32 %v8767_v29, %v9758_v62  ;;  %v8527_v29 = vld [vmem:[%s10577_s4 + $0x188] sm:$0xff]  }
0x139f   :  { %v8769_v31 = vpop.eup %8768 }
0x13a0   :  { %v3096_v33 = vmul.f32 %v8769_v31, %v9761_v2  ;;  %v3107_v18 = vmul.f32 %v6648_v32, %v3095_v30  ;;  %v8528_v30 = vld [vmem:[%s10577_s4 + $0x190] sm:$0xff]   ;;  %v8529_v31 = vld [vmem:[%s10577_s4 + $0x198] sm:$0xff]  }
0x13a2   :  { %v3108_v19 = vmul.f32 %v6648_v32, %v3096_v33  ;;  %v8531_v33 = vld [vmem:[%s10577_s4 + $0x1a8] sm:$0xff]  }
0x13a4   :  { %v9827_v23 = vpack.c.bf16 %v3108_v19, %v3107_v18  ;;  %v8532_v18 = vld [vmem:[%s10577_s4 + $0x1b0] sm:$0xff]   ;;  %v8533_v19 = vld [vmem:[%s10577_s4 + $0x1b8] sm:$0xff]  }
0x13a5   :  { %v8771_v20 = vpop.eup %8770 }
0x13a6   :  { %v3097_v45 = vmul.f32 %v8771_v20, %v9768_v12  ;;  %7875 = vmatprep.mubr.bf16.mxu0 %v9827_v23  ;;  %7895 = vmatprep.mubr.bf16.mxu1 %v9827_v23  ;;  %v8534_v20 = vld [vmem:[%s10579_s6 + $0x180] sm:$0xff]  }
0x13a7   :  { %v8773_v22 = vpop.eup %8772 }
0x13a8   :  { %v3098_v34 = vmul.f32 %v8773_v22, %v9771_v17  ;;  %v3109_v21 = vmul.f32 %v6648_v32, %v3097_v45  ;;  %v8535_v45 = vld [vmem:[%s10579_s6 + $0x188] sm:$0xff]   ;;  %v8536_v22 = vld [vmem:[%s10579_s6 + $0x190] sm:$0xff]  }
0x13aa   :  { %v3110_v46 = vmul.f32 %v6648_v32, %v3098_v34  ;;  %v8530_v32 = vld [vmem:[%s10577_s4 + $0x1a0] sm:$0xff]   ;;  %v8537_v34 = vld [vmem:[%s10579_s6 + $0x198] sm:$0xff]  }
0x13ac   :  { %v9833_v35 = vpack.c.bf16 %v3110_v46, %v3109_v21  ;;  %v8538_v21 = vld [vmem:[%s10579_s6 + $0x1a0] sm:$0xff]   ;;  %v8539_v46 = vld [vmem:[%s10579_s6 + $0x1a8] sm:$0xff]  }
0x13ae   :  { %7876 = vmatmul.mubr.bf16.vlgmr.msra.gmra.mrb[56].mxu0 %v9833_v35  ;;  %7896 = vmatmul.mubr.bf16.vlgmr.msra.gmra.mrb[52].mxu1 %v9833_v35 }
0x13af   :  { %7900 = vmatpush3.bf16.msra.mxu0 %v8502_v52  ;;  %7915 = vmatprep.mubr.bf16.mxu0 %v9827_v23 }
0x13b0   :  { %7901 = vmatprep.subr.bf16.mxu0 %v8503_v47 }
0x13b3   :  { %7902 = vmatpush3.bf16.msra.mxu0 %v8503_v47  ;;  %v8540_v47 = vld [vmem:[%s10579_s6 + $0x1b0] sm:$0xff]  }
0x13b4   :  { %7903 = vmatprep.subr.bf16.mxu0 %v8504_v50 }
0x13b7   :  { %7904 = vmatpush3.bf16.msra.mxu0 %v8504_v50  ;;  %v8541_v50 = vld [vmem:[%s10579_s6 + $0x1b8] sm:$0xff]  }
0x13b8   :  { %7905 = vmatprep.subr.bf16.mxu0 %v8505_v60 }
0x13bb   :  { %7906 = vmatpush3.bf16.msra.mxu0 %v8505_v60  ;;  %v8542_v60 = vld [vmem:[%s10577_s4 + $0x1c0] sm:$0xff]  }
0x13bc   :  { %7907 = vmatprep.subr.bf16.mxu0 %v8506_v61 }
0x13bf   :  { %7908 = vmatpush3.bf16.msra.mxu0 %v8506_v61  ;;  %v8543_v61 = vld [vmem:[%s10577_s4 + $0x1c8] sm:$0xff]  }
0x13c0   :  { %7909 = vmatprep.subr.bf16.mxu0 %v8507_v41 }
0x13c3   :  { %7910 = vmatpush3.bf16.msra.mxu0 %v8507_v41  ;;  %v8544_v41 = vld [vmem:[%s10577_s4 + $0x1d0] sm:$0xff]  }
0x13c4   :  { %7911 = vmatprep.subr.bf16.mxu0 %v8508_v42 }
0x13c7   :  { %7912 = vmatpush3.bf16.msra.mxu0 %v8508_v42  ;;  %v8545_v42 = vld [vmem:[%s10577_s4 + $0x1d8] sm:$0xff]  }
0x13c8   :  { %7913 = vmatprep.subr.bf16.mxu0 %v8509_v0 }
0x13cb   :  { %7914 = vmatpush3.bf16.msra.mxu0 %v8509_v0  ;;  %v8546_v0 = vld [vmem:[%s10577_s4 + $0x1e0] sm:$0xff]  }
0x13ce   :  { %7916 = vmatmul.mubr.bf16.vlgmr.msra.gmra.mrb[60].mxu0 %v9833_v35 }
0x1481   :  { %v7877_v3 = vpop.f32.mrb[56].mxu0  ;;  %v7897_v4 = vpop.f32.mrb[52].mxu1 }
0x1482   :  { %v3212_v5 = vpop.f32.mrb[57].mxu0  ;;  %v3326_v57 = vpop.f32.mrb[53].mxu1 }
0x1483   :  { %v7878_v36 = vpop.f32.mrb[58].mxu0  ;;  %v7898_v39 = vpop.f32.mrb[54].mxu1 }
0x1484   :  { %v3456_v40 = vpack.c.bf16 %v7878_v36, %v7877_v3  ;;  %v3458_v51 = vpack.c.bf16 %v7898_v39, %v7897_v4  ;;  %v3215_v49 = vpop.f32.mrb[59].mxu0  ;;  %v3329_v6 = vpop.f32.mrb[55].mxu1  ;;  %v8547_v3 = vld [vmem:[%s10577_s4 + $0x1e8] sm:$0xff]   ;;  %v8548_v4 = vld [vmem:[%s10577_s4 + $0x1f0] sm:$0xff]  }
0x1485   :  { %v3455_v7 = vpack.c.bf16 %v3215_v49, %v3212_v5  ;;  %v3457_v15 = vpack.c.bf16 %v3329_v6, %v3326_v57  ;;  %v8549_v5 = vld [vmem:[%s10577_s4 + $0x1f8] sm:$0xff]   ;;  %v8550_v57 = vld [vmem:[%s10579_s6 + $0x1c0] sm:$0xff]   ;;  %v8551_v36 = vld [vmem:[%s10579_s6 + $0x1c8] sm:$0xff]  }
0x1486   :  { %v3469_v38 = vsel %vm449_vm0, %v3458_v51, 0  ;;  %v8552_v39 = vld [vmem:[%s10579_s6 + $0x1d0] sm:$0xff]   ;;  %v8555_v49 = vld [vmem:[%s10579_s6 + $0x1e8] sm:$0xff]  }
0x1487   :  { %v3466_v26 = vsel %vm449_vm0, %v3457_v15, 0  ;;  %8303 = vmatprep.subr.msk.bf16.mxu1 %vm449_vm0, %v3457_v15  ;;  %7923 = vmatprep.mubr.msk.bf16.mxu1 %vm449_vm0, %v3455_v7  ;;  %v8556_v6 = vld [vmem:[%s10579_s6 + $0x1f0] sm:$0xff]   ;;  %v8557_v7 = vld [vmem:[%s10579_s6 + $0x1f8] sm:$0xff]  }
0x1488   :  { %7920 = vmatpush3.bf16.xpose.msra.mxu1 %v3466_v26 }
0x1489   :  { %8304 = vmatprep.subr.msk.bf16.mxu1 %vm449_vm0, %v3458_v51  ;;  %v8554_v51 = vld [vmem:[%s10579_s6 + $0x1e0] sm:$0xff]  }
0x1490   :  { %7922 = vmatpush3.bf16.xpose.msra.mxu1 %v3469_v38 }
0x1491   :  { %7935 = vmatprep.subr.bf16.mxu1 %v8510_v8 }
0x1497   :  { %7924 = vmatmul.mubr.msk.bf16.vlgmr.msra.gmra.mrb[56].mxu1 %vm449_vm0, %v3456_v40  ;;  %v8553_v40 = vld [vmem:[%s10579_s6 + $0x1d8] sm:$0xff]  }
0x1498   :  { %7936 = vmatpush3.bf16.msra.mxu1 %v8510_v8  ;;  %7951 = vmatprep.mubr.bf16.mxu1 %v9827_v23 }
0x1499   :  { %7937 = vmatprep.subr.bf16.mxu1 %v8511_v55 }
0x149c   :  { %7938 = vmatpush3.bf16.msra.mxu1 %v8511_v55 }
0x149d   :  { %7939 = vmatprep.subr.bf16.mxu1 %v8512_v53 }
0x14a0   :  { %7940 = vmatpush3.bf16.msra.mxu1 %v8512_v53 }
0x14a1   :  { %v7917_v59 = vpop.f32.mrb[60].mxu0  ;;  %7941 = vmatprep.subr.bf16.mxu1 %v8513_v58 }
0x14a2   :  { %v3440_v10 = vpop.f32.mrb[61].mxu0 }
0x14a3   :  { %v7918_v11 = vpop.f32.mrb[62].mxu0 }
0x14a4   :  { %v3575_v43 = vpack.c.bf16 %v7918_v11, %v7917_v59  ;;  %v3443_v44 = vpop.f32.mrb[63].mxu0  ;;  %7942 = vmatpush3.bf16.msra.mxu1 %v8513_v58 }
0x14a5   :  { %v3574_v52 = vpack.c.bf16 %v3443_v44, %v3440_v10  ;;  %7943 = vmatprep.subr.bf16.mxu1 %v8514_v9 }
0x14a7   :  { %7927 = vmatprep.subr.bf16.mxu0 %v3574_v52 }
0x14a8   :  { %7928 = vmatpush3.bf16.msra.mxu0 %v3574_v52  ;;  %7944 = vmatpush3.bf16.msra.mxu1 %v8514_v9  ;;  %v10026_v9 = vld [vmem:[%s10574_s1] sm:$0xff]  ;;  %v10039_v52 = vld [vmem:[%s10574_s1 + $0x10] sm:$0xff] }
0x14a9   :  { %7929 = vmatprep.subr.bf16.mxu0 %v3575_v43  ;;  %7945 = vmatprep.subr.bf16.mxu1 %v8515_v54 }
0x14ac   :  { %7930 = vmatpush3.bf16.msra.mxu0 %v3575_v43  ;;  %7946 = vmatpush3.bf16.msra.mxu1 %v8515_v54  ;;  %v10033_v43 = vld [vmem:[%s10574_s1 + $0x8] sm:$0xff] }
0x14ad   :  { %7947 = vmatprep.subr.bf16.mxu1 %v8516_v56 }
0x14b0   :  { %7948 = vmatpush3.bf16.msra.mxu1 %v8516_v56 }
0x14b1   :  { %7949 = vmatprep.subr.bf16.mxu1 %v8517_v1 }
0x14b4   :  { %7950 = vmatpush3.bf16.msra.mxu1 %v8517_v1  ;;  %v10046_v1 = vld [vmem:[%s10574_s1 + $0x18] sm:$0xff] }
0x14b5   :  { %7975 = vmatprep.subr.bf16.mxu1 %v8518_v63 }
0x14b7   :  { %7952 = vmatmul.mubr.bf16.vlgmr.msra.gmra.mrb[60].mxu1 %v9833_v35 }
0x14b8   :  { %7976 = vmatpush3.bf16.msra.mxu1 %v8518_v63  ;;  %7991 = vmatprep.mubr.bf16.mxu1 %v9827_v23 }
0x14b9   :  { %7977 = vmatprep.subr.bf16.mxu1 %v8519_v13 }
0x14bc   :  { %7978 = vmatpush3.bf16.msra.mxu1 %v8519_v13 }
0x14bd   :  { %7979 = vmatprep.subr.bf16.mxu1 %v8520_v14 }
0x14c0   :  { %7980 = vmatpush3.bf16.msra.mxu1 %v8520_v14 }
0x14c1   :  { %7981 = vmatprep.subr.bf16.mxu1 %v8521_v48 }
0x14c4   :  { %7982 = vmatpush3.bf16.msra.mxu1 %v8521_v48 }
0x14c5   :  { %7983 = vmatprep.subr.bf16.mxu1 %v8522_v16 }
0x14c8   :  { %7984 = vmatpush3.bf16.msra.mxu1 %v8522_v16 }
0x14c9   :  { %7985 = vmatprep.subr.bf16.mxu1 %v8523_v24 }
0x14cc   :  { %7986 = vmatpush3.bf16.msra.mxu1 %v8523_v24 }
0x14cd   :  { %7987 = vmatprep.subr.bf16.mxu1 %v8524_v25 }
0x14d0   :  { %7988 = vmatpush3.bf16.msra.mxu1 %v8524_v25 }
0x14d1   :  { %7989 = vmatprep.subr.bf16.mxu1 %v8525_v27 }
0x14d4   :  { %7990 = vmatpush3.bf16.msra.mxu1 %v8525_v27 }
0x14d5   :  { %8027 = vmatprep.subr.bf16.mxu1 %v8526_v28 }
0x14d7   :  { %7992 = vmatmul.mubr.bf16.vlgmr.msra.gmra.mrb[64].mxu1 %v9833_v35 }
0x14d8   :  { %8028 = vmatpush3.bf16.msra.mxu1 %v8526_v28  ;;  %8043 = vmatprep.mubr.bf16.mxu1 %v9827_v23 }
0x14d9   :  { %8029 = vmatprep.subr.bf16.mxu1 %v8527_v29 }
0x14dc   :  { %8030 = vmatpush3.bf16.msra.mxu1 %v8527_v29 }
0x14dd   :  { %8031 = vmatprep.subr.bf16.mxu1 %v8528_v30 }
0x14e0   :  { %8032 = vmatpush3.bf16.msra.mxu1 %v8528_v30 }
0x14e1   :  { %8033 = vmatprep.subr.bf16.mxu1 %v8529_v31 }
0x14e4   :  { %8034 = vmatpush3.bf16.msra.mxu1 %v8529_v31 }
0x14e5   :  { %8035 = vmatprep.subr.bf16.mxu1 %v8530_v32 }
0x14e8   :  { %8036 = vmatpush3.bf16.msra.mxu1 %v8530_v32 }
0x14e9   :  { %8037 = vmatprep.subr.bf16.mxu1 %v8531_v33 }
0x14ec   :  { %8038 = vmatpush3.bf16.msra.mxu1 %v8531_v33 }
0x14ed   :  { %8039 = vmatprep.subr.bf16.mxu1 %v8532_v18 }
0x14f0   :  { %8040 = vmatpush3.bf16.msra.mxu1 %v8532_v18 }
0x14f1   :  { %8041 = vmatprep.subr.bf16.mxu1 %v8533_v19 }
0x14f4   :  { %8042 = vmatpush3.bf16.msra.mxu1 %v8533_v19 }
0x14f5   :  { %8067 = vmatprep.subr.bf16.mxu1 %v8534_v20 }
0x14f7   :  { %8044 = vmatmul.mubr.bf16.vlgmr.msra.gmra.mrb[68].mxu1 %v9833_v35 }
0x14f8   :  { %8068 = vmatpush3.bf16.msra.mxu1 %v8534_v20  ;;  %8083 = vmatprep.mubr.bf16.mxu1 %v9827_v23 }
0x14f9   :  { %8069 = vmatprep.subr.bf16.mxu1 %v8535_v45 }
0x14fc   :  { %8070 = vmatpush3.bf16.msra.mxu1 %v8535_v45 }
0x14fd   :  { %8071 = vmatprep.subr.bf16.mxu1 %v8536_v22 }
0x1500   :  { %8072 = vmatpush3.bf16.msra.mxu1 %v8536_v22 }
0x1501   :  { %8073 = vmatprep.subr.bf16.mxu1 %v8537_v34 }
0x1504   :  { %8074 = vmatpush3.bf16.msra.mxu1 %v8537_v34 }
0x1505   :  { %8075 = vmatprep.subr.bf16.mxu1 %v8538_v21 }
0x1508   :  { %8076 = vmatpush3.bf16.msra.mxu1 %v8538_v21 }
0x1509   :  { %8077 = vmatprep.subr.bf16.mxu1 %v8539_v46 }
0x150c   :  { %8078 = vmatpush3.bf16.msra.mxu1 %v8539_v46 }
0x150d   :  { %8079 = vmatprep.subr.bf16.mxu1 %v8540_v47 }
0x1510   :  { %8080 = vmatpush3.bf16.msra.mxu1 %v8540_v47 }
0x1511   :  { %8081 = vmatprep.subr.bf16.mxu1 %v8541_v50 }
0x1514   :  { %8082 = vmatpush3.bf16.msra.mxu1 %v8541_v50 }
0x1515   :  { %8111 = vmatprep.subr.bf16.mxu1 %v8542_v60 }
0x1517   :  { %8084 = vmatmul.mubr.bf16.vlgmr.msra.gmra.mrb[72].mxu1 %v9833_v35 }
0x1518   :  { %8112 = vmatpush3.bf16.msra.mxu1 %v8542_v60  ;;  %8127 = vmatprep.mubr.bf16.mxu1 %v9827_v23 }
0x1519   :  { %8113 = vmatprep.subr.bf16.mxu1 %v8543_v61 }
0x151c   :  { %8114 = vmatpush3.bf16.msra.mxu1 %v8543_v61 }
0x151d   :  { %8115 = vmatprep.subr.bf16.mxu1 %v8544_v41 }
0x1520   :  { %8116 = vmatpush3.bf16.msra.mxu1 %v8544_v41 }
0x1521   :  { %8117 = vmatprep.subr.bf16.mxu1 %v8545_v42 }
0x1524   :  { %8118 = vmatpush3.bf16.msra.mxu1 %v8545_v42 }
0x1525   :  { %8119 = vmatprep.subr.bf16.mxu1 %v8546_v0 }
0x1528   :  { %8120 = vmatpush3.bf16.msra.mxu1 %v8546_v0 }
0x1529   :  { %8121 = vmatprep.subr.bf16.mxu1 %v8547_v3 }
0x152c   :  { %8122 = vmatpush3.bf16.msra.mxu1 %v8547_v3 }
0x152d   :  { %8123 = vmatprep.subr.bf16.mxu1 %v8548_v4 }
0x1530   :  { %8124 = vmatpush3.bf16.msra.mxu1 %v8548_v4 }
0x1531   :  { %8125 = vmatprep.subr.bf16.mxu1 %v8549_v5 }
0x1534   :  { %8126 = vmatpush3.bf16.msra.mxu1 %v8549_v5 }
0x1535   :  { %8151 = vmatprep.subr.bf16.mxu1 %v8550_v57 }
0x1537   :  { %8128 = vmatmul.mubr.bf16.vlgmr.msra.gmra.mrb[76].mxu1 %v9833_v35 }
0x1538   :  { %8152 = vmatpush3.bf16.msra.mxu1 %v8550_v57  ;;  %8167 = vmatprep.mubr.bf16.mxu1 %v9827_v23 }
0x1539   :  { %8153 = vmatprep.subr.bf16.mxu1 %v8551_v36 }
0x153c   :  { %8154 = vmatpush3.bf16.msra.mxu1 %v8551_v36 }
0x153d   :  { %8155 = vmatprep.subr.bf16.mxu1 %v8552_v39 }
0x1540   :  { %8156 = vmatpush3.bf16.msra.mxu1 %v8552_v39 }
0x1541   :  { %8157 = vmatprep.subr.bf16.mxu1 %v8553_v40 }
0x1544   :  { %8158 = vmatpush3.bf16.msra.mxu1 %v8553_v40 }
0x1545   :  { %8159 = vmatprep.subr.bf16.mxu1 %v8554_v51 }
0x1548   :  { %8160 = vmatpush3.bf16.msra.mxu1 %v8554_v51 }
0x1549   :  { %8161 = vmatprep.subr.bf16.mxu1 %v8555_v49 }
0x154c   :  { %8162 = vmatpush3.bf16.msra.mxu1 %v8555_v49 }
0x154d   :  { %8163 = vmatprep.subr.bf16.mxu1 %v8556_v6 }
0x1550   :  { %8164 = vmatpush3.bf16.msra.mxu1 %v8556_v6 }
0x1551   :  { %8165 = vmatprep.subr.bf16.mxu1 %v8557_v7 }
0x1554   :  { %8166 = vmatpush3.bf16.msra.mxu1 %v8557_v7 }
0x1557   :  { %8168 = vmatmul.mubr.bf16.vlgmr.msra.gmra.mrb[80].mxu1 %v9833_v35 }
0x1558   :  { %5664 = vmatprep.mubr.bf16.mxu1 %v8922_v37 }
0x156a   :  { %v7925_v15 = vpop.f32.mrb[56].mxu1 }
0x156b   :  { %v3505_v26 = vpop.f32.mrb[57].mxu1  ;;  %v3522_v8 = vmul.f32 0.17677669, %v7925_v15 }
0x156c   :  { %v3520_v38 = vmul.f32 0.17677669, %v3505_v26  ;;  %v7926_v55 = vpop.f32.mrb[58].mxu1 }
0x156d   :  { %v3508_v53 = vpop.f32.mrb[59].mxu1  ;;  %v3523_v58 = vmul.f32 0.17677669, %v7926_v55  ;;  %v3526_v54 = vadd.f32 %v10039_v52, %v3522_v8 }
0x156e   :  { %v3521_v59 = vmul.f32 0.17677669, %v3508_v53  ;;  %v3524_v10 = vadd.f32 %v10026_v9, %v3520_v38 }
0x156f   :  { %v3527_v63 = vadd.f32 %v10046_v1, %v3523_v58  ;;  %v3534_v13 = vsel %vm449_vm0, %v3526_v54, -inf }
0x1570   :  { %v3528_v11 = vsel %vm449_vm0, %v3524_v10, -inf  ;;  %v3525_v44 = vadd.f32 %v10033_v43, %v3521_v59 }
0x1571   :  { %3529 = vmax.xlane.f32.xlu0 %v3528_v11  ;;  %v3537_v14 = vsel %vm449_vm0, %v3527_v63, -inf }
0x1572   :  { %v3531_v56 = vsel %vm449_vm0, %v3525_v44, -inf }
0x1573   :  { %3532 = vmax.xlane.f32.xlu1 %v3531_v56 }
0x1575   :  { %3535 = vmax.xlane.f32.xlu0 %v3534_v13 }
0x1577   :  { %3538 = vmax.xlane.f32.xlu1 %v3537_v14 }
0x158a   :  { %v10051_v48 = vpop.f32.mrb[60].mxu1 }
0x158b   :  { %v10053_v16 = vpop.f32.mrb[61].mxu1 }
0x158c   :  { %v10055_v24 = vpop.f32.mrb[62].mxu1 }
0x158d   :  { %v3981_v25 = vpack.c.bf16 %v10055_v24, %v10051_v48  ;;  %v10059_v27 = vpop.f32.mrb[63].mxu1 }
0x158e   :  { %v3980_v28 = vpack.c.bf16 %v10059_v27, %v10053_v16 }
0x15aa   :  { %v7993_v29 = vpop.f32.mrb[64].mxu1 }
0x15ab   :  { %v3965_v30 = vpop.f32.mrb[65].mxu1 }
0x15ac   :  { %v7994_v31 = vpop.f32.mrb[66].mxu1 }
0x15ad   :  { %v10063_v32 = vpack.c.bf16 %v7994_v31, %v7993_v29  ;;  %v3968_v33 = vpop.f32.mrb[67].mxu1 }
0x15ae   :  { %v10065_v18 = vpack.c.bf16 %v3968_v33, %v3965_v30  ;;  %v8558_v33 = vld [vmem:[%s10578_s5 + $0x140] sm:$0xff]  }
0x15af   :  { %7955 = vmatprep.subr.bf16.mxu0 %v8558_v33 }
0x15ca   :  { %v10067_v19 = vpop.f32.mrb[68].mxu1 }
0x15cb   :  { %v10069_v20 = vpop.f32.mrb[69].mxu1 }
0x15cc   :  { %v10071_v45 = vpop.f32.mrb[70].mxu1 }
0x15cd   :  { %v4640_v22 = vpack.c.bf16 %v10071_v45, %v10067_v19  ;;  %v10075_v34 = vpop.f32.mrb[71].mxu1 }
0x15ce   :  { %v4639_v21 = vpack.c.bf16 %v10075_v34, %v10069_v20 }
0x15ea   :  { %v8085_v46 = vpop.f32.mrb[72].mxu1 }
0x15eb   :  { %v4624_v47 = vpop.f32.mrb[73].mxu1 }
0x15ec   :  { %v8086_v50 = vpop.f32.mrb[74].mxu1 }
0x15ed   :  { %v10079_v60 = vpack.c.bf16 %v8086_v50, %v8085_v46  ;;  %v4627_v61 = vpop.f32.mrb[75].mxu1 }
0x15ee   :  { %v10081_v41 = vpack.c.bf16 %v4627_v61, %v4624_v47 }
0x15fe   :  { %v3530_v42 = vpop.xlane.xlu0 %3529 }
0x15ff   :  { %v3540_v0 = vsub.f32 %v3524_v10, %v3530_v42 }
0x1600   :  { %v3533_v3 = vpop.xlane.xlu1 %3532 }
0x1601   :  { %v3544_v4 = vmul.f32 1.442695, %v3540_v0  ;;  %v3541_v5 = vsub.f32 %v3525_v44, %v3533_v3 }
0x1602   :  { %v3536_v57 = vpop.xlane.xlu0 %3535 }
0x1603   :  { %8774 = vpow2.f32 %v3544_v4  ;;  %v3546_v36 = vmul.f32 1.442695, %v3541_v5  ;;  %v3542_v39 = vsub.f32 %v3526_v54, %v3536_v57 }
0x1604   :  { %v3539_v40 = vpop.xlane.xlu1 %3538 }
0x1605   :  { %8776 = vpow2.f32 %v3546_v36  ;;  %v3548_v51 = vmul.f32 1.442695, %v3542_v39  ;;  %v3543_v49 = vsub.f32 %v3527_v63, %v3539_v40 }
0x1607   :  { %8778 = vpow2.f32 %v3548_v51  ;;  %v3550_v6 = vmul.f32 1.442695, %v3543_v49  ;;  %v8559_v49 = vld [vmem:[%s10578_s5 + $0x148] sm:$0xff]  }
0x1609   :  { %8780 = vpow2.f32 %v3550_v6  ;;  %v8560_v6 = vld [vmem:[%s10578_s5 + $0x150] sm:$0xff]  }
0x160a   :  { %v10083_v7 = vpop.f32.mrb[76].mxu1 }
0x160b   :  { %v10085_v15 = vpop.f32.mrb[77].mxu1 }
0x160c   :  { %v10087_v26 = vpop.f32.mrb[78].mxu1 }
0x160d   :  { %v8775_v8 = vpop.eup %8774  ;;  %v5236_v38 = vpack.c.bf16 %v10087_v26, %v10083_v7  ;;  %v10091_v55 = vpop.f32.mrb[79].mxu1 }
0x160e   :  { %v5235_v53 = vpack.c.bf16 %v10091_v55, %v10085_v15  ;;  %v3552_v58 = vsel %vm449_vm0, %v8775_v8, 0.0 }
0x160f   :  { %v8777_v59 = vpop.eup %8776  ;;  %3553 = vadd.xlane.f32.xlu0 %v3552_v58  ;;  %v8562_v58 = vld [vmem:[%s10578_s5 + $0x160] sm:$0xff]  }
0x1610   :  { %v3555_v10 = vsel %vm449_vm0, %v8777_v59, 0.0 }
0x1611   :  { %v8779_v11 = vpop.eup %8778  ;;  %3556 = vadd.xlane.f32.xlu1 %v3555_v10  ;;  %v8564_v10 = vld [vmem:[%s10578_s5 + $0x170] sm:$0xff]  }
0x1612   :  { %v3558_v44 = vsel %vm449_vm0, %v8779_v11, 0.0 }
0x1613   :  { %v8781_v54 = vpop.eup %8780  ;;  %3559 = vadd.xlane.f32.xlu0 %v3558_v44 }
0x1614   :  { %v3561_v56 = vsel %vm449_vm0, %v8781_v54, 0.0 }
0x1615   :  { %3562 = vadd.xlane.f32.xlu1 %v3561_v56 }
0x162a   :  { %v8169_v63 = vpop.f32.mrb[80].mxu1 }
0x162b   :  { %v5220_v13 = vpop.f32.mrb[81].mxu1 }
0x162c   :  { %v8170_v14 = vpop.f32.mrb[82].mxu1 }
0x162d   :  { %v10099_v29 = vpack.c.bf16 %v8170_v14, %v8169_v63  ;;  %v5223_v30 = vpop.f32.mrb[83].mxu1 }
0x162e   :  { %v10101_v31 = vpack.c.bf16 %v5223_v30, %v5220_v13 }
0x169c   :  { %v3554_v46 = vpop.xlane.xlu0 %3553 }
0x169d   :  { %8782 = vrcp.f32 %v3554_v46 }
0x169e   :  { %v3557_v47 = vpop.xlane.xlu1 %3556 }
0x169f   :  { %8784 = vrcp.f32 %v3557_v47 }
0x16a0   :  { %v3560_v50 = vpop.xlane.xlu0 %3559 }
0x16a1   :  { %8786 = vrcp.f32 %v3560_v50 }
0x16a2   :  { %v3563_v61 = vpop.xlane.xlu1 %3562 }
0x16a3   :  { %8788 = vrcp.f32 %v3563_v61 }
0x16a7   :  { %v8783_v42 = vpop.eup %8782 }
0x16a8   :  { %v3568_v3 = vmul.f32 %v8783_v42, %v8775_v8  ;;  %v8561_v8 = vld [vmem:[%s10578_s5 + $0x158] sm:$0xff]  }
0x16a9   :  { %v8785_v0 = vpop.eup %8784 }
0x16aa   :  { %v3569_v4 = vmul.f32 %v8785_v0, %v8777_v59  ;;  %v8563_v59 = vld [vmem:[%s10578_s5 + $0x168] sm:$0xff]  }
0x16ab   :  { %v8787_v5 = vpop.eup %8786 }
0x16ac   :  { %v3572_v57 = vpack.c.bf16 %v3569_v4, %v3568_v3  ;;  %v3570_v39 = vmul.f32 %v8787_v5, %v8779_v11  ;;  %v8565_v11 = vld [vmem:[%s10578_s5 + $0x178] sm:$0xff]  }
0x16ad   :  { %v8789_v36 = vpop.eup %8788 }
0x16ae   :  { %v3571_v40 = vmul.f32 %v8789_v36, %v8781_v54  ;;  %7931 = vmatprep.mubr.msk.bf16.mxu0 %vm449_vm0, %v3572_v57 }
0x16b0   :  { %v3573_v51 = vpack.c.bf16 %v3571_v40, %v3570_v39 }
0x16b2   :  { %7932 = vmatmul.mubr.msk.bf16.vlgmr.msra.gmra.mrb[64].mxu0 %vm449_vm0, %v3573_v51 }
0x16b3   :  { %7956 = vmatpush3.bf16.msra.mxu0 %v8558_v33  ;;  %7971 = vmatprep.mubr.bf16.mxu0 %v9827_v23 }
0x16b4   :  { %7957 = vmatprep.subr.bf16.mxu0 %v8559_v49 }
0x16b7   :  { %7958 = vmatpush3.bf16.msra.mxu0 %v8559_v49 }
0x16b8   :  { %7959 = vmatprep.subr.bf16.mxu0 %v8560_v6 }
0x16bb   :  { %7960 = vmatpush3.bf16.msra.mxu0 %v8560_v6 }
0x16bc   :  { %7961 = vmatprep.subr.bf16.mxu0 %v8561_v8 }
0x16bf   :  { %7962 = vmatpush3.bf16.msra.mxu0 %v8561_v8 }
0x16c0   :  { %7963 = vmatprep.subr.bf16.mxu0 %v8562_v58 }
0x16c3   :  { %7964 = vmatpush3.bf16.msra.mxu0 %v8562_v58 }
0x16c4   :  { %7965 = vmatprep.subr.bf16.mxu0 %v8563_v59 }
0x16c7   :  { %7966 = vmatpush3.bf16.msra.mxu0 %v8563_v59 }
0x16c8   :  { %7967 = vmatprep.subr.bf16.mxu0 %v8564_v10 }
0x16cb   :  { %7968 = vmatpush3.bf16.msra.mxu0 %v8564_v10 }
0x16cc   :  { %7969 = vmatprep.subr.bf16.mxu0 %v8565_v11 }
0x16cf   :  { %7970 = vmatpush3.bf16.msra.mxu0 %v8565_v11 }
0x16d2   :  { %7972 = vmatmul.mubr.bf16.vlgmr.msra.gmra.mrb[68].mxu0 %v9833_v35 }
0x16d3   :  { %7999 = vmatprep.mubr.msk.bf16.mxu0 %vm449_vm0, %v3980_v28 }
0x1785   :  { %v10135_v44 = vpop.f32.mrb[64].mxu0 }
0x1786   :  { %v10137_v54 = vpop.f32.mrb[65].mxu0 }
0x1787   :  { %v10139_v56 = vpop.f32.mrb[66].mxu0 }
0x1788   :  { %v3632_v63 = vpack.c.bf16 %v10139_v56, %v10135_v44  ;;  %v10143_v13 = vpop.f32.mrb[67].mxu0  ;;  %v8574_v44 = vld [vmem:[%s10578_s5 + $0x1a0] sm:$0xff]   ;;  %v8575_v56 = vld [vmem:[%s10578_s5 + $0x1a8] sm:$0xff]  }
0x1789   :  { %v3631_v14 = vpack.c.bf16 %v10143_v13, %v10137_v54  ;;  %v8572_v54 = vld [vmem:[%s10578_s5 + $0x190] sm:$0xff]   ;;  %v8573_v13 = vld [vmem:[%s10578_s5 + $0x198] sm:$0xff]  }
0x17a5   :  { %v7973_v30 = vpop.f32.mrb[68].mxu0 }
0x17a6   :  { %v3851_v33 = vpop.f32.mrb[69].mxu0 }
0x17a7   :  { %v7974_v46 = vpop.f32.mrb[70].mxu0 }
0x17a8   :  { %v3983_v16 = vpack.c.bf16 %v7974_v46, %v7973_v30  ;;  %v3854_v27 = vpop.f32.mrb[71].mxu0 }
0x17a9   :  { %v3982_v28 = vpack.c.bf16 %v3854_v27, %v3851_v33 }
0x17aa   :  { %v3994_v50 = vsel %vm449_vm0, %v3983_v16, 0 }
0x17ab   :  { %v3991_v47 = vsel %vm449_vm0, %v3982_v28, 0  ;;  %8305 = vmatprep.subr.msk.bf16.mxu0 %vm449_vm0, %v3982_v28 }
0x17ac   :  { %7996 = vmatpush3.bf16.xpose.msra.mxu0 %v3991_v47 }
0x17ad   :  { %8306 = vmatprep.subr.msk.bf16.mxu0 %vm449_vm0, %v3983_v16 }
0x17b4   :  { %7998 = vmatpush3.bf16.xpose.msra.mxu0 %v3994_v50 }
0x17b5   :  { %8003 = vmatprep.subr.bf16.mxu0 %v10065_v18 }
0x17bb   :  { %8000 = vmatmul.mubr.msk.bf16.vlgmr.msra.gmra.mrb[72].mxu0 %vm449_vm0, %v3981_v25 }
0x17bc   :  { %8004 = vmatpush3.bf16.msra.mxu0 %v10065_v18 }
0x17bd   :  { %8005 = vmatprep.subr.bf16.mxu0 %v10063_v32 }
0x17c0   :  { %8006 = vmatpush3.bf16.msra.mxu0 %v10063_v32 }
0x188e   :  { %v8001_v61 = vpop.f32.mrb[72].mxu0 }
0x188f   :  { %v4030_v42 = vpop.f32.mrb[73].mxu0  ;;  %v4047_v0 = vmul.f32 0.17677669, %v8001_v61 }
0x1890   :  { %v4045_v3 = vmul.f32 0.17677669, %v4030_v42  ;;  %v8002_v4 = vpop.f32.mrb[74].mxu0 }
0x1891   :  { %v4033_v5 = vpop.f32.mrb[75].mxu0  ;;  %v4048_v57 = vmul.f32 0.17677669, %v8002_v4  ;;  %v4051_v25 = vadd.f32 %v10039_v52, %v4047_v0 }
0x1892   :  { %v4046_v36 = vmul.f32 0.17677669, %v4033_v5  ;;  %v4049_v39 = vadd.f32 %v10026_v9, %v4045_v3  ;;  %v8566_v5 = vld [vmem:[%s10580_s7 + $0x50] sm:$0xff]  }
0x1893   :  { %v4052_v32 = vadd.f32 %v10046_v1, %v4048_v57  ;;  %v4059_v40 = vsel %vm449_vm0, %v4051_v25, -inf  ;;  %8011 = vmatprep.subr.bf16.mxu0 %v8566_v5 }
0x1894   :  { %v4053_v48 = vsel %vm449_vm0, %v4049_v39, -inf  ;;  %v4050_v24 = vadd.f32 %v10033_v43, %v4046_v36 }
0x1895   :  { %4054 = vmax.xlane.f32.xlu0 %v4053_v48  ;;  %v4062_v51 = vsel %vm449_vm0, %v4052_v32, -inf }
0x1896   :  { %v4056_v18 = vsel %vm449_vm0, %v4050_v24, -inf }
0x1897   :  { %4057 = vmax.xlane.f32.xlu1 %v4056_v18 }
0x1899   :  { %4060 = vmax.xlane.f32.xlu0 %v4059_v40 }
0x189b   :  { %4063 = vmax.xlane.f32.xlu1 %v4062_v51 }
0x1922   :  { %v4055_v49 = vpop.xlane.xlu0 %4054 }
0x1923   :  { %v4065_v6 = vsub.f32 %v4049_v39, %v4055_v49 }
0x1924   :  { %v4058_v8 = vpop.xlane.xlu1 %4057 }
0x1925   :  { %v4069_v58 = vmul.f32 1.442695, %v4065_v6  ;;  %v4066_v59 = vsub.f32 %v4050_v24, %v4058_v8 }
0x1926   :  { %v4061_v10 = vpop.xlane.xlu0 %4060 }
0x1927   :  { %8790 = vpow2.f32 %v4069_v58  ;;  %v4071_v11 = vmul.f32 1.442695, %v4066_v59  ;;  %v4067_v30 = vsub.f32 %v4051_v25, %v4061_v10  ;;  %v8567_v59 = vld [vmem:[%s10580_s7 + $0x58] sm:$0xff]   ;;  %v8568_v10 = vld [vmem:[%s10580_s7 + $0x40] sm:$0xff]  }
0x1928   :  { %v4064_v33 = vpop.xlane.xlu1 %4063 }
0x1929   :  { %8792 = vpow2.f32 %v4071_v11  ;;  %v4073_v46 = vmul.f32 1.442695, %v4067_v30  ;;  %v4068_v16 = vsub.f32 %v4052_v32, %v4064_v33 }
0x192b   :  { %8794 = vpow2.f32 %v4073_v46  ;;  %v4075_v27 = vmul.f32 1.442695, %v4068_v16 }
0x192d   :  { %8796 = vpow2.f32 %v4075_v27 }
0x1931   :  { %v8791_v28 = vpop.eup %8790 }
0x1932   :  { %v4077_v47 = vsel %vm449_vm0, %v8791_v28, 0.0 }
0x1933   :  { %v8793_v50 = vpop.eup %8792  ;;  %4078 = vadd.xlane.f32.xlu0 %v4077_v47  ;;  %v8570_v47 = vld [vmem:[%s10578_s5 + $0x180] sm:$0xff]  }
0x1934   :  { %v4080_v61 = vsel %vm449_vm0, %v8793_v50, 0.0 }
0x1935   :  { %v8795_v42 = vpop.eup %8794  ;;  %4081 = vadd.xlane.f32.xlu1 %v4080_v61 }
0x1936   :  { %v4083_v0 = vsel %vm449_vm0, %v8795_v42, 0.0 }
0x1937   :  { %v8797_v3 = vpop.eup %8796  ;;  %4084 = vadd.xlane.f32.xlu0 %v4083_v0 }
0x1938   :  { %v4086_v4 = vsel %vm449_vm0, %v8797_v3, 0.0 }
0x1939   :  { %4087 = vadd.xlane.f32.xlu1 %v4086_v4 }
0x19c0   :  { %v4079_v57 = vpop.xlane.xlu0 %4078 }
0x19c1   :  { %8798 = vrcp.f32 %v4079_v57 }
0x19c2   :  { %v4082_v36 = vpop.xlane.xlu1 %4081 }
0x19c3   :  { %8800 = vrcp.f32 %v4082_v36 }
0x19c4   :  { %v4085_v39 = vpop.xlane.xlu0 %4084 }
0x19c5   :  { %8802 = vrcp.f32 %v4085_v39 }
0x19c6   :  { %v4088_v48 = vpop.xlane.xlu1 %4087 }
0x19c7   :  { %8804 = vrcp.f32 %v4088_v48 }
0x19cb   :  { %v8799_v24 = vpop.eup %8798 }
0x19cc   :  { %v4093_v18 = vmul.f32 %v8799_v24, %v8791_v28  ;;  %v8569_v28 = vld [vmem:[%s10580_s7 + $0x48] sm:$0xff]  }
0x19cd   :  { %v8801_v25 = vpop.eup %8800 }
0x19ce   :  { %v4094_v32 = vmul.f32 %v8801_v25, %v8793_v50  ;;  %v8571_v50 = vld [vmem:[%s10578_s5 + $0x188] sm:$0xff]  }
0x19cf   :  { %v8803_v40 = vpop.eup %8802 }
0x19d0   :  { %v4097_v51 = vpack.c.bf16 %v4094_v32, %v4093_v18  ;;  %v4095_v6 = vmul.f32 %v8803_v40, %v8795_v42 }
0x19d1   :  { %v8805_v49 = vpop.eup %8804 }
0x19d2   :  { %v4096_v8 = vmul.f32 %v8805_v49, %v8797_v3  ;;  %8007 = vmatprep.mubr.msk.bf16.mxu0 %vm449_vm0, %v4097_v51 }
0x19d4   :  { %v4098_v58 = vpack.c.bf16 %v4096_v8, %v4095_v6 }
0x19d6   :  { %8008 = vmatmul.mubr.msk.bf16.vlgmr.msra.gmra.mrb[76].mxu0 %vm449_vm0, %v4098_v58 }
0x19d7   :  { %8012 = vmatpush3.bf16.msra.mxu0 %v8566_v5 }
0x19d8   :  { %8013 = vmatprep.subr.bf16.mxu0 %v8567_v59 }
0x19db   :  { %8014 = vmatpush3.bf16.msra.mxu0 %v8567_v59 }
0x19dc   :  { %8019 = vmatprep.subr.bf16.mxu0 %v8568_v10 }
0x1aa9   :  { %v8009_v11 = vpop.f32.mrb[76].mxu0 }
0x1aaa   :  { %v4141_v30 = vpop.f32.mrb[77].mxu0 }
0x1aab   :  { %v8010_v33 = vpop.f32.mrb[78].mxu0 }
0x1aac   :  { %v4157_v46 = vpack.c.bf16 %v8010_v33, %v8009_v11  ;;  %v4144_v16 = vpop.f32.mrb[79].mxu0 }
0x1aad   :  { %v4156_v27 = vpack.c.bf16 %v4144_v16, %v4141_v30 }
0x1aaf   :  { %8015 = vmatprep.mubr.msk.bf16.mxu0 %vm449_vm0, %v4156_v27 }
0x1ab0   :  { %8016 = vmatmul.mubr.msk.bf16.vlgmr.msra.gmra.mrb[80].mxu0 %vm449_vm0, %v4157_v46 }
0x1ab1   :  { %8023 = vmatprep.mubr.msk.bf16.mxu0 %vm449_vm0, %v3631_v14  ;;  %8020 = vmatpush3.bf16.msra.mxu0 %v8568_v10  ;;  %v8577_v14 = vld [vmem:[%s10578_s5 + $0x1b8] sm:$0xff]  }
0x1ab2   :  { %8021 = vmatprep.subr.bf16.mxu0 %v8569_v28 }
0x1ab5   :  { %8022 = vmatpush3.bf16.msra.mxu0 %v8569_v28 }
0x1ab6   :  { %8047 = vmatprep.subr.bf16.mxu0 %v8570_v47 }
0x1abc   :  { %8024 = vmatmul.mubr.msk.bf16.vlgmr.msra.gmra.mrb[80].mxu0 %vm449_vm0, %v3632_v63  ;;  %v8576_v63 = vld [vmem:[%s10578_s5 + $0x1b0] sm:$0xff]  }
0x1abd   :  { %8048 = vmatpush3.bf16.msra.mxu0 %v8570_v47  ;;  %8063 = vmatprep.mubr.bf16.mxu0 %v9827_v23 }
0x1abe   :  { %8049 = vmatprep.subr.bf16.mxu0 %v8571_v50 }
0x1ac1   :  { %8050 = vmatpush3.bf16.msra.mxu0 %v8571_v50 }
0x1ac2   :  { %8051 = vmatprep.subr.bf16.mxu0 %v8572_v54 }
0x1ac5   :  { %8052 = vmatpush3.bf16.msra.mxu0 %v8572_v54 }
0x1ac6   :  { %8053 = vmatprep.subr.bf16.mxu0 %v8573_v13 }
0x1ac9   :  { %8054 = vmatpush3.bf16.msra.mxu0 %v8573_v13 }
0x1aca   :  { %8055 = vmatprep.subr.bf16.mxu0 %v8574_v44 }
0x1acd   :  { %8056 = vmatpush3.bf16.msra.mxu0 %v8574_v44 }
0x1ace   :  { %8057 = vmatprep.subr.bf16.mxu0 %v8575_v56 }
0x1ad1   :  { %8058 = vmatpush3.bf16.msra.mxu0 %v8575_v56 }
0x1ad2   :  { %8059 = vmatprep.subr.bf16.mxu0 %v8576_v63 }
0x1ad5   :  { %8060 = vmatpush3.bf16.msra.mxu0 %v8576_v63 }
0x1ad6   :  { %8061 = vmatprep.subr.bf16.mxu0 %v8577_v14 }
0x1ad9   :  { %8062 = vmatpush3.bf16.msra.mxu0 %v8577_v14  ;;  %v8578_v14 = vld [vmem:[%s10580_s7 + $0x60] sm:$0xff]  }
0x1adc   :  { %8064 = vmatmul.mubr.bf16.vlgmr.msra.gmra.mrb[84].mxu0 %v9833_v35 }
0x1add   :  { %8091 = vmatprep.mubr.msk.bf16.mxu0 %vm449_vm0, %v4639_v21 }
0x1baf   :  { %v8065_v61 = vpop.f32.mrb[84].mxu0 }
0x1bb0   :  { %v4510_v42 = vpop.f32.mrb[85].mxu0 }
0x1bb1   :  { %v8066_v0 = vpop.f32.mrb[86].mxu0 }
0x1bb2   :  { %v4642_v3 = vpack.c.bf16 %v8066_v0, %v8065_v61  ;;  %v4513_v4 = vpop.f32.mrb[87].mxu0 }
0x1bb3   :  { %v4641_v5 = vpack.c.bf16 %v4513_v4, %v4510_v42 }
0x1bb4   :  { %v4653_v36 = vsel %vm449_vm0, %v4642_v3, 0 }
0x1bb5   :  { %v4650_v57 = vsel %vm449_vm0, %v4641_v5, 0  ;;  %8307 = vmatprep.subr.msk.bf16.mxu0 %vm449_vm0, %v4641_v5 }
0x1bb6   :  { %8088 = vmatpush3.bf16.xpose.msra.mxu0 %v4650_v57 }
0x1bb7   :  { %8308 = vmatprep.subr.msk.bf16.mxu0 %vm449_vm0, %v4642_v3 }
0x1bbe   :  { %8090 = vmatpush3.bf16.xpose.msra.mxu0 %v4653_v36 }
0x1bbf   :  { %8095 = vmatprep.subr.bf16.mxu0 %v10081_v41 }
0x1bc5   :  { %8092 = vmatmul.mubr.msk.bf16.vlgmr.msra.gmra.mrb[88].mxu0 %vm449_vm0, %v4640_v22 }
0x1bc6   :  { %8096 = vmatpush3.bf16.msra.mxu0 %v10081_v41 }
0x1bc7   :  { %8097 = vmatprep.subr.bf16.mxu0 %v10079_v60 }
0x1bca   :  { %8098 = vmatpush3.bf16.msra.mxu0 %v10079_v60 }
0x1bcb   :  { %8103 = vmatprep.subr.bf16.mxu0 %v8578_v14 }
0x1c98   :  { %v8093_v20 = vpop.f32.mrb[88].mxu0 }
0x1c99   :  { %v4689_v34 = vpop.f32.mrb[89].mxu0  ;;  %v4706_v21 = vmul.f32 0.17677669, %v8093_v20 }
0x1c9a   :  { %v4704_v39 = vmul.f32 0.17677669, %v4689_v34  ;;  %v8094_v48 = vpop.f32.mrb[90].mxu0 }
0x1c9b   :  { %v4692_v24 = vpop.f32.mrb[91].mxu0  ;;  %v4707_v25 = vmul.f32 0.17677669, %v8094_v48  ;;  %v4710_v22 = vadd.f32 %v10039_v52, %v4706_v21 }
0x1c9c   :  { %v4705_v18 = vmul.f32 0.17677669, %v4692_v24  ;;  %v4708_v32 = vadd.f32 %v10026_v9, %v4704_v39 }
0x1c9d   :  { %v4711_v60 = vadd.f32 %v10046_v1, %v4707_v25  ;;  %v4718_v40 = vsel %vm449_vm0, %v4710_v22, -inf  ;;  %v8579_v25 = vld [vmem:[%s10580_s7 + $0x68] sm:$0xff]  }
0x1c9e   :  { %v4712_v19 = vsel %vm449_vm0, %v4708_v32, -inf  ;;  %v4709_v45 = vadd.f32 %v10033_v43, %v4705_v18  ;;  %v8580_v18 = vld [vmem:[%s10578_s5 + $0x1c0] sm:$0xff]  }
0x1c9f   :  { %4713 = vmax.xlane.f32.xlu0 %v4712_v19  ;;  %v4721_v51 = vsel %vm449_vm0, %v4711_v60, -inf }
0x1ca0   :  { %v4715_v41 = vsel %vm449_vm0, %v4709_v45, -inf }
0x1ca1   :  { %4716 = vmax.xlane.f32.xlu1 %v4715_v41 }
0x1ca3   :  { %4719 = vmax.xlane.f32.xlu0 %v4718_v40  ;;  %v8581_v40 = vld [vmem:[%s10578_s5 + $0x1c8] sm:$0xff]  }
0x1ca5   :  { %4722 = vmax.xlane.f32.xlu1 %v4721_v51  ;;  %v8582_v51 = vld [vmem:[%s10578_s5 + $0x1d0] sm:$0xff]  }
0x1d2c   :  { %v4714_v49 = vpop.xlane.xlu0 %4713 }
0x1d2d   :  { %v4724_v6 = vsub.f32 %v4708_v32, %v4714_v49  ;;  %v8583_v49 = vld [vmem:[%s10578_s5 + $0x1d8] sm:$0xff]  }
0x1d2e   :  { %v4717_v8 = vpop.xlane.xlu1 %4716 }
0x1d2f   :  { %v4728_v58 = vmul.f32 1.442695, %v4724_v6  ;;  %v4725_v59 = vsub.f32 %v4709_v45, %v4717_v8  ;;  %v8584_v6 = vld [vmem:[%s10578_s5 + $0x1e0] sm:$0xff]   ;;  %v8586_v8 = vld [vmem:[%s10578_s5 + $0x1f0] sm:$0xff]  }
0x1d30   :  { %v4720_v10 = vpop.xlane.xlu0 %4719 }
0x1d31   :  { %8806 = vpow2.f32 %v4728_v58  ;;  %v4730_v11 = vmul.f32 1.442695, %v4725_v59  ;;  %v4726_v30 = vsub.f32 %v4710_v22, %v4720_v10  ;;  %v8587_v58 = vld [vmem:[%s10578_s5 + $0x1f8] sm:$0xff]  }
0x1d32   :  { %v4723_v33 = vpop.xlane.xlu1 %4722 }
0x1d33   :  { %8808 = vpow2.f32 %v4730_v11  ;;  %v4732_v46 = vmul.f32 1.442695, %v4726_v30  ;;  %v4727_v16 = vsub.f32 %v4711_v60, %v4723_v33 }
0x1d35   :  { %8810 = vpow2.f32 %v4732_v46  ;;  %v4734_v27 = vmul.f32 1.442695, %v4727_v16 }
0x1d37   :  { %8812 = vpow2.f32 %v4734_v27 }
0x1d3b   :  { %v8807_v28 = vpop.eup %8806 }
0x1d3c   :  { %v4736_v47 = vsel %vm449_vm0, %v8807_v28, 0.0 }
0x1d3d   :  { %v8809_v50 = vpop.eup %8808  ;;  %4737 = vadd.xlane.f32.xlu0 %v4736_v47 }
0x1d3e   :  { %v4739_v54 = vsel %vm449_vm0, %v8809_v50, 0.0 }
0x1d3f   :  { %v8811_v13 = vpop.eup %8810  ;;  %4740 = vadd.xlane.f32.xlu1 %v4739_v54 }
0x1d40   :  { %v4742_v44 = vsel %vm449_vm0, %v8811_v13, 0.0 }
0x1d41   :  { %v8813_v56 = vpop.eup %8812  ;;  %4743 = vadd.xlane.f32.xlu0 %v4742_v44 }
0x1d42   :  { %v4745_v63 = vsel %vm449_vm0, %v8813_v56, 0.0 }
0x1d43   :  { %4746 = vadd.xlane.f32.xlu1 %v4745_v63 }
0x1dca   :  { %v4738_v61 = vpop.xlane.xlu0 %4737 }
0x1dcb   :  { %8814 = vrcp.f32 %v4738_v61 }
0x1dcc   :  { %v4741_v42 = vpop.xlane.xlu1 %4740 }
0x1dcd   :  { %8816 = vrcp.f32 %v4741_v42 }
0x1dce   :  { %v4744_v0 = vpop.xlane.xlu0 %4743 }
0x1dcf   :  { %8818 = vrcp.f32 %v4744_v0 }
0x1dd0   :  { %v4747_v3 = vpop.xlane.xlu1 %4746 }
0x1dd1   :  { %8820 = vrcp.f32 %v4747_v3 }
0x1dd5   :  { %v8815_v4 = vpop.eup %8814 }
0x1dd6   :  { %v4752_v57 = vmul.f32 %v8815_v4, %v8807_v28 }
0x1dd7   :  { %v8817_v5 = vpop.eup %8816 }
0x1dd8   :  { %v4753_v36 = vmul.f32 %v8817_v5, %v8809_v50 }
0x1dd9   :  { %v8819_v20 = vpop.eup %8818 }
0x1dda   :  { %v4756_v34 = vpack.c.bf16 %v4753_v36, %v4752_v57  ;;  %v4754_v39 = vmul.f32 %v8819_v20, %v8811_v13 }
0x1ddb   :  { %v8821_v21 = vpop.eup %8820 }
0x1ddc   :  { %v4755_v48 = vmul.f32 %v8821_v21, %v8813_v56  ;;  %8099 = vmatprep.mubr.msk.bf16.mxu0 %vm449_vm0, %v4756_v34 }
0x1dde   :  { %v4757_v24 = vpack.c.bf16 %v4755_v48, %v4754_v39 }
0x1de0   :  { %8100 = vmatmul.mubr.msk.bf16.vlgmr.msra.gmra.mrb[92].mxu0 %vm449_vm0, %v4757_v24 }
0x1de1   :  { %8104 = vmatpush3.bf16.msra.mxu0 %v8578_v14 }
0x1de2   :  { %8105 = vmatprep.subr.bf16.mxu0 %v8579_v25 }
0x1de5   :  { %8106 = vmatpush3.bf16.msra.mxu0 %v8579_v25  ;;  %v8588_v25 = vld [vmem:[%s10580_s7 + $0x70] sm:$0xff]  }
0x1de6   :  { %8131 = vmatprep.subr.bf16.mxu0 %v8580_v18 }
0x1eb3   :  { %v8101_v32 = vpop.f32.mrb[92].mxu0 }
0x1eb4   :  { %v4800_v19 = vpop.f32.mrb[93].mxu0 }
0x1eb5   :  { %v8102_v45 = vpop.f32.mrb[94].mxu0 }
0x1eb6   :  { %v4816_v22 = vpack.c.bf16 %v8102_v45, %v8101_v32  ;;  %v4803_v41 = vpop.f32.mrb[95].mxu0 }
0x1eb7   :  { %v4815_v60 = vpack.c.bf16 %v4803_v41, %v4800_v19 }
0x1eb9   :  { %8107 = vmatprep.mubr.msk.bf16.mxu0 %vm449_vm0, %v4815_v60 }
0x1eba   :  { %8108 = vmatmul.mubr.msk.bf16.vlgmr.msra.gmra.mrb[80].mxu0 %vm449_vm0, %v4816_v22 }
0x1ebb   :  { %8132 = vmatpush3.bf16.msra.mxu0 %v8580_v18  ;;  %8147 = vmatprep.mubr.bf16.mxu0 %v9827_v23  ;;  %v8585_v23 = vld [vmem:[%s10578_s5 + $0x1e8] sm:$0xff]  }
0x1ebc   :  { %8133 = vmatprep.subr.bf16.mxu0 %v8581_v40 }
0x1ebf   :  { %8134 = vmatpush3.bf16.msra.mxu0 %v8581_v40 }
0x1ec0   :  { %8135 = vmatprep.subr.bf16.mxu0 %v8582_v51 }
0x1ec3   :  { %8136 = vmatpush3.bf16.msra.mxu0 %v8582_v51 }
0x1ec4   :  { %8137 = vmatprep.subr.bf16.mxu0 %v8583_v49 }
0x1ec7   :  { %8138 = vmatpush3.bf16.msra.mxu0 %v8583_v49 }
0x1ec8   :  { %8139 = vmatprep.subr.bf16.mxu0 %v8584_v6 }
0x1ecb   :  { %8140 = vmatpush3.bf16.msra.mxu0 %v8584_v6 }
0x1ecc   :  { %8141 = vmatprep.subr.bf16.mxu0 %v8585_v23 }
0x1ecf   :  { %8142 = vmatpush3.bf16.msra.mxu0 %v8585_v23 }
0x1ed0   :  { %8143 = vmatprep.subr.bf16.mxu0 %v8586_v8 }
0x1ed3   :  { %8144 = vmatpush3.bf16.msra.mxu0 %v8586_v8 }
0x1ed4   :  { %8145 = vmatprep.subr.bf16.mxu0 %v8587_v58 }
0x1ed7   :  { %8146 = vmatpush3.bf16.msra.mxu0 %v8587_v58 }
0x1eda   :  { %8148 = vmatmul.mubr.bf16.vlgmr.msra.gmra.mrb[96].mxu0 %v9833_v35 }
0x1edb   :  { %8175 = vmatprep.mubr.msk.bf16.mxu0 %vm449_vm0, %v5235_v53 }
0x1fad   :  { %v8149_v59 = vpop.f32.mrb[96].mxu0 }
0x1fae   :  { %v5106_v10 = vpop.f32.mrb[97].mxu0 }
0x1faf   :  { %v8150_v11 = vpop.f32.mrb[98].mxu0 }
0x1fb0   :  { %v5238_v30 = vpack.c.bf16 %v8150_v11, %v8149_v59  ;;  %v5109_v33 = vpop.f32.mrb[99].mxu0  ;;  %v8589_v59 = vld [vmem:[%s10580_s7 + $0x78] sm:$0xff]  }
0x1fb1   :  { %v5237_v46 = vpack.c.bf16 %v5109_v33, %v5106_v10 }
0x1fb2   :  { %v5249_v35 = vsel %vm449_vm0, %v5238_v30, 0 }
0x1fb3   :  { %v5246_v16 = vsel %vm449_vm0, %v5237_v46, 0  ;;  %8309 = vmatprep.subr.msk.bf16.mxu0 %vm449_vm0, %v5237_v46 }
0x1fb4   :  { %8172 = vmatpush3.bf16.xpose.msra.mxu0 %v5246_v16 }
0x1fb5   :  { %8310 = vmatprep.subr.msk.bf16.mxu0 %vm449_vm0, %v5238_v30 }
0x1fbc   :  { %8174 = vmatpush3.bf16.xpose.msra.mxu0 %v5249_v35  ;;  %v8590_v35 = vld [vmem:[%s10582_s9 + $0x80] ss:$8 sps:$4 sm:$0xff]  }
0x1fbd   :  { %8179 = vmatprep.subr.bf16.mxu0 %v10101_v31 }
0x1fc3   :  { %8176 = vmatmul.mubr.msk.bf16.vlgmr.msra.gmra.mrb[100].mxu0 %vm449_vm0, %v5236_v38 }
0x1fc4   :  { %8180 = vmatpush3.bf16.msra.mxu0 %v10101_v31 }
0x1fc5   :  { %8181 = vmatprep.subr.bf16.mxu0 %v10099_v29 }
0x1fc8   :  { %8182 = vmatpush3.bf16.msra.mxu0 %v10099_v29 }
0x1fc9   :  { %8187 = vmatprep.subr.bf16.mxu0 %v8588_v25 }
0x2096   :  { %v8177_v15 = vpop.f32.mrb[100].mxu0 }
0x2097   :  { %v5285_v55 = vpop.f32.mrb[101].mxu0  ;;  %v5302_v53 = vmul.f32 0.17677669, %v8177_v15  ;;  %v8592_v15 = vld [vmem:[%s10582_s9 + $0x84] ss:$8 sps:$4 sm:$0xff]  }
0x2098   :  { %v5300_v27 = vmul.f32 0.17677669, %v5285_v55  ;;  %v8178_v28 = vpop.f32.mrb[102].mxu0  ;;  %v8593_v55 = vld [vmem:[%s10583_s10 + $0x80] ss:$8 sps:$4 sm:$0xff]   ;;  %5632 = vmatprep.subr.bf16.mxu1 %v8592_v15 }
0x2099   :  { %v5288_v47 = vpop.f32.mrb[103].mxu0  ;;  %v5303_v50 = vmul.f32 0.17677669, %v8178_v28  ;;  %v5306_v38 = vadd.f32 %v10039_v52, %v5302_v53  ;;  %v8595_v53 = vld [vmem:[%s10583_s10 + $0x84] ss:$8 sps:$4 sm:$0xff]   ;;  %5633 = vmatpush1.bf16.msra.mxu1 %v8590_v35 }
0x209a   :  { %v5301_v54 = vmul.f32 0.17677669, %v5288_v47  ;;  %v5304_v13 = vadd.f32 %v10026_v9, %v5300_v27  ;;  %v8598_v27 = vld [vmem:[%s10582_s9 + $0x94] ss:$8 sps:$4 sm:$0xff]   ;;  %v8596_v47 = vld [vmem:[%s10582_s9 + $0x90] ss:$8 sps:$4 sm:$0xff]  }
0x209b   :  { %v5307_v29 = vadd.f32 %v10046_v1, %v5303_v50  ;;  %v5314_v44 = vsel %vm449_vm0, %v5306_v38, -inf  ;;  %v8601_v28 = vld [vmem:[%s10583_s10 + $0x94] ss:$8 sps:$4 sm:$0xff]   ;;  %5634 = vmatprep.subr.bf16.mxu1 %v8598_v27  ;;  %v8599_v50 = vld [vmem:[%s10583_s10 + $0x90] ss:$8 sps:$4 sm:$0xff]  }
0x209c   :  { %v5308_v7 = vsel %vm449_vm0, %v5304_v13, -inf  ;;  %v5305_v26 = vadd.f32 %v10033_v43, %v5301_v54  ;;  %v8604_v54 = vld [vmem:[%s10582_s9 + $0xa4] ss:$8 sps:$4 sm:$0xff]  }
0x209d   :  { %5309 = vmax.xlane.f32.xlu0 %v5308_v7  ;;  %v5317_v56 = vsel %vm449_vm0, %v5307_v29, -inf  ;;  %5635 = vmatpush1.bf16.msra.mxu1 %v8596_v47  ;;  %v8602_v7 = vld [vmem:[%s10582_s9 + $0xa0] ss:$8 sps:$4 sm:$0xff]  }
0x209e   :  { %v5311_v31 = vsel %vm449_vm0, %v5305_v26, -inf  ;;  %5636 = vmatprep.subr.bf16.mxu1 %v8604_v54  ;;  %v8638_v54 = vld [vmem:[%s10584_s11 + $0xc0] sm:$0xff]  }
0x209f   :  { %5312 = vmax.xlane.f32.xlu1 %v5311_v31 }
0x20a1   :  { %5315 = vmax.xlane.f32.xlu0 %v5314_v44  ;;  %5637 = vmatpush1.bf16.msra.mxu1 %v8602_v7  ;;  %v8640_v7 = vld [vmem:[%s10584_s11 + $0xc8] sm:$0xff]  }
0x20a3   :  { %5318 = vmax.xlane.f32.xlu1 %v5317_v56 }
0x212a   :  { %v5310_v63 = vpop.xlane.xlu0 %5309 }
0x212b   :  { %v5320_v9 = vsub.f32 %v5304_v13, %v5310_v63  ;;  %v8607_v13 = vld [vmem:[%s10583_s10 + $0xa4] ss:$8 sps:$4 sm:$0xff]  }
0x212c   :  { %v5313_v14 = vpop.xlane.xlu1 %5312 }
0x212d   :  { %v5324_v61 = vmul.f32 1.442695, %v5320_v9  ;;  %v5321_v42 = vsub.f32 %v5305_v26, %v5313_v14  ;;  %v8605_v26 = vld [vmem:[%s10583_s10 + $0xa0] ss:$8 sps:$4 sm:$0xff]  }
0x212e   :  { %v5316_v43 = vpop.xlane.xlu0 %5315 }
0x212f   :  { %8822 = vpow2.f32 %v5324_v61  ;;  %v5326_v52 = vmul.f32 1.442695, %v5321_v42  ;;  %v5322_v0 = vsub.f32 %v5306_v38, %v5316_v43  ;;  %v8608_v43 = vld [vmem:[%s10582_s9 + $0xb0] ss:$8 sps:$4 sm:$0xff]  }
0x2130   :  { %v5319_v3 = vpop.xlane.xlu1 %5318 }
0x2131   :  { %8824 = vpow2.f32 %v5326_v52  ;;  %v5328_v4 = vmul.f32 1.442695, %v5322_v0  ;;  %v5323_v1 = vsub.f32 %v5307_v29, %v5319_v3  ;;  %v8611_v52 = vld [vmem:[%s10583_s10 + $0xb0] ss:$8 sps:$4 sm:$0xff]   ;;  %v8616_v0 = vld [vmem:[%s10582_s9 + $0xc4] ss:$8 sps:$4 sm:$0xff]  }
0x2132   :  { %v8619_v3 = vld [vmem:[%s10583_s10 + $0xc4] ss:$8 sps:$4 sm:$0xff]  }
0x2133   :  { %8826 = vpow2.f32 %v5328_v4  ;;  %v5330_v5 = vmul.f32 1.442695, %v5323_v1  ;;  %v8614_v4 = vld [vmem:[%s10582_s9 + $0xc0] ss:$8 sps:$4 sm:$0xff]  }
0x2134   :  { %v8617_v1 = vld [vmem:[%s10583_s10 + $0xc0] ss:$8 sps:$4 sm:$0xff]  }
0x2135   :  { %8828 = vpow2.f32 %v5330_v5  ;;  %v8622_v5 = vld [vmem:[%s10582_s9 + $0xd4] ss:$8 sps:$4 sm:$0xff]  }
0x2139   :  { %v8823_v57 = vpop.eup %8822 }
0x213a   :  { %v5332_v36 = vsel %vm449_vm0, %v8823_v57, 0.0 }
0x213b   :  { %v8825_v20 = vpop.eup %8824  ;;  %5333 = vadd.xlane.f32.xlu0 %v5332_v36  ;;  %v8620_v36 = vld [vmem:[%s10582_s9 + $0xd0] ss:$8 sps:$4 sm:$0xff]  }
0x213c   :  { %v5335_v34 = vsel %vm449_vm0, %v8825_v20, 0.0 }
0x213d   :  { %v8827_v21 = vpop.eup %8826  ;;  %5336 = vadd.xlane.f32.xlu1 %v5335_v34  ;;  %v8628_v34 = vld [vmem:[%s10582_s9 + $0xe4] ss:$8 sps:$4 sm:$0xff]  }
0x213e   :  { %v5338_v39 = vsel %vm449_vm0, %v8827_v21, 0.0 }
0x213f   :  { %v8829_v48 = vpop.eup %8828  ;;  %5339 = vadd.xlane.f32.xlu0 %v5338_v39  ;;  %v8626_v39 = vld [vmem:[%s10582_s9 + $0xe0] ss:$8 sps:$4 sm:$0xff]  }
0x2140   :  { %v5341_v24 = vsel %vm449_vm0, %v8829_v48, 0.0 }
0x2141   :  { %5342 = vadd.xlane.f32.xlu1 %v5341_v24  ;;  %v8634_v24 = vld [vmem:[%s10582_s9 + $0xf4] ss:$8 sps:$4 sm:$0xff]  }
0x21c8   :  { %v5334_v18 = vpop.xlane.xlu0 %5333 }
0x21c9   :  { %8830 = vrcp.f32 %v5334_v18  ;;  %v8632_v18 = vld [vmem:[%s10582_s9 + $0xf0] ss:$8 sps:$4 sm:$0xff]  }
0x21ca   :  { %v5337_v32 = vpop.xlane.xlu1 %5336 }
0x21cb   :  { %8832 = vrcp.f32 %v5337_v32  ;;  %v8635_v32 = vld [vmem:[%s10583_s10 + $0xf0] ss:$8 sps:$4 sm:$0xff]  }
0x21cc   :  { %v5340_v19 = vpop.xlane.xlu0 %5339 }
0x21cd   :  { %8834 = vrcp.f32 %v5340_v19 }
0x21ce   :  { %v5343_v45 = vpop.xlane.xlu1 %5342 }
0x21cf   :  { %8836 = vrcp.f32 %v5343_v45 }
0x21d3   :  { %v8831_v22 = vpop.eup %8830 }
0x21d4   :  { %v5348_v60 = vmul.f32 %v8831_v22, %v8823_v57  ;;  %v8625_v57 = vld [vmem:[%s10583_s10 + $0xd4] ss:$8 sps:$4 sm:$0xff]  }
0x21d5   :  { %v8833_v41 = vpop.eup %8832 }
0x21d6   :  { %v5349_v40 = vmul.f32 %v8833_v41, %v8825_v20  ;;  %v8623_v20 = vld [vmem:[%s10583_s10 + $0xd0] ss:$8 sps:$4 sm:$0xff]  }
0x21d7   :  { %v8835_v51 = vpop.eup %8834 }
0x21d8   :  { %v5352_v49 = vpack.c.bf16 %v5349_v40, %v5348_v60  ;;  %v5350_v23 = vmul.f32 %v8835_v51, %v8827_v21  ;;  %v8631_v21 = vld [vmem:[%s10583_s10 + $0xe4] ss:$8 sps:$4 sm:$0xff]  }
0x21d9   :  { %v8837_v6 = vpop.eup %8836 }
0x21da   :  { %v5351_v8 = vmul.f32 %v8837_v6, %v8829_v48  ;;  %8183 = vmatprep.mubr.msk.bf16.mxu0 %vm449_vm0, %v5352_v49  ;;  %v8629_v48 = vld [vmem:[%s10583_s10 + $0xe0] ss:$8 sps:$4 sm:$0xff]  }
0x21dc   :  { %v5353_v58 = vpack.c.bf16 %v5351_v8, %v5350_v23 }
0x21de   :  { %8184 = vmatmul.mubr.msk.bf16.vlgmr.msra.gmra.mrb[104].mxu0 %vm449_vm0, %v5353_v58 }
0x21df   :  { %8188 = vmatpush3.bf16.msra.mxu0 %v8588_v25  ;;  %v8637_v25 = vld [vmem:[%s10583_s10 + $0xf4] ss:$8 sps:$4 sm:$0xff]  }
0x21e0   :  { %8189 = vmatprep.subr.bf16.mxu0 %v8589_v59 }
0x21e3   :  { %8190 = vmatpush3.bf16.msra.mxu0 %v8589_v59 }
0x21e4   :  { %5782 = vmatprep.subr.bf16.mxu0 %v8595_v53 }
0x22b1   :  { %v8185_v10 = vpop.f32.mrb[104].mxu0 }
0x22b2   :  { %v5396_v11 = vpop.f32.mrb[105].mxu0 }
0x22b3   :  { %v8186_v30 = vpop.f32.mrb[106].mxu0 }
0x22b4   :  { %v5412_v33 = vpack.c.bf16 %v8186_v30, %v8185_v10  ;;  %v5399_v46 = vpop.f32.mrb[107].mxu0  ;;  %v6986_v30 = vld [vmem:[%s10581_s8 + $0x1] ss:$0 sm:$0xff] }
0x22b5   :  { %v5411_v16 = vpack.c.bf16 %v5399_v46, %v5396_v11 }
0x22b7   :  { %8191 = vmatprep.mubr.msk.bf16.mxu0 %vm449_vm0, %v5411_v16 }
0x22b8   :  { %8192 = vmatmul.mubr.msk.bf16.vlgmr.msra.gmra.mrb[80].mxu0 %vm449_vm0, %v5412_v33 }
0x22b9   :  { %5814 = vmatprep.mubr.bf16.mxu0 %v8922_v37  ;;  %5783 = vmatpush1.bf16.msra.mxu0 %v8593_v55 }
0x22ba   :  { %5784 = vmatprep.subr.bf16.mxu0 %v8601_v28 }
0x22bd   :  { %5785 = vmatpush1.bf16.msra.mxu0 %v8599_v50 }
0x22be   :  { %5786 = vmatprep.subr.bf16.mxu0 %v8607_v13  ;;  %v8639_v13 = vld [vmem:[%s10584_s11 + $0x80] sm:$0xff]  }
0x22c1   :  { %5787 = vmatpush1.bf16.msra.mxu0 %v8605_v26  ;;  %v8642_v26 = vld [vmem:[%s10584_s11 + $0xd0] sm:$0xff]  }
0x238b   :  { %v8193_v38 = vpop.f32.mrb[80].mxu0 }
0x238c   :  { %v5470_v31 = vpop.f32.mrb[81].mxu0  ;;  %v10364_v63 = vadd.f32 %v8193_v38, %v9768_v12  ;;  %v8643_v38 = vld [vmem:[%s10584_s11 + $0x90] sm:$0xff]  }
0x238d   :  { %v10361_v29 = vadd.f32 %v5470_v31, %v9758_v62  ;;  %v8194_v44 = vpop.f32.mrb[82].mxu0  ;;  %v8644_v31 = vld [vmem:[%s10584_s11 + $0xd8] sm:$0xff]  }
0x238e   :  { %v5473_v56 = vpop.f32.mrb[83].mxu0  ;;  %v10372_v61 = vadd.f32 %v8194_v44, %v9771_v17  ;;  %v5495_v62 = vmul.f32 %v10364_v63, %v10364_v63  ;;  %v8613_v17 = vld [vmem:[%s10583_s10 + $0xb4] ss:$8 sps:$4 sm:$0xff]  }
0x238f   :  { %v10367_v9 = vadd.f32 %v5473_v56, %v9761_v2  ;;  %v5493_v14 = vmul.f32 %v10361_v29, %v10361_v29  ;;  %v8610_v2 = vld [vmem:[%s10582_s9 + $0xb4] ss:$8 sps:$4 sm:$0xff]   ;;  %5788 = vmatprep.subr.bf16.mxu0 %v8613_v17  ;;  %v8646_v56 = vld [vmem:[%s10584_s11 + $0xe0] sm:$0xff]  }
0x2390   :  { %v5496_v12 = vmul.f32 %v10372_v61, %v10372_v61  ;;  %5638 = vmatprep.subr.bf16.mxu1 %v8610_v2  ;;  %5789 = vmatpush1.bf16.msra.mxu0 %v8611_v52  ;;  %v8645_v44 = vld [vmem:[%s10584_s11 + $0x98] sm:$0xff]   ;;  %v8651_v2 = vld [vmem:[%s10584_s11 + $0xb0] sm:$0xff]  }
0x2391   :  { %5497 = vadd.xlane.f32.xlu0 %v5493_v14  ;;  %v5494_v42 = vmul.f32 %v10367_v9, %v10367_v9  ;;  %5639 = vmatpush1.bf16.msra.mxu1 %v8608_v43  ;;  %v8647_v14 = vld [vmem:[%s10584_s11 + $0xa0] sm:$0xff]   ;;  %v8652_v17 = vld [vmem:[%s10584_s11 + $0xf8] sm:$0xff]  }
0x2392   :  { %5640 = vmatprep.subr.bf16.mxu1 %v8616_v0  ;;  %5790 = vmatprep.subr.bf16.mxu0 %v8619_v3  ;;  %v8653_v43 = vld [vmem:[%s10584_s11 + $0xb8] sm:$0xff]  }
0x2393   :  { %5499 = vadd.xlane.f32.xlu1 %v5494_v42  ;;  %v8648_v42 = vld [vmem:[%s10584_s11 + $0xe8] sm:$0xff]  }
0x2394   :  { %5791 = vmatpush1.bf16.msra.mxu0 %v8617_v1 }
0x2395   :  { %5501 = vadd.xlane.f32.xlu0 %v5495_v62  ;;  %5641 = vmatpush1.bf16.msra.mxu1 %v8614_v4  ;;  %v8649_v62 = vld [vmem:[%s10584_s11 + $0xa8] sm:$0xff]  }
0x2396   :  { %5642 = vmatprep.subr.bf16.mxu1 %v8622_v5  ;;  %5792 = vmatprep.subr.bf16.mxu0 %v8625_v57 }
0x2397   :  { %5503 = vadd.xlane.f32.xlu1 %v5496_v12  ;;  %v8650_v12 = vld [vmem:[%s10584_s11 + $0xf0] sm:$0xff]  }
0x2398   :  { %5793 = vmatpush1.bf16.msra.mxu0 %v8623_v20 }
0x2399   :  { %5643 = vmatpush1.bf16.msra.mxu1 %v8620_v36  ;;  %5794 = vmatprep.subr.bf16.mxu0 %v8631_v21 }
0x239a   :  { %5644 = vmatprep.subr.bf16.mxu1 %v8628_v34 }
0x239c   :  { %5795 = vmatpush1.bf16.msra.mxu0 %v8629_v48 }
0x239d   :  { %5645 = vmatpush1.bf16.msra.mxu1 %v8626_v39  ;;  %5796 = vmatprep.subr.bf16.mxu0 %v8637_v25 }
0x239e   :  { %5646 = vmatprep.subr.bf16.mxu1 %v8634_v24 }
0x23a0   :  { %5797 = vmatpush1.bf16.msra.mxu0 %v8635_v32 }
0x23a1   :  { %5647 = vmatpush1.bf16.msra.mxu1 %v8632_v18 }
0x23a2   :  { %7473 = vmatprep.subr.bf16.mxu1 %v8638_v54 }
0x241e   :  { %v5498_v19 = vpop.xlane.xlu0 %5497 }
0x241f   :  { %v5505_v45 = vmul.f32 0.0078125, %v5498_v19 }
0x2420   :  { %v5500_v22 = vpop.xlane.xlu1 %5499 }
0x2421   :  { %v5509_v41 = vadd.f32 1e-06, %v5505_v45  ;;  %v5506_v60 = vmul.f32 0.0078125, %v5500_v22 }
0x2422   :  { %v5502_v40 = vpop.xlane.xlu0 %5501 }
0x2423   :  { %8838 = vrsqrt.f32 %v5509_v41  ;;  %v5510_v51 = vadd.f32 1e-06, %v5506_v60  ;;  %v5507_v49 = vmul.f32 0.0078125, %v5502_v40 }
0x2424   :  { %v5504_v6 = vpop.xlane.xlu1 %5503 }
0x2425   :  { %8840 = vrsqrt.f32 %v5510_v51  ;;  %v5511_v23 = vadd.f32 1e-06, %v5507_v49  ;;  %v5508_v8 = vmul.f32 0.0078125, %v5504_v6 }
0x2427   :  { %v5512_v58 = vadd.f32 1e-06, %v5508_v8  ;;  %8842 = vrsqrt.f32 %v5511_v23 }
0x2429   :  { %8844 = vrsqrt.f32 %v5512_v58 }
0x242d   :  { %v8839_v59 = vpop.eup %8838 }
0x242e   :  { %v5517_v10 = vmul.f32 %v8839_v59, %v10361_v29 }
0x242f   :  { %v8841_v11 = vpop.eup %8840 }
0x2430   :  { %v5518_v33 = vmul.f32 %v8841_v11, %v10367_v9  ;;  %v5529_v16 = vmul.f32 %v6986_v30, %v5517_v10 }
0x2431   :  { %v8843_v46 = vpop.eup %8842 }
0x2432   :  { %v5530_v35 = vmul.f32 %v6986_v30, %v5518_v33  ;;  %v5519_v27 = vmul.f32 %v8843_v46, %v10364_v63 }
0x2433   :  { %v8845_v15 = vpop.eup %8844 }
0x2434   :  { %v5533_v55 = vpack.c.bf16 %v5530_v35, %v5529_v16  ;;  %v5520_v53 = vmul.f32 %v8845_v15, %v10372_v61  ;;  %v5531_v47 = vmul.f32 %v6986_v30, %v5519_v27 }
0x2436   :  { %5665 = vmatmul.mubr.bf16.vlgmr.msra.gmra.mrb[84].mxu1 %v5533_v55  ;;  %5815 = vmatmul.mubr.bf16.vlgmr.msra.gmra.mrb[108].mxu0 %v5533_v55  ;;  %v5532_v28 = vmul.f32 %v6986_v30, %v5520_v53 }
0x2437   :  { %5674 = vmatprep.mubr.bf16.mxu1 %v8922_v37  ;;  %5824 = vmatprep.mubr.bf16.mxu0 %v8922_v37  ;;  %v8641_v37 = vld [vmem:[%s10584_s11 + $0x88] sm:$0xff]  }
0x2438   :  { %v5534_v50 = vpack.c.bf16 %v5532_v28, %v5531_v47  ;;  %7474 = vmatpush3.bf16.msra.mxu1 %v8639_v13 }
0x2439   :  { %7475 = vmatprep.subr.bf16.mxu1 %v8640_v7 }
0x243c   :  { %7476 = vmatpush3.bf16.msra.mxu1 %v8641_v37 }
0x243d   :  { %7477 = vmatprep.subr.bf16.mxu1 %v8642_v26 }
0x243e   :  { %5675 = vmatmul.mubr.bf16.gmra.mrb[88].mxu1 %v5534_v50  ;;  %5825 = vmatmul.mubr.bf16.gmra.mrb[112].mxu0 %v5534_v50 }
0x2440   :  { %7478 = vmatpush3.bf16.msra.mxu1 %v8643_v38 }
0x2441   :  { %7479 = vmatprep.subr.bf16.mxu1 %v8644_v31 }
0x2444   :  { %7480 = vmatpush3.bf16.msra.mxu1 %v8645_v44 }
0x2445   :  { %7481 = vmatprep.subr.bf16.mxu1 %v8646_v56 }
0x2448   :  { %7482 = vmatpush3.bf16.msra.mxu1 %v8647_v14 }
0x2449   :  { %7483 = vmatprep.subr.bf16.mxu1 %v8648_v42 }
0x244c   :  { %7484 = vmatpush3.bf16.msra.mxu1 %v8649_v62 }
0x244d   :  { %7485 = vmatprep.subr.bf16.mxu1 %v8650_v12 }
0x2450   :  { %7486 = vmatpush3.bf16.msra.mxu1 %v8651_v2 }
0x2451   :  { %7487 = vmatprep.subr.bf16.mxu1 %v8652_v17 }
0x2454   :  { %7488 = vmatpush3.bf16.msra.mxu1 %v8653_v43 }
0x2509   :  { %v5666_v52 = vpop.f32.mrb[84].mxu1  ;;  %v5816_v0 = vpop.f32.mrb[108].mxu0 }
0x250a   :  { %v7051_v3 = vmul.f32 -1.442695, %v5666_v52  ;;  %v5668_v4 = vpop.f32.mrb[85].mxu1  ;;  %v5818_v1 = vpop.f32.mrb[109].mxu0 }
0x250b   :  { %v7052_v5 = vmul.f32 -1.442695, %v5668_v4  ;;  %v5670_v57 = vpop.f32.mrb[86].mxu1  ;;  %v5820_v36 = vpop.f32.mrb[110].mxu0 }
0x250c   :  { %8846 = vpow2.f32 %v7051_v3  ;;  %v7053_v20 = vmul.f32 -1.442695, %v5670_v57  ;;  %v5672_v34 = vpop.f32.mrb[87].mxu1  ;;  %v5822_v21 = vpop.f32.mrb[111].mxu0 }
0x250d   :  { %8848 = vpow2.f32 %v7052_v5  ;;  %v7054_v39 = vmul.f32 -1.442695, %v5672_v34 }
0x250e   :  { %8850 = vpow2.f32 %v7053_v20 }
0x250f   :  { %8852 = vpow2.f32 %v7054_v39  ;;  %v6160_v39 = vld [vmem:[%s10585_s12 + $0x8] sm:$0xff] }
0x2511   :  { %v5676_v48 = vpop.f32.mrb[88].mxu1  ;;  %v5826_v24 = vpop.f32.mrb[112].mxu0 }
0x2512   :  { %v7055_v25 = vmul.f32 -1.442695, %v5676_v48  ;;  %v5678_v18 = vpop.f32.mrb[89].mxu1  ;;  %v5828_v32 = vpop.f32.mrb[113].mxu0 }
0x2513   :  { %v7056_v19 = vmul.f32 -1.442695, %v5678_v18  ;;  %v5680_v45 = vpop.f32.mrb[90].mxu1  ;;  %v5830_v22 = vpop.f32.mrb[114].mxu0 }
0x2514   :  { %8854 = vpow2.f32 %v7055_v25  ;;  %v7057_v41 = vmul.f32 -1.442695, %v5680_v45  ;;  %v5682_v60 = vpop.f32.mrb[91].mxu1  ;;  %v5832_v40 = vpop.f32.mrb[115].mxu0  ;;  %v6162_v25 = vld [vmem:[%s10585_s12 + $0x18] sm:$0xff] }
0x2515   :  { %8856 = vpow2.f32 %v7056_v19  ;;  %v7058_v51 = vmul.f32 -1.442695, %v5682_v60  ;;  %v6164_v19 = vld [vmem:[%s10585_s12 + $0x28] sm:$0xff] }
0x2516   :  { %v8847_v49 = vpop.eup %8846  ;;  %8858 = vpow2.f32 %v7057_v41  ;;  %v6166_v41 = vld [vmem:[%s10585_s12 + $0x38] sm:$0xff] }
0x2517   :  { %v8849_v6 = vpop.eup %8848  ;;  %v5859_v23 = vadd.f32 1.0, %v8847_v49  ;;  %8860 = vpow2.f32 %v7058_v51  ;;  %v6168_v51 = vld [vmem:[%s10585_s12 + $0x48] sm:$0xff] }
0x2518   :  { %v8851_v8 = vpop.eup %8850  ;;  %v5860_v58 = vadd.f32 1.0, %v8849_v6  ;;  %v6169_v6 = vld [vmem:[%s10585_s12 + $0x50] sm:$0xff] }
0x2519   :  { %v8853_v59 = vpop.eup %8852  ;;  %8862 = vrcp.f32 %v5859_v23  ;;  %v5861_v10 = vadd.f32 1.0, %v8851_v8  ;;  %v6170_v23 = vld [vmem:[%s10585_s12 + $0x58] sm:$0xff] }
0x251a   :  { %8864 = vrcp.f32 %v5860_v58  ;;  %v5862_v11 = vadd.f32 1.0, %v8853_v59  ;;  %v8263_v8 = vpack.c.bf16 %v6170_v23, %v6169_v6  ;;  %v6171_v58 = vld [vmem:[%s10585_s12 + $0x60] sm:$0xff]  ;;  %v6172_v59 = vld [vmem:[%s10585_s12 + $0x68] sm:$0xff] }
0x251b   :  { %8866 = vrcp.f32 %v5861_v10  ;;  %v8266_v10 = vpack.c.bf16 %v6172_v59, %v6171_v58 }
0x251c   :  { %8868 = vrcp.f32 %v5862_v11  ;;  %v6173_v11 = vld [vmem:[%s10585_s12 + $0x70] sm:$0xff] }
0x251e   :  { %v8855_v30 = vpop.eup %8854 }
0x251f   :  { %v8857_v33 = vpop.eup %8856  ;;  %v5863_v46 = vadd.f32 1.0, %v8855_v30  ;;  %v6174_v30 = vld [vmem:[%s10585_s12 + $0x78] sm:$0xff] }
0x2520   :  { %v8859_v16 = vpop.eup %8858  ;;  %v5864_v35 = vadd.f32 1.0, %v8857_v33  ;;  %v8269_v33 = vpack.c.bf16 %v6174_v30, %v6173_v11 }
0x2521   :  { %v8861_v15 = vpop.eup %8860  ;;  %8870 = vrcp.f32 %v5863_v46  ;;  %v5865_v55 = vadd.f32 1.0, %v8859_v16 }
0x2522   :  { %8872 = vrcp.f32 %v5864_v35  ;;  %v5866_v53 = vadd.f32 1.0, %v8861_v15 }
0x2523   :  { %v8863_v27 = vpop.eup %8862  ;;  %8874 = vrcp.f32 %v5865_v55 }
0x2524   :  { %v8865_v28 = vpop.eup %8864  ;;  %v5883_v47 = vmul.f32 %v8863_v27, %v5666_v52  ;;  %8876 = vrcp.f32 %v5866_v53 }
0x2525   :  { %v8867_v50 = vpop.eup %8866  ;;  %v5884_v54 = vmul.f32 %v8865_v28, %v5668_v4 }
0x2526   :  { %v8869_v13 = vpop.eup %8868  ;;  %v5891_v7 = vmul.f32 %v5883_v47, %v5816_v0  ;;  %v5885_v37 = vmul.f32 %v8867_v50, %v5670_v57 }
0x2527   :  { %v5892_v26 = vmul.f32 %v5884_v54, %v5818_v1  ;;  %v5886_v38 = vmul.f32 %v8869_v13, %v5672_v34  ;;  %v8925_v34 = vmov 0.0  }
0x2528   :  { %v5893_v31 = vmul.f32 %v5885_v37, %v5820_v36  ;;  %v8923_v36 = vmov 0.0|0.0   ;;  %8238 = vmatprep.mubr.msk.f32.mxu0 %vm8924_vm1, %v8925_v34 }
0x2529   :  { %v5894_v44 = vmul.f32 %v5886_v38, %v5822_v21  ;;  %8241 = vmatprep.subr.bf16.mxu1 %v8923_v36  ;;  %8247 = vmatprep.subr.bf16.mxu0 %v8923_v36  ;;  %v6159_v21 = vld [vmem:[%s10585_s12] sm:$0xff] }
0x252a   :  { %v5899_v56 = vpack.c.bf16 %v5893_v31, %v5891_v7 }
0x252b   :  { %v8871_v14 = vpop.eup %8870  ;;  %v5900_v42 = vpack.c.bf16 %v5894_v44, %v5892_v26 }
0x252c   :  { %v8873_v62 = vpop.eup %8872  ;;  %v5887_v12 = vmul.f32 %v8871_v14, %v5676_v48  ;;  %v6161_v48 = vld [vmem:[%s10585_s12 + $0x10] sm:$0xff]  ;;  %v7108_v14 = vld [vmem:[#allocation2] ss:$0 sm:$0xff] }
0x252d   :  { %v8875_v2 = vpop.eup %8874  ;;  %v5888_v17 = vmul.f32 %v8873_v62, %v5678_v18  ;;  %6064 = vmatprep.mubr.bf16.mxu1 %v5900_v42  ;;  %v8251_v18 = vpack.c.bf16 %v6162_v25, %v6161_v48 }
0x252e   :  { %v8877_v43 = vpop.eup %8876  ;;  %v5895_v52 = vmul.f32 %v5887_v12, %v5826_v24  ;;  %v5889_v3 = vmul.f32 %v8875_v2, %v5680_v45  ;;  %6065 = vmatmul.mubr.bf16.vlgmr.msra.gmra.mrb[92].mxu1 %v5899_v56  ;;  %v8248_v24 = vpack.c.bf16 %v6160_v39, %v6159_v21 }
0x252f   :  { %v5896_v4 = vmul.f32 %v5888_v17, %v5828_v32  ;;  %v5890_v5 = vmul.f32 %v8877_v43, %v5682_v60  ;;  %v6163_v32 = vld [vmem:[%s10585_s12 + $0x20] sm:$0xff] }
0x2530   :  { %v5897_v0 = vmul.f32 %v5889_v3, %v5830_v22  ;;  %8249 = vmatpush3.bf16.msra.mxu0 %v8248_v24  ;;  %v8254_v45 = vpack.c.bf16 %v6164_v19, %v6163_v32  ;;  %v6165_v22 = vld [vmem:[%s10585_s12 + $0x30] sm:$0xff]  ;;  %v6254_v3 = vld [vmem:[%s10587_s14] sm:$0x3]  ;;  %s8926_s14 = smov [#allocation3]  }
0x2531   :  { %v5898_v57 = vmul.f32 %v5890_v5, %v5832_v40  ;;  %8250 = vmatprep.subr.bf16.mxu0 %v8923_v36  ;;  %v8257_v60 = vpack.c.bf16 %v6166_v41, %v6165_v22  ;;  %v6167_v40 = vld [vmem:[%s10585_s12 + $0x40] sm:$0xff] }
0x2532   :  { %v5901_v1 = vpack.c.bf16 %v5897_v0, %v5895_v52  ;;  %v8260_v49 = vpack.c.bf16 %v6168_v51, %v6167_v40 }
0x2533   :  { %v5902_v20 = vpack.c.bf16 %v5898_v57, %v5896_v4 }
0x2534   :  { %8252 = vmatpush3.bf16.msra.mxu0 %v8251_v18 }
0x2535   :  { %6072 = vmatprep.mubr.bf16.mxu1 %v5902_v20  ;;  %8253 = vmatprep.subr.bf16.mxu0 %v8923_v36 }
0x2536   :  { %6073 = vmatmul.mubr.bf16.gmra.mrb[96].mxu1 %v5901_v1 }
0x2537   :  { %8203 = vmatprep.mubr.msk.f32.mxu1 %vm8924_vm1, %v8925_v34 }
0x2538   :  { %8255 = vmatpush3.bf16.msra.mxu0 %v8254_v45 }
0x2539   :  { %8256 = vmatprep.subr.bf16.mxu0 %v8923_v36 }
0x253c   :  { %8258 = vmatpush3.bf16.msra.mxu0 %v8257_v60 }
0x253d   :  { %8259 = vmatprep.subr.bf16.mxu0 %v8923_v36 }
0x2540   :  { %8261 = vmatpush3.bf16.msra.mxu0 %v8260_v49 }
0x2541   :  { %8262 = vmatprep.subr.bf16.mxu0 %v8923_v36 }
0x2544   :  { %8264 = vmatpush3.bf16.msra.mxu0 %v8263_v8 }
0x2545   :  { %8265 = vmatprep.subr.bf16.mxu0 %v8923_v36 }
0x2548   :  { %8267 = vmatpush3.bf16.msra.mxu0 %v8266_v10 }
0x2549   :  { %8268 = vmatprep.subr.bf16.mxu0 %v8923_v36 }
0x254c   :  { %8270 = vmatpush3.bf16.msra.mxu0 %v8269_v33 }
0x2601   :  { %v7489_v46 = vpop.f32.mrb[92].mxu1 }
0x2602   :  { %v7490_v16 = vpop.f32.mrb[93].mxu1 }
0x2603   :  { %v7491_v35 = vadd.f32 %v7490_v16, %v7489_v46  ;;  %v7492_v15 = vpop.f32.mrb[94].mxu1 }
0x2604   :  { %v7493_v55 = vpop.f32.mrb[95].mxu1 }
0x2605   :  { %v7494_v53 = vadd.f32 %v7493_v55, %v7492_v15  ;;  %v6081_v27 = vadd.f32 %v7491_v35, %v10361_v29  ;;  %v6085_v29 = vld [vmem:[%s10575_s2] sm:$0x3] }
0x2607   :  { %v6082_v28 = vadd.f32 %v7494_v53, %v10367_v9 }
0x2609   :  { %v8242_v47 = vpack.c.bf16 %v6082_v28, %v6081_v27  ;;  %v7495_v50 = vpop.f32.mrb[96].mxu1 }
0x260a   :  { %v7496_v54 = vpop.f32.mrb[97].mxu1 }
0x260b   :  { %v7497_v13 = vadd.f32 %v7496_v54, %v7495_v50  ;;  %v7498_v7 = vpop.f32.mrb[98].mxu1  ;;  %8243 = vmatpush3.bf16.msra.mxu1 %v8242_v47 }
0x260c   :  { %v7499_v37 = vpop.f32.mrb[99].mxu1  ;;  %8244 = vmatprep.subr.bf16.mxu1 %v8923_v36 }
0x260d   :  { %v7500_v26 = vadd.f32 %v7499_v37, %v7498_v7  ;;  %v6083_v38 = vadd.f32 %v7497_v13, %v10364_v63 }
0x260f   :  { %v6084_v31 = vadd.f32 %v7500_v26, %v10372_v61 }
0x2611   :  { %v8245_v44 = vpack.c.bf16 %v6084_v31, %v6083_v38 }
0x2613   :  { %8246 = vmatpush3.bf16.msra.mxu1 %v8245_v44 }
0x2616   :  { %8204 = vmatmul.mubr.msk.f32.vlgmr.msra.gmra.mrb[100].mxu1 %vm449_vm0, %v6085_v29 }
0x26e9   :  { %v6155_v9 = vpop.f32.mrb[100].mxu1 }
0x26ea   :  { %8239 = vmatmul.mubr.f32.vlgmr.msra.gmra.mrb[116].mxu0 %v6155_v9  ;;  %v8205_v56 = vpop.f32.mrb[101].mxu1 }
0x27bd   :  { %v6248_v42 = vpop.f32.mrb[116].mxu0 }
0x27be   :  { %v6249_v62 = vadd.f32 %v7108_v14, %v6248_v42  ;;  %v8240_v12 = vpop.f32.mrb[117].mxu0 }
0x27c0   :  { %v6258_v2 = vand.u32 2147483647, %v6249_v62  ;;  %6253 = vst.msk [vmem:[%s10588_s15] sm:$0x3] %vm6252_vm2, %v6249_v62  ;;  %v6255_v5 = vmax.f32 %v6249_v62, 0.0  ;;  %v6256_v0 = vmul.f32 %v6254_v3, %v6249_v62  ;;  %s6295_s15 = sshll.u32 %s8926_s14, 4  ;;  %s6296_s15 = int_to_ptr.vmem [resolvable:$true] %s6295_s15 }
0x27c1   :  { %s8898_s18 = scalar_lea.vmem %s6296_s15, 16  ;;  %s8902_s19 = scalar_lea.vmem %s6296_s15, 32 }
0x27c2   :  { %v6259_v63 = vsub.f32 0.0, %v6258_v2  ;;  %v6257_v34 = vsub.f32 %v6255_v5, %v6256_v0  ;;  %p8899_p0 = scmp.ne.s32.totalorder %s6296_s15, %s8898_s18  ;;  %p8903_p1 = scmp.lt.s32.totalorder %s6296_s15, %s6296_s15 }
0x27c3   :  { %p8904_p2 = scmp.lt.s32.totalorder %s8902_s19, %s8898_s18 }
0x27c4   :  { %v6260_v61 = vmul.f32 1.442695, %v6259_v63 }
0x27c5   :  { %p8905_p3 = por %p8904_p2, %p8903_p1 }
0x27c6   :  { %8878 = vpow2.f32 %v6260_v61 }
0x27c7   :  { %p8906_p4 = pnand %p8905_p3, %p8899_p0 }
0x27d0   :  { %v8879_v17 = vpop.eup %8878 }
0x27d1   :  { %v6262_v43 = vadd.f32 1.0, %v8879_v17  ;;  %v6265_v52 = vmul.f32 -0.5, %v8879_v17  ;;  %v6268_v57 = vand.u32 2147483647, %v8879_v17 }
0x27d3   :  { %8880 = vlog2.f32 %v6262_v43  ;;  %v6266_v4 = vadd.f32 1.0, %v6265_v52  ;;  %vm6269_vm3 = vcmp.lt.f32.partialorder %v6268_v57, 0.0004427343 }
0x27d5   :  { %v6267_v36 = vmul.f32 %v8879_v17, %v6266_v4 }
0x27dd   :  { %v8881_v1 = vpop.eup %8880 }
0x27de   :  { %v6264_v20 = vmul.f32 0.6931472, %v8881_v1 }
0x27e0   :  { %v6270_v21 = vsel %vm6269_vm3, %v6267_v36, %v6264_v20 }
0x27e1   :  { %v6271_v39 = vadd.f32 %v6270_v21, %v6257_v34 }
0x27e3   :  { %v6272_v48 = vsel %vm6252_vm2, %v6271_v39, 0.0 }
0x27e4   :  { %6273 = vadd.xlane.f32.xlu0 %v6272_v48 }
0x2871   :  { %v6274_v24 = vpop.xlane.xlu0 %6273 }
0x2872   :  { %v6275_v25 = vrot.slane %v6274_v24, 4 }
0x2874   :  { %v6276_v18 = vadd.f32 %v6275_v25, %v6274_v24 }
0x2876   :  { %v6277_v32 = vrot.slane %v6276_v18, 2 }
0x2878   :  { %v6278_v19 = vadd.f32 %v6277_v32, %v6276_v18 }
0x287a   :  { %v6279_v45 = vrot.slane %v6278_v19, 1 }
0x287c   :  { %v6280_v22 = vadd.f32 %v6279_v45, %v6278_v19 }
0x287e   :  { %8311 = vpush %v6280_v22 }
0x28af   :  { %s8312_s17 = spop %8311 }
0x28b0   :  { %v6282_v41 = vstv %s8312_s17 }
0x28b1   :  { %v6284_v60 = vmul.f32 0.5, %v6282_v41 }
0x28b3   :  { %6286 = vst.msk [vmem:[#allocation3] sm:$0x1] %vm6285_vm4, %v6284_v60 }
0x28b4   :  { %8909 = shalt.err (!%p8906_p4)
}
0x28b5   :  { %s8910_s5 = scalar_lea.hbm %s10589_s16, 16 }
0x28b6   :  { %p8911_p5 = scmp.ne.s32.totalorder %s10589_s16, %s8910_s5  ;;  %p8914_p6 = scmp.lt.u32.totalorder %s8910_s5, %s10589_s16 }
0x28b8   :  { %p8916_p7 = pnand %p8914_p6, %p8911_p5 }
0x28ba   :  { %8919 = shalt.err (!%p8916_p7)
}
0x28bb   :  { %6298 = dma.vmem_to_hbm [thread:$0]  %s6296_s15, 16, %s10589_s16, [#allocation4]  }
0x28bc   :  { %8920 = dma.done.wait [#allocation4], 16  }
0x28bd   :  { %8921 = vsyncadd [#allocation4], 4294967280 }
0x28be   :  { %6304 = vsyncpa [#allocation4], 1 }

</bundles_post_ra>
